<compile_context>
chip_gen: v5e
topology: v5e:2x2
jax: 0.10.0
libtpu: 0.0.40
codegen_flags: <defaults>
</compile_context>

<pallas_src>
import functools

import numpy as np
import jax
import jax.numpy as jnp
from jax.experimental import pallas as pl
from jax.experimental.pallas import tpu as pltpu


def _bilinear_matrix(in_size: int, scale: int) -> np.ndarray:
    """Row-stochastic (out, in) matrix matching PyTorch bilinear, align_corners=False."""
    out_size = in_size * scale
    a = np.zeros((out_size, in_size), dtype=np.float32)
    for o in range(out_size):
        src = max((o + 0.5) / scale - 0.5, 0.0)
        i0 = min(int(np.floor(src)), in_size - 1)
        i1 = min(i0 + 1, in_size - 1)
        w1 = src - i0
        a[o, i0] += 1.0 - w1
        a[o, i1] += w1
    return a


@functools.lru_cache(maxsize=None)
def _deconv_constants(H, W, K, scale):
    """Fused upsample+pad+flatten matrix M and per-kw width-edge masks (built once)."""
    P = K // 2
    OH, OW = H * scale, W * scale
    RH = OH + K + 1                         # OH + P pad top/bottom + 1 guard row each
    FL = RH * OW
    FLP = -(-FL // 128) * 128               # lane-pad flat buffer to a 128 multiple

    a_h = _bilinear_matrix(H, scale)        # (OH, H)
    a_w = _bilinear_matrix(W, scale)        # (OW, W)
    ah = np.zeros((RH, H), dtype=np.float32)
    ah[1 + P:1 + P + OH, :] = a_h           # vertical conv padding folded in as zero rows

    # M[h*W + w, r*OW + ow] = ah[r, h] * a_w[ow, w]  ->  flat = x_flat @ M
    m = np.zeros((H * W, FLP), dtype=np.float32)
    m[:, :FL] = np.kron(ah.T, a_w.T)

    # Per-kw horizontal-padding masks on the flattened (OH*OW) lane axis.
    ow_idx = np.arange(OH * OW) % OW
    mask = np.zeros((K, OH * OW), dtype=np.float32)
    for kw in range(K):
        col = ow_idx + kw - P
        mask[kw] = ((col >= 0) & (col < OW)).astype(np.float32)
    return m, mask


def mydeconv_forward(x_nchw, weight, bias, *, kernel_size=5, scale_factor=2):
    """weight: (Cout, Cin, K, K) like torch Conv2d; bias: (Cout,). Returns NCHW."""
    N, Cin, H, W = x_nchw.shape
    Cout = weight.shape[0]
    K = kernel_size
    P = K // 2
    OH, OW = H * scale_factor, W * scale_factor
    OHW = OH * OW
    RH = OH + K + 1
    FL = RH * OW
    FLP = -(-FL // 128) * 128               # lane-padded flat length
    Cpad = -(-Cin // 8) * 8                 # 8-sublane-aligned channel group
    KKC = K * K * Cpad                      # im2col contraction size

    m_np, mask_np = _deconv_constants(H, W, K, scale_factor)
    m = jnp.asarray(m_np)                   # (H*W, FLP)
    masks = jnp.asarray(mask_np)            # (K, OHW)

    # Free reshape + tiny zero-pad of channels up to a full 8-sublane group.
    x3 = x_nchw.reshape(N, Cin, H * W)
    if Cpad > Cin:
        x3 = jnp.pad(x3, ((0, 0), (0, Cpad - Cin), (0, 0)))

    # (Cout, Cin, K, K) -> (Cout, K*K*Cpad), column order (kh, kw, c), c zero-padded.
    w_perm = jnp.transpose(weight, (0, 2, 3, 1)).reshape(Cout, K * K, Cin)
    if Cpad > Cin:
        w_perm = jnp.pad(w_perm, ((0, 0), (0, 0), (0, Cpad - Cin)))
    w_mat = w_perm.reshape(Cout, KKC).astype(jnp.float32)
    b2 = bias.reshape(Cout, 1).astype(jnp.float32)

    def kernel(x_ref, m_ref, wm_ref, b_ref, mask_ref, o_ref, flat_ref, col_ref):
        # --- fused bilinear upsample + vertical zero-pad + lane-flatten: 1 matmul ---
        flat_ref[...] = jnp.dot(x_ref[0].astype(jnp.float32), m_ref[...],
                                preferred_element_type=jnp.float32)        # (Cpad, FLP)

        # --- im2col: K*K static lane-window slices, width-edge masked, ---
        # --- stored as full 8-sublane-aligned (Cpad, OHW) tiles.        ---
        for kh in range(K):
            for kw in range(K):
                start = (kh + 1) * OW + (kw - P)
                win = flat_ref[:, start:start + OHW]                       # (Cpad, OHW)
                mk = mask_ref[kw:kw + 1, :]                                # per-iter load (no hoist)
                t = kh * K + kw
                col_ref[t * Cpad:(t + 1) * Cpad, :] = win * mk

        # --- single conv matmul (contraction K*K*Cpad) + bias + LeakyReLU(0.1) ---
        acc = jnp.dot(wm_ref[...], col_ref[...],
                      preferred_element_type=jnp.float32)                  # (Cout, OHW)
        acc = acc + b_ref[...]
        acc = jnp.where(acc > 0, acc, 0.1 * acc)
        o_ref[0] = acc.astype(o_ref.dtype)                                 # lane-dense store

    out2 = pl.pallas_call(
        kernel,
        out_shape=jax.ShapeDtypeStruct((N, Cout, OHW), x_nchw.dtype),
        grid_spec=pltpu.PrefetchScalarGridSpec(
            num_scalar_prefetch=0,
            grid=(N,),
            in_specs=[
                pl.BlockSpec((1, Cpad, H * W), lambda n: (n, 0, 0)),   # x (per batch)
                pl.BlockSpec((H * W, FLP), lambda n: (0, 0)),          # fused upsample matrix
                pl.BlockSpec((Cout, KKC), lambda n: (0, 0)),           # conv weights (im2col)
                pl.BlockSpec((Cout, 1), lambda n: (0, 0)),             # bias
                pl.BlockSpec((K, OHW), lambda n: (0, 0)),              # width-pad masks
            ],
            out_specs=pl.BlockSpec((1, Cout, OHW), lambda n: (n, 0, 0)),
            scratch_shapes=[
                pltpu.VMEM((Cpad, FLP), jnp.float32),                  # lane-flattened padded image
                pltpu.VMEM((KKC, OHW), jnp.float32),                   # im2col matrix
            ],
        ),
        compiler_params=pltpu.CompilerParams(dimension_semantics=("parallel",)),
    )(x3, m, w_mat, b2, masks)

    # TODO(synk): for N==1 on v7x add a second parallel grid axis splitting OHW
    # into 128-multiple halves so both TensorCores are used.
    return out2.reshape(N, Cout, OH, OW)   # free reshape to NCHW


# ---------------------------- plain-JAX reference ----------------------------
def _reference(x_nchw, weight, bias, *, kernel_size=5, scale_factor=2):
    N, Cin, H, W = x_nchw.shape
    Cout = weight.shape[0]
    K = kernel_size
    P = K // 2
    OH, OW = H * scale_factor, W * scale_factor

    def coords(in_size):
        o = np.arange(in_size * scale_factor)
        src = np.maximum((o + 0.5) / scale_factor - 0.5, 0.0)
        i0 = np.minimum(np.floor(src).astype(np.int32), in_size - 1)
        i1 = np.minimum(i0 + 1, in_size - 1)
        w1 = (src - i0).astype(np.float32)
        return i0, i1, w1

    h0, h1, wh = coords(H)
    w0, w1, ww = coords(W)
    xh = (x_nchw[:, :, h0, :] * (1.0 - wh)[None, None, :, None]
          + x_nchw[:, :, h1, :] * wh[None, None, :, None])
    up = (xh[:, :, :, w0] * (1.0 - ww)[None, None, None, :]
          + xh[:, :, :, w1] * ww[None, None, None, :])
    up_pad = jnp.pad(up, ((0, 0), (0, 0), (P, P), (P, P)))
    out = jnp.broadcast_to(bias[None, :, None, None], (N, Cout, OH, OW))
    for kh in range(K):
        for kw in range(K):
            out = out + jnp.einsum('oc,nchw->nohw', weight[:, :, kh, kw],
                                   up_pad[:, :, kh:kh + OH, kw:kw + OW])
    return jnp.where(out > 0, out, 0.1 * out)


if __name__ == "__main__":
    N, Cin, Cout, H, W = 2, 4, 8, 16, 16
    K, SCALE = 5, 2

    key = jax.random.PRNGKey(0)
    kx, kwt, kb = jax.random.split(key, 3)
    x = jax.random.normal(kx, (N, Cin, H, W), dtype=jnp.float32)
    weight = 0.1 * jax.random.normal(kwt, (Cout, Cin, K, K), dtype=jnp.float32)
    bias = 0.1 * jax.random.normal(kb, (Cout,), dtype=jnp.float32)

    fwd = jax.jit(functools.partial(mydeconv_forward,
                                    kernel_size=K, scale_factor=SCALE))
    out = jax.block_until_ready(fwd(x, weight, bias))

    ref = jax.block_until_ready(
        _reference(x, weight, bias, kernel_size=K, scale_factor=SCALE))

    assert out.shape == (N, Cout, H * SCALE, W * SCALE), out.shape
    np.testing.assert_allclose(np.asarray(out), np.asarray(ref), atol=2e-4, rtol=2e-4)

    print("KERNEL_OK")
</pallas_src>

<mosaic_0001>
module attributes {stable_mosaic.version = 11 : i64} {
  func.func @kernel(%arg0: i32, %arg1: memref<1x8x256xf32, #tpu.memory_space<vmem>>, %arg2: memref<256x1280xf32, #tpu.memory_space<vmem>>, %arg3: memref<8x200xf32, #tpu.memory_space<vmem>>, %arg4: memref<8x1xf32, #tpu.memory_space<vmem>>, %arg5: memref<5x1024xf32, #tpu.memory_space<vmem>>, %arg6: memref<1x8x1024xf32, #tpu.memory_space<vmem>>, %arg7: memref<8x1280xf32, #tpu.memory_space<vmem>>, %arg8: memref<200x1024xf32, #tpu.memory_space<vmem>>) attributes {dimension_semantics = [#tpu.dimension_semantics<parallel>], iteration_bounds = array<i64: 2>, scalar_prefetch = 0 : i64, scratch_operands = 2 : i64, tpu.core_type = #tpu.core_type<tc>, window_params = [{transform_indices = @transform_0, window_bounds = array<i64: 1, 8, 256>}, {pipeline_mode = #tpu.pipeline_mode<synchronous>, transform_indices = @transform_1, window_bounds = array<i64: 256, 1280>}, {pipeline_mode = #tpu.pipeline_mode<synchronous>, transform_indices = @transform_2, window_bounds = array<i64: 8, 200>}, {pipeline_mode = #tpu.pipeline_mode<synchronous>, transform_indices = @transform_3, window_bounds = array<i64: 8, 1>}, {pipeline_mode = #tpu.pipeline_mode<synchronous>, transform_indices = @transform_4, window_bounds = array<i64: 5, 1024>}, {transform_indices = @transform_5, window_bounds = array<i64: 1, 8, 1024>}]} {
    %c0 = arith.constant 0 : index
    %c0_0 = arith.constant 0 : index
    %c0_1 = arith.constant 0 : index
    %0 = vector.load %arg1[%c0, %c0_0, %c0_1] : memref<1x8x256xf32, #tpu.memory_space<vmem>>, vector<1x8x256xf32>
    %1 = vector.shape_cast %0 : vector<1x8x256xf32> to vector<8x256xf32>
    %c0_2 = arith.constant 0 : index
    %c0_3 = arith.constant 0 : index
    %2 = vector.load %arg2[%c0_2, %c0_3] : memref<256x1280xf32, #tpu.memory_space<vmem>>, vector<256x1280xf32>
    %cst = arith.constant dense<0.000000e+00> : vector<8x1280xf32>
    %3 = tpu.matmul %1, %2, %cst {dimension_numbers = #tpu.dot_dimension_numbers<[1], [0], [0], [1], [0, 0, 1, 1], [], []>} : vector<8x256xf32>, vector<256x1280xf32>, vector<8x1280xf32> -> vector<8x1280xf32>
    %c0_4 = arith.constant 0 : index
    %c0_5 = arith.constant 0 : index
    %4 = vector.load %arg7[%c0_4, %c0_5] : memref<8x1280xf32, #tpu.memory_space<vmem>>, vector<8x1280xf32>
    tpu.vector_store %arg7[%c0_4, %c0_5], %3 {strides = array<i32>} : memref<8x1280xf32, #tpu.memory_space<vmem>>, vector<8x1280xf32>,
    %c0_6 = arith.constant 0 : index
    %c30 = arith.constant 30 : index
    %5 = vector.load %arg7[%c0_6, %c30] : memref<8x1280xf32, #tpu.memory_space<vmem>>, vector<8x1024xf32>
    %c0_7 = arith.constant 0 : index
    %c0_8 = arith.constant 0 : index
    %6 = vector.load %arg5[%c0_7, %c0_8] : memref<5x1024xf32, #tpu.memory_space<vmem>>, vector<1x1024xf32>
    %7 = vector.broadcast %6 : vector<1x1024xf32> to vector<8x1024xf32>
    %8 = arith.mulf %5, %7 : vector<8x1024xf32>
    %c0_9 = arith.constant 0 : index
    %c0_10 = arith.constant 0 : index
    %9 = vector.load %arg8[%c0_9, %c0_10] : memref<200x1024xf32, #tpu.memory_space<vmem>>, vector<8x1024xf32>
    tpu.vector_store %arg8[%c0_9, %c0_10], %8 {strides = array<i32>} : memref<200x1024xf32, #tpu.memory_space<vmem>>, vector<8x1024xf32>,
    %c0_11 = arith.constant 0 : index
    %c31 = arith.constant 31 : index
    %10 = vector.load %arg7[%c0_11, %c31] : memref<8x1280xf32, #tpu.memory_space<vmem>>, vector<8x1024xf32>
    %c1 = arith.constant 1 : index
    %c0_12 = arith.constant 0 : index
    %11 = vector.load %arg5[%c1, %c0_12] : memref<5x1024xf32, #tpu.memory_space<vmem>>, vector<1x1024xf32>
    %12 = vector.broadcast %11 : vector<1x1024xf32> to vector<8x1024xf32>
    %13 = arith.mulf %10, %12 : vector<8x1024xf32>
    %c8 = arith.constant 8 : index
    %c0_13 = arith.constant 0 : index
    %14 = vector.load %arg8[%c8, %c0_13] : memref<200x1024xf32, #tpu.memory_space<vmem>>, vector<8x1024xf32>
    tpu.vector_store %arg8[%c8, %c0_13], %13 {strides = array<i32>} : memref<200x1024xf32, #tpu.memory_space<vmem>>, vector<8x1024xf32>,
    %c0_14 = arith.constant 0 : index
    %c32 = arith.constant 32 : index
    %15 = vector.load %arg7[%c0_14, %c32] : memref<8x1280xf32, #tpu.memory_space<vmem>>, vector<8x1024xf32>
    %c2 = arith.constant 2 : index
    %c0_15 = arith.constant 0 : index
    %16 = vector.load %arg5[%c2, %c0_15] : memref<5x1024xf32, #tpu.memory_space<vmem>>, vector<1x1024xf32>
    %17 = vector.broadcast %16 : vector<1x1024xf32> to vector<8x1024xf32>
    %18 = arith.mulf %15, %17 : vector<8x1024xf32>
    %c16 = arith.constant 16 : index
    %c0_16 = arith.constant 0 : index
    %19 = vector.load %arg8[%c16, %c0_16] : memref<200x1024xf32, #tpu.memory_space<vmem>>, vector<8x1024xf32>
    tpu.vector_store %arg8[%c16, %c0_16], %18 {strides = array<i32>} : memref<200x1024xf32, #tpu.memory_space<vmem>>, vector<8x1024xf32>,
    %c0_17 = arith.constant 0 : index
    %c33 = arith.constant 33 : index
    %20 = vector.load %arg7[%c0_17, %c33] : memref<8x1280xf32, #tpu.memory_space<vmem>>, vector<8x1024xf32>
    %c3 = arith.constant 3 : index
    %c0_18 = arith.constant 0 : index
    %21 = vector.load %arg5[%c3, %c0_18] : memref<5x1024xf32, #tpu.memory_space<vmem>>, vector<1x1024xf32>
    %22 = vector.broadcast %21 : vector<1x1024xf32> to vector<8x1024xf32>
    %23 = arith.mulf %20, %22 : vector<8x1024xf32>
    %c24 = arith.constant 24 : index
    %c0_19 = arith.constant 0 : index
    %24 = vector.load %arg8[%c24, %c0_19] : memref<200x1024xf32, #tpu.memory_space<vmem>>, vector<8x1024xf32>
    tpu.vector_store %arg8[%c24, %c0_19], %23 {strides = array<i32>} : memref<200x1024xf32, #tpu.memory_space<vmem>>, vector<8x1024xf32>,
    %c0_20 = arith.constant 0 : index
    %c34 = arith.constant 34 : index
    %25 = vector.load %arg7[%c0_20, %c34] : memref<8x1280xf32, #tpu.memory_space<vmem>>, vector<8x1024xf32>
    %c4 = arith.constant 4 : index
    %c0_21 = arith.constant 0 : index
    %26 = vector.load %arg5[%c4, %c0_21] : memref<5x1024xf32, #tpu.memory_space<vmem>>, vector<1x1024xf32>
    %27 = vector.broadcast %26 : vector<1x1024xf32> to vector<8x1024xf32>
    %28 = arith.mulf %25, %27 : vector<8x1024xf32>
    %c32_22 = arith.constant 32 : index
    %c0_23 = arith.constant 0 : index
    %29 = vector.load %arg8[%c32_22, %c0_23] : memref<200x1024xf32, #tpu.memory_space<vmem>>, vector<8x1024xf32>
    tpu.vector_store %arg8[%c32_22, %c0_23], %28 {strides = array<i32>} : memref<200x1024xf32, #tpu.memory_space<vmem>>, vector<8x1024xf32>,
    %c0_24 = arith.constant 0 : index
    %c62 = arith.constant 62 : index
    %30 = vector.load %arg7[%c0_24, %c62] : memref<8x1280xf32, #tpu.memory_space<vmem>>, vector<8x1024xf32>
    %c0_25 = arith.constant 0 : index
    %c0_26 = arith.constant 0 : index
    %31 = vector.load %arg5[%c0_25, %c0_26] : memref<5x1024xf32, #tpu.memory_space<vmem>>, vector<1x1024xf32>
    %32 = vector.broadcast %31 : vector<1x1024xf32> to vector<8x1024xf32>
    %33 = arith.mulf %30, %32 : vector<8x1024xf32>
    %c40 = arith.constant 40 : index
    %c0_27 = arith.constant 0 : index
    %34 = vector.load %arg8[%c40, %c0_27] : memref<200x1024xf32, #tpu.memory_space<vmem>>, vector<8x1024xf32>
    tpu.vector_store %arg8[%c40, %c0_27], %33 {strides = array<i32>} : memref<200x1024xf32, #tpu.memory_space<vmem>>, vector<8x1024xf32>,
    %c0_28 = arith.constant 0 : index
    %c63 = arith.constant 63 : index
    %35 = vector.load %arg7[%c0_28, %c63] : memref<8x1280xf32, #tpu.memory_space<vmem>>, vector<8x1024xf32>
    %c1_29 = arith.constant 1 : index
    %c0_30 = arith.constant 0 : index
    %36 = vector.load %arg5[%c1_29, %c0_30] : memref<5x1024xf32, #tpu.memory_space<vmem>>, vector<1x1024xf32>
    %37 = vector.broadcast %36 : vector<1x1024xf32> to vector<8x1024xf32>
    %38 = arith.mulf %35, %37 : vector<8x1024xf32>
    %c48 = arith.constant 48 : index
    %c0_31 = arith.constant 0 : index
    %39 = vector.load %arg8[%c48, %c0_31] : memref<200x1024xf32, #tpu.memory_space<vmem>>, vector<8x1024xf32>
    tpu.vector_store %arg8[%c48, %c0_31], %38 {strides = array<i32>} : memref<200x1024xf32, #tpu.memory_space<vmem>>, vector<8x1024xf32>,
    %c0_32 = arith.constant 0 : index
    %c64 = arith.constant 64 : index
    %40 = vector.load %arg7[%c0_32, %c64] : memref<8x1280xf32, #tpu.memory_space<vmem>>, vector<8x1024xf32>
    %c2_33 = arith.constant 2 : index
    %c0_34 = arith.constant 0 : index
    %41 = vector.load %arg5[%c2_33, %c0_34] : memref<5x1024xf32, #tpu.memory_space<vmem>>, vector<1x1024xf32>
    %42 = vector.broadcast %41 : vector<1x1024xf32> to vector<8x1024xf32>
    %43 = arith.mulf %40, %42 : vector<8x1024xf32>
    %c56 = arith.constant 56 : index
    %c0_35 = arith.constant 0 : index
    %44 = vector.load %arg8[%c56, %c0_35] : memref<200x1024xf32, #tpu.memory_space<vmem>>, vector<8x1024xf32>
    tpu.vector_store %arg8[%c56, %c0_35], %43 {strides = array<i32>} : memref<200x1024xf32, #tpu.memory_space<vmem>>, vector<8x1024xf32>,
    %c0_36 = arith.constant 0 : index
    %c65 = arith.constant 65 : index
    %45 = vector.load %arg7[%c0_36, %c65] : memref<8x1280xf32, #tpu.memory_space<vmem>>, vector<8x1024xf32>
    %c3_37 = arith.constant 3 : index
    %c0_38 = arith.constant 0 : index
    %46 = vector.load %arg5[%c3_37, %c0_38] : memref<5x1024xf32, #tpu.memory_space<vmem>>, vector<1x1024xf32>
    %47 = vector.broadcast %46 : vector<1x1024xf32> to vector<8x1024xf32>
    %48 = arith.mulf %45, %47 : vector<8x1024xf32>
    %c64_39 = arith.constant 64 : index
    %c0_40 = arith.constant 0 : index
    %49 = vector.load %arg8[%c64_39, %c0_40] : memref<200x1024xf32, #tpu.memory_space<vmem>>, vector<8x1024xf32>
    tpu.vector_store %arg8[%c64_39, %c0_40], %48 {strides = array<i32>} : memref<200x1024xf32, #tpu.memory_space<vmem>>, vector<8x1024xf32>,
    %c0_41 = arith.constant 0 : index
    %c66 = arith.constant 66 : index
    %50 = vector.load %arg7[%c0_41, %c66] : memref<8x1280xf32, #tpu.memory_space<vmem>>, vector<8x1024xf32>
    %c4_42 = arith.constant 4 : index
    %c0_43 = arith.constant 0 : index
    %51 = vector.load %arg5[%c4_42, %c0_43] : memref<5x1024xf32, #tpu.memory_space<vmem>>, vector<1x1024xf32>
    %52 = vector.broadcast %51 : vector<1x1024xf32> to vector<8x1024xf32>
    %53 = arith.mulf %50, %52 : vector<8x1024xf32>
    %c72 = arith.constant 72 : index
    %c0_44 = arith.constant 0 : index
    %54 = vector.load %arg8[%c72, %c0_44] : memref<200x1024xf32, #tpu.memory_space<vmem>>, vector<8x1024xf32>
    tpu.vector_store %arg8[%c72, %c0_44], %53 {strides = array<i32>} : memref<200x1024xf32, #tpu.memory_space<vmem>>, vector<8x1024xf32>,
    %c0_45 = arith.constant 0 : index
    %c94 = arith.constant 94 : index
    %55 = vector.load %arg7[%c0_45, %c94] : memref<8x1280xf32, #tpu.memory_space<vmem>>, vector<8x1024xf32>
    %c0_46 = arith.constant 0 : index
    %c0_47 = arith.constant 0 : index
    %56 = vector.load %arg5[%c0_46, %c0_47] : memref<5x1024xf32, #tpu.memory_space<vmem>>, vector<1x1024xf32>
    %57 = vector.broadcast %56 : vector<1x1024xf32> to vector<8x1024xf32>
    %58 = arith.mulf %55, %57 : vector<8x1024xf32>
    %c80 = arith.constant 80 : index
    %c0_48 = arith.constant 0 : index
    %59 = vector.load %arg8[%c80, %c0_48] : memref<200x1024xf32, #tpu.memory_space<vmem>>, vector<8x1024xf32>
    tpu.vector_store %arg8[%c80, %c0_48], %58 {strides = array<i32>} : memref<200x1024xf32, #tpu.memory_space<vmem>>, vector<8x1024xf32>,
    %c0_49 = arith.constant 0 : index
    %c95 = arith.constant 95 : index
    %60 = vector.load %arg7[%c0_49, %c95] : memref<8x1280xf32, #tpu.memory_space<vmem>>, vector<8x1024xf32>
    %c1_50 = arith.constant 1 : index
    %c0_51 = arith.constant 0 : index
    %61 = vector.load %arg5[%c1_50, %c0_51] : memref<5x1024xf32, #tpu.memory_space<vmem>>, vector<1x1024xf32>
    %62 = vector.broadcast %61 : vector<1x1024xf32> to vector<8x1024xf32>
    %63 = arith.mulf %60, %62 : vector<8x1024xf32>
    %c88 = arith.constant 88 : index
    %c0_52 = arith.constant 0 : index
    %64 = vector.load %arg8[%c88, %c0_52] : memref<200x1024xf32, #tpu.memory_space<vmem>>, vector<8x1024xf32>
    tpu.vector_store %arg8[%c88, %c0_52], %63 {strides = array<i32>} : memref<200x1024xf32, #tpu.memory_space<vmem>>, vector<8x1024xf32>,
    %c0_53 = arith.constant 0 : index
    %c96 = arith.constant 96 : index
    %65 = vector.load %arg7[%c0_53, %c96] : memref<8x1280xf32, #tpu.memory_space<vmem>>, vector<8x1024xf32>
    %c2_54 = arith.constant 2 : index
    %c0_55 = arith.constant 0 : index
    %66 = vector.load %arg5[%c2_54, %c0_55] : memref<5x1024xf32, #tpu.memory_space<vmem>>, vector<1x1024xf32>
    %67 = vector.broadcast %66 : vector<1x1024xf32> to vector<8x1024xf32>
    %68 = arith.mulf %65, %67 : vector<8x1024xf32>
    %c96_56 = arith.constant 96 : index
    %c0_57 = arith.constant 0 : index
    %69 = vector.load %arg8[%c96_56, %c0_57] : memref<200x1024xf32, #tpu.memory_space<vmem>>, vector<8x1024xf32>
    tpu.vector_store %arg8[%c96_56, %c0_57], %68 {strides = array<i32>} : memref<200x1024xf32, #tpu.memory_space<vmem>>, vector<8x1024xf32>,
    %c0_58 = arith.constant 0 : index
    %c97 = arith.constant 97 : index
    %70 = vector.load %arg7[%c0_58, %c97] : memref<8x1280xf32, #tpu.memory_space<vmem>>, vector<8x1024xf32>
    %c3_59 = arith.constant 3 : index
    %c0_60 = arith.constant 0 : index
    %71 = vector.load %arg5[%c3_59, %c0_60] : memref<5x1024xf32, #tpu.memory_space<vmem>>, vector<1x1024xf32>
    %72 = vector.broadcast %71 : vector<1x1024xf32> to vector<8x1024xf32>
    %73 = arith.mulf %70, %72 : vector<8x1024xf32>
    %c104 = arith.constant 104 : index
    %c0_61 = arith.constant 0 : index
    %74 = vector.load %arg8[%c104, %c0_61] : memref<200x1024xf32, #tpu.memory_space<vmem>>, vector<8x1024xf32>
    tpu.vector_store %arg8[%c104, %c0_61], %73 {strides = array<i32>} : memref<200x1024xf32, #tpu.memory_space<vmem>>, vector<8x1024xf32>,
    %c0_62 = arith.constant 0 : index
    %c98 = arith.constant 98 : index
    %75 = vector.load %arg7[%c0_62, %c98] : memref<8x1280xf32, #tpu.memory_space<vmem>>, vector<8x1024xf32>
    %c4_63 = arith.constant 4 : index
    %c0_64 = arith.constant 0 : index
    %76 = vector.load %arg5[%c4_63, %c0_64] : memref<5x1024xf32, #tpu.memory_space<vmem>>, vector<1x1024xf32>
    %77 = vector.broadcast %76 : vector<1x1024xf32> to vector<8x1024xf32>
    %78 = arith.mulf %75, %77 : vector<8x1024xf32>
    %c112 = arith.constant 112 : index
    %c0_65 = arith.constant 0 : index
    %79 = vector.load %arg8[%c112, %c0_65] : memref<200x1024xf32, #tpu.memory_space<vmem>>, vector<8x1024xf32>
    tpu.vector_store %arg8[%c112, %c0_65], %78 {strides = array<i32>} : memref<200x1024xf32, #tpu.memory_space<vmem>>, vector<8x1024xf32>,
    %c0_66 = arith.constant 0 : index
    %c126 = arith.constant 126 : index
    %80 = vector.load %arg7[%c0_66, %c126] : memref<8x1280xf32, #tpu.memory_space<vmem>>, vector<8x1024xf32>
    %c0_67 = arith.constant 0 : index
    %c0_68 = arith.constant 0 : index
    %81 = vector.load %arg5[%c0_67, %c0_68] : memref<5x1024xf32, #tpu.memory_space<vmem>>, vector<1x1024xf32>
    %82 = vector.broadcast %81 : vector<1x1024xf32> to vector<8x1024xf32>
    %83 = arith.mulf %80, %82 : vector<8x1024xf32>
    %c120 = arith.constant 120 : index
    %c0_69 = arith.constant 0 : index
    %84 = vector.load %arg8[%c120, %c0_69] : memref<200x1024xf32, #tpu.memory_space<vmem>>, vector<8x1024xf32>
    tpu.vector_store %arg8[%c120, %c0_69], %83 {strides = array<i32>} : memref<200x1024xf32, #tpu.memory_space<vmem>>, vector<8x1024xf32>,
    %c0_70 = arith.constant 0 : index
    %c127 = arith.constant 127 : index
    %85 = vector.load %arg7[%c0_70, %c127] : memref<8x1280xf32, #tpu.memory_space<vmem>>, vector<8x1024xf32>
    %c1_71 = arith.constant 1 : index
    %c0_72 = arith.constant 0 : index
    %86 = vector.load %arg5[%c1_71, %c0_72] : memref<5x1024xf32, #tpu.memory_space<vmem>>, vector<1x1024xf32>
    %87 = vector.broadcast %86 : vector<1x1024xf32> to vector<8x1024xf32>
    %88 = arith.mulf %85, %87 : vector<8x1024xf32>
    %c128 = arith.constant 128 : index
    %c0_73 = arith.constant 0 : index
    %89 = vector.load %arg8[%c128, %c0_73] : memref<200x1024xf32, #tpu.memory_space<vmem>>, vector<8x1024xf32>
    tpu.vector_store %arg8[%c128, %c0_73], %88 {strides = array<i32>} : memref<200x1024xf32, #tpu.memory_space<vmem>>, vector<8x1024xf32>,
    %c0_74 = arith.constant 0 : index
    %c128_75 = arith.constant 128 : index
    %90 = vector.load %arg7[%c0_74, %c128_75] : memref<8x1280xf32, #tpu.memory_space<vmem>>, vector<8x1024xf32>
    %c2_76 = arith.constant 2 : index
    %c0_77 = arith.constant 0 : index
    %91 = vector.load %arg5[%c2_76, %c0_77] : memref<5x1024xf32, #tpu.memory_space<vmem>>, vector<1x1024xf32>
    %92 = vector.broadcast %91 : vector<1x1024xf32> to vector<8x1024xf32>
    %93 = arith.mulf %90, %92 : vector<8x1024xf32>
    %c136 = arith.constant 136 : index
    %c0_78 = arith.constant 0 : index
    %94 = vector.load %arg8[%c136, %c0_78] : memref<200x1024xf32, #tpu.memory_space<vmem>>, vector<8x1024xf32>
    tpu.vector_store %arg8[%c136, %c0_78], %93 {strides = array<i32>} : memref<200x1024xf32, #tpu.memory_space<vmem>>, vector<8x1024xf32>,
    %c0_79 = arith.constant 0 : index
    %c129 = arith.constant 129 : index
    %95 = vector.load %arg7[%c0_79, %c129] : memref<8x1280xf32, #tpu.memory_space<vmem>>, vector<8x1024xf32>
    %c3_80 = arith.constant 3 : index
    %c0_81 = arith.constant 0 : index
    %96 = vector.load %arg5[%c3_80, %c0_81] : memref<5x1024xf32, #tpu.memory_space<vmem>>, vector<1x1024xf32>
    %97 = vector.broadcast %96 : vector<1x1024xf32> to vector<8x1024xf32>
    %98 = arith.mulf %95, %97 : vector<8x1024xf32>
    %c144 = arith.constant 144 : index
    %c0_82 = arith.constant 0 : index
    %99 = vector.load %arg8[%c144, %c0_82] : memref<200x1024xf32, #tpu.memory_space<vmem>>, vector<8x1024xf32>
    tpu.vector_store %arg8[%c144, %c0_82], %98 {strides = array<i32>} : memref<200x1024xf32, #tpu.memory_space<vmem>>, vector<8x1024xf32>,
    %c0_83 = arith.constant 0 : index
    %c130 = arith.constant 130 : index
    %100 = vector.load %arg7[%c0_83, %c130] : memref<8x1280xf32, #tpu.memory_space<vmem>>, vector<8x1024xf32>
    %c4_84 = arith.constant 4 : index
    %c0_85 = arith.constant 0 : index
    %101 = vector.load %arg5[%c4_84, %c0_85] : memref<5x1024xf32, #tpu.memory_space<vmem>>, vector<1x1024xf32>
    %102 = vector.broadcast %101 : vector<1x1024xf32> to vector<8x1024xf32>
    %103 = arith.mulf %100, %102 : vector<8x1024xf32>
    %c152 = arith.constant 152 : index
    %c0_86 = arith.constant 0 : index
    %104 = vector.load %arg8[%c152, %c0_86] : memref<200x1024xf32, #tpu.memory_space<vmem>>, vector<8x1024xf32>
    tpu.vector_store %arg8[%c152, %c0_86], %103 {strides = array<i32>} : memref<200x1024xf32, #tpu.memory_space<vmem>>, vector<8x1024xf32>,
    %c0_87 = arith.constant 0 : index
    %c158 = arith.constant 158 : index
    %105 = vector.load %arg7[%c0_87, %c158] : memref<8x1280xf32, #tpu.memory_space<vmem>>, vector<8x1024xf32>
    %c0_88 = arith.constant 0 : index
    %c0_89 = arith.constant 0 : index
    %106 = vector.load %arg5[%c0_88, %c0_89] : memref<5x1024xf32, #tpu.memory_space<vmem>>, vector<1x1024xf32>
    %107 = vector.broadcast %106 : vector<1x1024xf32> to vector<8x1024xf32>
    %108 = arith.mulf %105, %107 : vector<8x1024xf32>
    %c160 = arith.constant 160 : index
    %c0_90 = arith.constant 0 : index
    %109 = vector.load %arg8[%c160, %c0_90] : memref<200x1024xf32, #tpu.memory_space<vmem>>, vector<8x1024xf32>
    tpu.vector_store %arg8[%c160, %c0_90], %108 {strides = array<i32>} : memref<200x1024xf32, #tpu.memory_space<vmem>>, vector<8x1024xf32>,
    %c0_91 = arith.constant 0 : index
    %c159 = arith.constant 159 : index
    %110 = vector.load %arg7[%c0_91, %c159] : memref<8x1280xf32, #tpu.memory_space<vmem>>, vector<8x1024xf32>
    %c1_92 = arith.constant 1 : index
    %c0_93 = arith.constant 0 : index
    %111 = vector.load %arg5[%c1_92, %c0_93] : memref<5x1024xf32, #tpu.memory_space<vmem>>, vector<1x1024xf32>
    %112 = vector.broadcast %111 : vector<1x1024xf32> to vector<8x1024xf32>
    %113 = arith.mulf %110, %112 : vector<8x1024xf32>
    %c168 = arith.constant 168 : index
    %c0_94 = arith.constant 0 : index
    %114 = vector.load %arg8[%c168, %c0_94] : memref<200x1024xf32, #tpu.memory_space<vmem>>, vector<8x1024xf32>
    tpu.vector_store %arg8[%c168, %c0_94], %113 {strides = array<i32>} : memref<200x1024xf32, #tpu.memory_space<vmem>>, vector<8x1024xf32>,
    %c0_95 = arith.constant 0 : index
    %c160_96 = arith.constant 160 : index
    %115 = vector.load %arg7[%c0_95, %c160_96] : memref<8x1280xf32, #tpu.memory_space<vmem>>, vector<8x1024xf32>
    %c2_97 = arith.constant 2 : index
    %c0_98 = arith.constant 0 : index
    %116 = vector.load %arg5[%c2_97, %c0_98] : memref<5x1024xf32, #tpu.memory_space<vmem>>, vector<1x1024xf32>
    %117 = vector.broadcast %116 : vector<1x1024xf32> to vector<8x1024xf32>
    %118 = arith.mulf %115, %117 : vector<8x1024xf32>
    %c176 = arith.constant 176 : index
    %c0_99 = arith.constant 0 : index
    %119 = vector.load %arg8[%c176, %c0_99] : memref<200x1024xf32, #tpu.memory_space<vmem>>, vector<8x1024xf32>
    tpu.vector_store %arg8[%c176, %c0_99], %118 {strides = array<i32>} : memref<200x1024xf32, #tpu.memory_space<vmem>>, vector<8x1024xf32>,
    %c0_100 = arith.constant 0 : index
    %c161 = arith.constant 161 : index
    %120 = vector.load %arg7[%c0_100, %c161] : memref<8x1280xf32, #tpu.memory_space<vmem>>, vector<8x1024xf32>
    %c3_101 = arith.constant 3 : index
    %c0_102 = arith.constant 0 : index
    %121 = vector.load %arg5[%c3_101, %c0_102] : memref<5x1024xf32, #tpu.memory_space<vmem>>, vector<1x1024xf32>
    %122 = vector.broadcast %121 : vector<1x1024xf32> to vector<8x1024xf32>
    %123 = arith.mulf %120, %122 : vector<8x1024xf32>
    %c184 = arith.constant 184 : index
    %c0_103 = arith.constant 0 : index
    %124 = vector.load %arg8[%c184, %c0_103] : memref<200x1024xf32, #tpu.memory_space<vmem>>, vector<8x1024xf32>
    tpu.vector_store %arg8[%c184, %c0_103], %123 {strides = array<i32>} : memref<200x1024xf32, #tpu.memory_space<vmem>>, vector<8x1024xf32>,
    %c0_104 = arith.constant 0 : index
    %c162 = arith.constant 162 : index
    %125 = vector.load %arg7[%c0_104, %c162] : memref<8x1280xf32, #tpu.memory_space<vmem>>, vector<8x1024xf32>
    %c4_105 = arith.constant 4 : index
    %c0_106 = arith.constant 0 : index
    %126 = vector.load %arg5[%c4_105, %c0_106] : memref<5x1024xf32, #tpu.memory_space<vmem>>, vector<1x1024xf32>
    %127 = vector.broadcast %126 : vector<1x1024xf32> to vector<8x1024xf32>
    %128 = arith.mulf %125, %127 : vector<8x1024xf32>
    %c192 = arith.constant 192 : index
    %c0_107 = arith.constant 0 : index
    %129 = vector.load %arg8[%c192, %c0_107] : memref<200x1024xf32, #tpu.memory_space<vmem>>, vector<8x1024xf32>
    tpu.vector_store %arg8[%c192, %c0_107], %128 {strides = array<i32>} : memref<200x1024xf32, #tpu.memory_space<vmem>>, vector<8x1024xf32>,
    %c0_108 = arith.constant 0 : index
    %c0_109 = arith.constant 0 : index
    %130 = vector.load %arg3[%c0_108, %c0_109] : memref<8x200xf32, #tpu.memory_space<vmem>>, vector<8x200xf32>
    %c0_110 = arith.constant 0 : index
    %c0_111 = arith.constant 0 : index
    %131 = vector.load %arg8[%c0_110, %c0_111] : memref<200x1024xf32, #tpu.memory_space<vmem>>, vector<200x1024xf32>
    %cst_112 = arith.constant dense<0.000000e+00> : vector<8x1024xf32>
    %132 = tpu.matmul %130, %131, %cst_112 {dimension_numbers = #tpu.dot_dimension_numbers<[1], [0], [0], [1], [0, 0, 1, 1], [], []>} : vector<8x200xf32>, vector<200x1024xf32>, vector<8x1024xf32> -> vector<8x1024xf32>
    %c0_113 = arith.constant 0 : index
    %c0_114 = arith.constant 0 : index
    %133 = vector.load %arg4[%c0_113, %c0_114] : memref<8x1xf32, #tpu.memory_space<vmem>>, vector<8x1xf32>
    %134 = vector.broadcast %133 : vector<8x1xf32> to vector<8x1024xf32>
    %135 = arith.addf %132, %134 : vector<8x1024xf32>
    %cst_115 = arith.constant 0.000000e+00 : f32
    %136 = vector.broadcast %cst_115 : f32 to vector<8x1024xf32>
    %137 = arith.cmpf ogt, %135, %136 : vector<8x1024xf32>
    %cst_116 = arith.constant 1.000000e-01 : f32
    %138 = vector.broadcast %cst_116 : f32 to vector<8x1024xf32>
    %139 = arith.mulf %138, %135 : vector<8x1024xf32>
    %140 = arith.select %137, %135, %139 : vector<8x1024xi1>, vector<8x1024xf32>
    %c0_117 = arith.constant 0 : index
    %c0_118 = arith.constant 0 : index
    %c0_119 = arith.constant 0 : index
    %141 = vector.load %arg6[%c0_117, %c0_118, %c0_119] : memref<1x8x1024xf32, #tpu.memory_space<vmem>>, vector<1x8x1024xf32>
    %142 = vector.shape_cast %141 : vector<1x8x1024xf32> to vector<8x1024xf32>
    %143 = vector.shape_cast %140 : vector<8x1024xf32> to vector<1x8x1024xf32>
    tpu.vector_store %arg6[%c0_117, %c0_118, %c0_119], %143 {strides = array<i32>} : memref<1x8x1024xf32, #tpu.memory_space<vmem>>, vector<1x8x1024xf32>,
    return
  }
  func.func @transform_0(%arg0: i32) -> (i32, i32, i32) {
    %c0_i32 = arith.constant 0 : i32
    %c0_i32_0 = arith.constant 0 : i32
    %c0_i32_1 = arith.constant 0 : i32
    return %arg0, %c0_i32, %c0_i32_0 : i32, i32, i32
  }
  func.func @transform_1(%arg0: i32) -> (i32, i32) {
    %c0_i32 = arith.constant 0 : i32
    %c0_i32_0 = arith.constant 0 : i32
    %c0_i32_1 = arith.constant 0 : i32
    return %c0_i32, %c0_i32_0 : i32, i32
  }
  func.func @transform_2(%arg0: i32) -> (i32, i32) {
    %c0_i32 = arith.constant 0 : i32
    %c0_i32_0 = arith.constant 0 : i32
    %c0_i32_1 = arith.constant 0 : i32
    return %c0_i32, %c0_i32_0 : i32, i32
  }
  func.func @transform_3(%arg0: i32) -> (i32, i32) {
    %c0_i32 = arith.constant 0 : i32
    %c0_i32_0 = arith.constant 0 : i32
    %c0_i32_1 = arith.constant 0 : i32
    return %c0_i32, %c0_i32_0 : i32, i32
  }
  func.func @transform_4(%arg0: i32) -> (i32, i32) {
    %c0_i32 = arith.constant 0 : i32
    %c0_i32_0 = arith.constant 0 : i32
    %c0_i32_1 = arith.constant 0 : i32
    return %c0_i32, %c0_i32_0 : i32, i32
  }
  func.func @transform_5(%arg0: i32) -> (i32, i32, i32) {
    %c0_i32 = arith.constant 0 : i32
    %c0_i32_0 = arith.constant 0 : i32
    %c0_i32_1 = arith.constant 0 : i32
    return %arg0, %c0_i32, %c0_i32_0 : i32, i32, i32
  }
}

</mosaic_0001>

<bundles_post_ra>
// kernel: mydeconv_forward.1
= control target key start
LH: loop header
LB: loop body
LE: loop exit
PB: predicated region body
PF: predicated region fallthrough
CT: control target
= control target key end

     0   :  { %10 = vsyncpa [#allocation5], 0  ;;  %s7505_s0 = inlined_call_operand.vmem [shape: f32[2,8,256], index: 0, kind: input, shape index: {}]   ;;  %s7506_s1 = inlined_call_operand.hbm [shape: f32[256,1280], index: 1, kind: input, shape index: {}]   ;;  %s7507_s2 = inlined_call_operand.vmem [shape: f32[8,200], index: 2, kind: input, shape index: {}]   ;;  %s7508_s3 = inlined_call_operand.vmem [shape: f32[8,1], index: 3, kind: input, shape index: {}]   ;;  %s7509_s4 = inlined_call_operand.hbm [shape: f32[5,1024], index: 4, kind: input, shape index: {}]   ;;  %s7510_s5 = inlined_call_operand.vmem [shape: f32[2,8,1024], index: 5, kind: output, shape index: {}]  }
   0x1   :  { %11 = vsyncpa [#allocation7], 0  ;;  %s5101_s18 = smov 0  }
   0x2 LB: > { %s169_s21 = sshll.u32 %s7506_s1, 4  ;;  %s5110_s22 = sadd.s32 4294967295, %s5045_s18   ;;  %s5045_s18 = sphi %s5101_s18, %s17_s18   ;;  %s170_s21 = int_to_ptr.hbm [resolvable:$true] %s169_s21 }
   0x3   : > { %p4411_p0 = scmp.ge.s32.totalorder %s5045_s18, 1  ;;  %p158_p1 = scmp.lt.s32.totalorder %s5045_s18, 3 }
   0x4   : > { %p4449_p2 = scmp.eq.s32.totalorder %s5110_s22, 0  ;;  %s5047_s24 = smov [#allocation4]  }
   0x5   : > { %p5115_p3 = pnand %p4411_p0, %p158_p1  ;;  %s171_s25 = sshll.u32 %s5047_s24, 4  ;;  %s172_s25 = int_to_ptr.vmem [resolvable:$true] %s171_s25 }
   0x6   : > { %s190_s28 = sshll.u32 %s7509_s4, 4  ;;  %s5048_s29 = smov [#allocation6]   ;;  %s191_s28 = int_to_ptr.hbm [resolvable:$true] %s190_s28 }
   0x7   : > { %p4442_p4 = pneg %p5115_p3  ;;  %s192_s30 = sshll.u32 %s5048_s29, 4  ;;  %s193_s30 = int_to_ptr.vmem [resolvable:$true] %s192_s30 }
   0x8   : > { %s5049_s6 = smov 1280   ;;  %s5050_s7 = smov 80  }
   0x9   : > { %p4443_p5 = pnand %p4449_p2, %p4442_p4  ;;  %213 = sbr.rel (%p5115_p3) target bundleno = 2596 (0xa24), region = 40 }
   0xb   : > { %4445 = dma.hbm_to_vmem [thread:$0]  (!%p4443_p5), %s170_s21, 40960, %s172_s25, [#allocation5], %s5049_s6, %s5049_s6, %s5050_s7  }
   0xc   : > { %4448 = dma.hbm_to_vmem [thread:$0]  (!%p4443_p5), %s191_s28, 1024, %s193_s30, [#allocation7]  }
   0xe   : > { %5036 = dma.done.wait (%p4449_p2), [#allocation5], 40960  }
   0xf   : > { %5038 = vsyncadd (%p4449_p2), [#allocation5], 4294926336 }
  0x10   : > { %5040 = dma.done.wait (%p4449_p2), [#allocation7], 1024  }
  0x11   : > { %5042 = vsyncadd (%p4449_p2), [#allocation7], 4294966272  ;;  %v409_v0 = vld [vmem:[#allocation4 + $0x4b0] sm:$0xff]  ;;  %v410_v2 = vld [vmem:[#allocation4 + $0x4b8] sm:$0xff]  ;;  %s5051_s8 = smov 30   ;;  %p247_p6 = scmp.lt.s32.totalorder %s5110_s22, 1 }
  0x12   : > { %v569_v1 = vld [vmem:[#allocation4 + $0x9b0] sm:$0xff]  ;;  %579 = vmatpush.msra.mxu0 %v409_v0  ;;  %v570_v3 = vld [vmem:[#allocation4 + $0x9b8] sm:$0xff]  ;;  %v399_v4 = vld [vmem:[#allocation4 + $0x460] sm:$0xff]  ;;  %619 = vmatpush.msra.mxu2 %v410_v2  ;;  %s5052_s9 = smov 31   ;;  %s5053_s14 = smov 32   ;;  %vm1142_vm0 = vcmask 252928  }
  0x13   : > { %599 = vmatpush.msra.mxu1 %v569_v1  ;;  %v559_v5 = vld [vmem:[#allocation4 + $0x960] sm:$0xff]  ;;  %639 = vmatpush.msra.mxu3 %v570_v3  ;;  %v400_v6 = vld [vmem:[#allocation4 + $0x468] sm:$0xff]  ;;  %v389_v10 = vld [vmem:[#allocation4 + $0x410] sm:$0xff]  ;;  %s7894_s22 = smov (!%p247_p6, %s5110_s22), 1  ;;  %s5054_s15 = smov 33   ;;  %vm1258_vm1 = vcmask 261120  }
  0x14   : > { %v560_v7 = vld [vmem:[#allocation4 + $0x968] sm:$0xff]  ;;  %580 = vmatpush.msra.mxu0 %v399_v4  ;;  %v549_v11 = vld [vmem:[#allocation4 + $0x910] sm:$0xff]  ;;  %620 = vmatpush.msra.mxu2 %v400_v6  ;;  %v390_v13 = vld [vmem:[#allocation4 + $0x418] sm:$0xff]  ;;  %s4432_s10 = sshll.u32 %s7894_s22, 4  ;;  %s5055_s16 = smov 34   ;;  %vm7575_vm2 = vcmask 244736  }
  0x15   : > { %v998_v8 = vld [vmem:[#allocation6] ss:$8 sm:$0xf]  ;;  %600 = vmatpush.msra.mxu1 %v559_v5  ;;  %640 = vmatpush.msra.mxu3 %v560_v7  ;;  %v1114_v37 = vld [vmem:[#allocation6 + $0x1] ss:$8 sm:$0xf]  ;;  %s5172_s13 = scalar_lea.vmem %s7505_s0, %s4432_s10 }
  0x16   : > { %v999_v9 = vld [vmem:[#allocation6] ss:$8 sm:$0xf0]  ;;  %581 = vmatpush.msra.mxu0 %v389_v10  ;;  %621 = vmatpush.msra.mxu2 %v390_v13  ;;  %v1115_v38 = vld [vmem:[#allocation6 + $0x1] ss:$8 sm:$0xf0] }
  0x17   : > { %v5136_v12 = vor.u32 %v999_v9, %v998_v8  ;;  %v550_v14 = vld [vmem:[#allocation4 + $0x918] sm:$0xff]  ;;  %v379_v15 = vld [vmem:[#allocation4 + $0x3c0] sm:$0xff]  ;;  %601 = vmatpush.msra.mxu1 %v549_v11  ;;  %v380_v20 = vld [vmem:[#allocation4 + $0x3c8] sm:$0xff]  ;;  %v5149_v43 = vor.u32 %v1115_v38, %v1114_v37  ;;  %s5056_s17 = smov 62   ;;  %s5057_s19 = smov 63   ;;  %vm1374_vm3 = vcmask 269312  }
  0x18   : > { %v539_v16 = vld [vmem:[#allocation4 + $0x8c0] sm:$0xff]  ;;  %641 = vmatpush.msra.mxu3 %v550_v14  ;;  %582 = vmatpush.msra.mxu0 %v379_v15  ;;  %v540_v21 = vld [vmem:[#allocation4 + $0x8c8] sm:$0xff]  ;;  %v369_v22 = vld [vmem:[#allocation4 + $0x370] sm:$0xff]  ;;  %s5058_s20 = smov 96   ;;  %s5059_s21 = smov 97   ;;  %vm1490_vm4 = vcmask 277504  }
  0x19   : > { %v1006_v17 = vperm.slane %v5136_v12, 4  ;;  %v1004_v18 = vperm.slane %v5136_v12, 2  ;;  %v1002_v19 = vperm.slane %v5136_v12, 0  ;;  %602 = vmatpush.msra.mxu1 %v539_v16  ;;  %v529_v23 = vld [vmem:[#allocation4 + $0x870] sm:$0xff]  ;;  %v370_v24 = vld [vmem:[#allocation4 + $0x378] sm:$0xff]  ;;  %622 = vmatpush.msra.mxu2 %v380_v20  ;;  %v359_v26 = vld [vmem:[#allocation4 + $0x320] sm:$0xff] }
  0x1a   : > { %v530_v25 = vld [vmem:[#allocation4 + $0x878] sm:$0xff]  ;;  %642 = vmatpush.msra.mxu3 %v540_v21  ;;  %583 = vmatpush.msra.mxu0 %v369_v22  ;;  %v519_v27 = vld [vmem:[#allocation4 + $0x820] sm:$0xff]  ;;  %v360_v28 = vld [vmem:[#allocation4 + $0x328] sm:$0xff]  ;;  %v1007_v31 = vperm.slane %v5136_v12, 5  ;;  %v1005_v32 = vperm.slane %v5136_v12, 3  ;;  %v1003_v35 = vperm.slane %v5136_v12, 1 }
  0x1b   : > { %1018 = vrot.lane.b32.xlu2 %v1006_v17, %s5051_s8  ;;  %1014 = vrot.lane.b32.xlu1 %v1004_v18, %s5051_s8  ;;  %v520_v29 = vld [vmem:[#allocation4 + $0x828] sm:$0xff]  ;;  %v349_v30 = vld [vmem:[#allocation4 + $0x2d0] sm:$0xff]  ;;  %v350_v34 = vld [vmem:[#allocation4 + $0x2d8] sm:$0xff]  ;;  %v1119_v52 = vperm.slane %v5149_v43, 1  ;;  %v1009_v53 = vperm.slane %v5136_v12, 7  ;;  %v1008_v54 = vperm.slane %v5136_v12, 6 }
  0x1c   : > { %1010 = vrot.lane.b32.xlu0 %v1002_v19, %s5051_s8  ;;  %603 = vmatpush.msra.mxu1 %v529_v23  ;;  %v509_v33 = vld [vmem:[#allocation4 + $0x7d0] sm:$0xff]  ;;  %v510_v36 = vld [vmem:[#allocation4 + $0x7d8] sm:$0xff]  ;;  %v339_v39 = vld [vmem:[#allocation4 + $0x280] sm:$0xff]  ;;  %v1122_v6 = vperm.slane %v5149_v43, 4  ;;  %v1118_v8 = vperm.slane %v5149_v43, 0  ;;  %v1120_v9 = vperm.slane %v5149_v43, 2 }
  0x1d   : > { %623 = vmatpush.msra.mxu2 %v370_v24  ;;  %643 = vmatpush.msra.mxu3 %v530_v25  ;;  %v499_v40 = vld [vmem:[#allocation4 + $0x780] sm:$0xff]  ;;  %v340_v41 = vld [vmem:[#allocation4 + $0x288] sm:$0xff]  ;;  %v329_v44 = vld [vmem:[#allocation4 + $0x230] sm:$0xff]  ;;  %s5060_s23 = smov 98   ;;  %s5061_s24 = smov 95   ;;  %vm1605_vm5 = vcmask 506880  }
  0x1e   : > { %584 = vmatpush.msra.mxu0 %v359_v26  ;;  %604 = vmatpush.msra.mxu1 %v519_v27  ;;  %v500_v42 = vld [vmem:[#allocation4 + $0x788] sm:$0xff]  ;;  %v489_v45 = vld [vmem:[#allocation4 + $0x730] sm:$0xff]  ;;  %v330_v46 = vld [vmem:[#allocation4 + $0x238] sm:$0xff]  ;;  %s5062_s25 = smov 94   ;;  %s5063_s26 = smov 66   ;;  %vm1720_vm6 = vcmask 515072  }
  0x1f   : > { %624 = vmatpush.msra.mxu2 %v360_v28  ;;  %644 = vmatpush.msra.mxu3 %v520_v29  ;;  %v490_v47 = vld [vmem:[#allocation4 + $0x738] sm:$0xff]  ;;  %v319_v48 = vld [vmem:[#allocation4 + $0x1e0] sm:$0xff]  ;;  %v320_v50 = vld [vmem:[#allocation4 + $0x1e8] sm:$0xff]  ;;  %s5064_s27 = smov 65   ;;  %s5065_s28 = smov 64   ;;  %vm1079_vm7 = vcmask 801792  }
  0x20   : > { %585 = vmatpush.msra.mxu0 %v349_v30  ;;  %605 = vmatpush.msra.mxu1 %v509_v33  ;;  %v479_v49 = vld [vmem:[#allocation4 + $0x6e0] sm:$0xff]  ;;  %v480_v51 = vld [vmem:[#allocation4 + $0x6e8] sm:$0xff]  ;;  %v309_v55 = vld [vmem:[#allocation4 + $0x190] sm:$0xff]  ;;  %v1121_v33 = vperm.slane %v5149_v43, 3  ;;  %vm1427_vm8 = vcmask 777216   ;;  %vm1195_vm9 = vcmask 793600  }
  0x21   : > { %625 = vmatpush.msra.mxu2 %v350_v34  ;;  %645 = vmatpush.msra.mxu3 %v510_v36  ;;  %v469_v56 = vld [vmem:[#allocation4 + $0x690] sm:$0xff]  ;;  %v310_v57 = vld [vmem:[#allocation4 + $0x198] sm:$0xff]  ;;  %v299_v59 = vld [vmem:[#allocation4 + $0x140] sm:$0xff]  ;;  %v1123_v34 = vperm.slane %v5149_v43, 5  ;;  %vm1311_vm10 = vcmask 785408   ;;  %vm1543_vm11 = vcmask 769024  }
  0x22   : > { %586 = vmatpush.msra.mxu0 %v339_v39  ;;  %606 = vmatpush.msra.mxu1 %v499_v40  ;;  %v470_v58 = vld [vmem:[#allocation4 + $0x698] sm:$0xff]  ;;  %v459_v60 = vld [vmem:[#allocation4 + $0x640] sm:$0xff]  ;;  %v300_v61 = vld [vmem:[#allocation4 + $0x148] sm:$0xff]  ;;  %vm7580_vm12 = vcmask 539648   ;;  %vm7632_vm13 = vcmask 531456   ;;  %vm7633_vm14 = vcmask 523264  }
  0x23   : > { %1020 = vrot.lane.b32.xlu2 %v1007_v31, %s5051_s8  ;;  %1016 = vrot.lane.b32.xlu1 %v1005_v32, %s5051_s8  ;;  %v460_v62 = vld [vmem:[#allocation4 + $0x648] sm:$0xff]  ;;  %v289_v63 = vld [vmem:[#allocation4 + $0xf0] sm:$0xff]  ;;  %v290_v1 = vld [vmem:[#allocation4 + $0xf8] sm:$0xff]  ;;  %v1125_v32 = vperm.slane %v5149_v43, 7  ;;  %s5066_s29 = smov 126   ;;  %vm7562_vm15 = vcmask 1031168  }
  0x24   : > { %1012 = vrot.lane.b32.xlu0 %v1003_v35, %s5051_s8  ;;  %626 = vmatpush.msra.mxu2 %v340_v41  ;;  %v449_v0 = vld [vmem:[#allocation4 + $0x5f0] sm:$0xff]  ;;  %v450_v2 = vld [vmem:[#allocation4 + $0x5f8] sm:$0xff]  ;;  %v279_v3 = vld [vmem:[#allocation4 + $0xa0] sm:$0xff]  ;;  %s5067_s30 = smov 2   ;;  %s5068_s6 = smov 127  }
  0x25   : > { %646 = vmatpush.msra.mxu3 %v500_v42  ;;  %587 = vmatpush.msra.mxu0 %v329_v44  ;;  %v439_v4 = vld [vmem:[#allocation4 + $0x5a0] sm:$0xff]  ;;  %v280_v5 = vld [vmem:[#allocation4 + $0xa8] sm:$0xff]  ;;  %v269_v10 = vld [vmem:[#allocation4 + $0x50] sm:$0xff]  ;;  %s5069_s11 = smov 1  }
  0x26   : > { %607 = vmatpush.msra.mxu1 %v489_v45  ;;  %627 = vmatpush.msra.mxu2 %v330_v46  ;;  %v440_v7 = vld [vmem:[#allocation4 + $0x5a8] sm:$0xff]  ;;  %v429_v11 = vld [vmem:[#allocation4 + $0x550] sm:$0xff]  ;;  %v270_v12 = vld [vmem:[#allocation4 + $0x58] sm:$0xff] }
  0x27   : > { %647 = vmatpush.msra.mxu3 %v490_v47  ;;  %588 = vmatpush.msra.mxu0 %v319_v48  ;;  %v430_v13 = vld [vmem:[#allocation4 + $0x558] sm:$0xff]  ;;  %v259_v14 = vld [vmem:[#allocation4] sm:$0xff]  ;;  %v260_v16 = vld [vmem:[#allocation4 + $0x8] sm:$0xff] }
  0x28   : > { %608 = vmatpush.msra.mxu1 %v479_v49  ;;  %628 = vmatpush.msra.mxu2 %v320_v50  ;;  %v419_v15 = vld [vmem:[#allocation4 + $0x500] sm:$0xff]  ;;  %v420_v17 = vld [vmem:[#allocation4 + $0x508] sm:$0xff]  ;;  %v401_v24 = vld [vmem:[#allocation4 + $0x470] sm:$0xff] }
  0x29   : > { %648 = vmatpush.msra.mxu3 %v480_v51  ;;  %589 = vmatpush.msra.mxu0 %v309_v55  ;;  %v5177_v18 = vld [vmem:[%s5172_s13] sm:$0xff]  ;;  %v5180_v19 = vld [vmem:[%s5172_s13 + $0x8] sm:$0xff]  ;;  %v561_v25 = vld [vmem:[#allocation4 + $0x970] sm:$0xff] }
  0x2a   : > { %609 = vmatpush.msra.mxu1 %v469_v56  ;;  %629 = vmatpush.msra.mxu2 %v310_v57  ;;  %v411_v20 = vld [vmem:[#allocation4 + $0x4c0] sm:$0xff]  ;;  %v412_v22 = vld [vmem:[#allocation4 + $0x4c8] sm:$0xff]  ;;  %v402_v26 = vld [vmem:[#allocation4 + $0x478] sm:$0xff]  ;;  %v1124_v56 = vperm.slane %v5149_v43, 6 }
  0x2b   : > { %1128 = vrot.lane.b32.xlu2 %v1119_v52, %s5052_s9  ;;  %1024 = vrot.lane.b32.xlu1 %v1009_v53, %s5051_s8  ;;  %v571_v21 = vld [vmem:[#allocation4 + $0x9c0] sm:$0xff]  ;;  %v572_v23 = vld [vmem:[#allocation4 + $0x9c8] sm:$0xff]  ;;  %v562_v27 = vld [vmem:[#allocation4 + $0x978] sm:$0xff] }
  0x2c   : > { %1022 = vrot.lane.b32.xlu0 %v1008_v54, %s5051_s8  ;;  %649 = vmatpush.msra.mxu3 %v470_v58  ;;  %v391_v28 = vld [vmem:[#allocation4 + $0x420] sm:$0xff]  ;;  %v392_v30 = vld [vmem:[#allocation4 + $0x428] sm:$0xff]  ;;  %v381_v35 = vld [vmem:[#allocation4 + $0x3d0] sm:$0xff] }
  0x2d   : > { %590 = vmatpush.msra.mxu0 %v299_v59  ;;  %610 = vmatpush.msra.mxu1 %v459_v60  ;;  %v551_v29 = vld [vmem:[#allocation4 + $0x920] sm:$0xff]  ;;  %v552_v31 = vld [vmem:[#allocation4 + $0x928] sm:$0xff]  ;;  %v541_v38 = vld [vmem:[#allocation4 + $0x8d0] sm:$0xff] }
  0x2e   : > { %630 = vmatpush.msra.mxu2 %v300_v61  ;;  %650 = vmatpush.msra.mxu3 %v460_v62  ;;  %v1230_v36 = vld [vmem:[#allocation6 + $0x2] ss:$8 sm:$0xf] }
  0x2f   : > { %591 = vmatpush.msra.mxu0 %v289_v63  ;;  %611 = vmatpush.msra.mxu1 %v449_v0  ;;  %v1231_v37 = vld [vmem:[#allocation6 + $0x2] ss:$8 sm:$0xf0] }
  0x30   : > { %631 = vmatpush.msra.mxu2 %v290_v1  ;;  %651 = vmatpush.msra.mxu3 %v450_v2  ;;  %v382_v39 = vld [vmem:[#allocation4 + $0x3d8] sm:$0xff]  ;;  %v371_v41 = vld [vmem:[#allocation4 + $0x380] sm:$0xff]  ;;  %v372_v44 = vld [vmem:[#allocation4 + $0x388] sm:$0xff]  ;;  %v5192_v45 = vor.u32 %v1231_v37, %v1230_v36 }
  0x31   : > { %592 = vmatpush.msra.mxu0 %v279_v3  ;;  %612 = vmatpush.msra.mxu1 %v439_v4  ;;  %v542_v40 = vld [vmem:[#allocation4 + $0x8d8] sm:$0xff]  ;;  %v531_v42 = vld [vmem:[#allocation4 + $0x880] sm:$0xff]  ;;  %v532_v46 = vld [vmem:[#allocation4 + $0x888] sm:$0xff] }
  0x32   : > { %632 = vmatpush.msra.mxu2 %v280_v5  ;;  %652 = vmatpush.msra.mxu3 %v440_v7  ;;  %v361_v47 = vld [vmem:[#allocation4 + $0x330] sm:$0xff]  ;;  %v362_v49 = vld [vmem:[#allocation4 + $0x338] sm:$0xff]  ;;  %v351_v51 = vld [vmem:[#allocation4 + $0x2e0] sm:$0xff]  ;;  %v1234_v54 = vperm.slane %v5192_v45, 0  ;;  %v1235_v57 = vperm.slane %v5192_v45, 1 }
  0x33   : > { %1134 = vrot.lane.b32.xlu2 %v1122_v6, %s5052_s9  ;;  %1126 = vrot.lane.b32.xlu1 %v1118_v8, %s5052_s9  ;;  %v521_v48 = vld [vmem:[#allocation4 + $0x830] sm:$0xff]  ;;  %v522_v50 = vld [vmem:[#allocation4 + $0x838] sm:$0xff]  ;;  %v511_v52 = vld [vmem:[#allocation4 + $0x7e0] sm:$0xff] }
  0x34   : > { %1130 = vrot.lane.b32.xlu0 %v1120_v9, %s5052_s9  ;;  %593 = vmatpush.msra.mxu0 %v269_v10  ;;  %v352_v53 = vld [vmem:[#allocation4 + $0x2e8] sm:$0xff]  ;;  %v341_v58 = vld [vmem:[#allocation4 + $0x290] sm:$0xff]  ;;  %v342_v60 = vld [vmem:[#allocation4 + $0x298] sm:$0xff]  ;;  %v1237_v9 = vperm.slane %v5192_v45, 3  ;;  %v1236_v10 = vperm.slane %v5192_v45, 2 }
  0x35   : > { %613 = vmatpush.msra.mxu1 %v429_v11  ;;  %633 = vmatpush.msra.mxu2 %v270_v12  ;;  %v512_v55 = vld [vmem:[#allocation4 + $0x7e8] sm:$0xff]  ;;  %v501_v59 = vld [vmem:[#allocation4 + $0x790] sm:$0xff]  ;;  %v502_v61 = vld [vmem:[#allocation4 + $0x798] sm:$0xff]  ;;  %v1238_v11 = vperm.slane %v5192_v45, 4 }
  0x36   : > { %653 = vmatpush.msra.mxu3 %v430_v13  ;;  %594 = vmatpush.msra.mxu0 %v259_v14  ;;  %v331_v62 = vld [vmem:[#allocation4 + $0x240] sm:$0xff]  ;;  %v332_v63 = vld [vmem:[#allocation4 + $0x248] sm:$0xff]  ;;  %v321_v1 = vld [vmem:[#allocation4 + $0x1f0] sm:$0xff] }
  0x37   : > { %614 = vmatpush.msra.mxu1 %v419_v15  ;;  %634 = vmatpush.msra.mxu2 %v260_v16  ;;  %v491_v43 = vld [vmem:[#allocation4 + $0x740] sm:$0xff]  ;;  %v492_v0 = vld [vmem:[#allocation4 + $0x748] sm:$0xff]  ;;  %v481_v2 = vld [vmem:[#allocation4 + $0x6f0] sm:$0xff] }
  0x38   : > { %654 = vmatpush.msra.mxu3 %v420_v17  ;;  %595 = vmatmul.f32.vlgmr.msra.gmra.mxu0 %v5177_v18  ;;  %v322_v3 = vld [vmem:[#allocation4 + $0x1f8] sm:$0xff]  ;;  %v311_v5 = vld [vmem:[#allocation4 + $0x1a0] sm:$0xff]  ;;  %v312_v7 = vld [vmem:[#allocation4 + $0x1a8] sm:$0xff] }
  0x39   : > { %615 = vmatmul.f32.vlgmr.msra.gmra.mxu1 %v5180_v19  ;;  %635 = vmatmul.f32.vlgmr.msra.gmra.mxu2 %v5177_v18  ;;  %v482_v4 = vld [vmem:[#allocation4 + $0x6f8] sm:$0xff]  ;;  %v471_v6 = vld [vmem:[#allocation4 + $0x6a0] sm:$0xff]  ;;  %v472_v8 = vld [vmem:[#allocation4 + $0x6a8] sm:$0xff] }
  0x3a   : > { %655 = vmatmul.f32.vlgmr.msra.gmra.mxu3 %v5180_v19  ;;  %659 = vmatpush.msrb.mxu0 %v411_v20  ;;  %v301_v12 = vld [vmem:[#allocation4 + $0x150] sm:$0xff]  ;;  %v302_v14 = vld [vmem:[#allocation4 + $0x158] sm:$0xff]  ;;  %v291_v16 = vld [vmem:[#allocation4 + $0x100] sm:$0xff] }
  0x3b   : > { %679 = vmatpush.msrb.mxu1 %v571_v21  ;;  %699 = vmatpush.msrb.mxu2 %v412_v22  ;;  %v461_v13 = vld [vmem:[#allocation4 + $0x650] sm:$0xff]  ;;  %v462_v15 = vld [vmem:[#allocation4 + $0x658] sm:$0xff]  ;;  %v451_v17 = vld [vmem:[#allocation4 + $0x600] sm:$0xff] }
  0x3c   : > { %719 = vmatpush.msrb.mxu3 %v572_v23  ;;  %660 = vmatpush.msrb.mxu0 %v401_v24  ;;  %v292_v20 = vld [vmem:[#allocation4 + $0x108] sm:$0xff]  ;;  %v281_v22 = vld [vmem:[#allocation4 + $0xb0] sm:$0xff]  ;;  %v282_v24 = vld [vmem:[#allocation4 + $0xb8] sm:$0xff] }
  0x3d   : > { %680 = vmatpush.msrb.mxu1 %v561_v25  ;;  %700 = vmatpush.msrb.mxu2 %v402_v26  ;;  %v452_v21 = vld [vmem:[#allocation4 + $0x608] sm:$0xff]  ;;  %v441_v23 = vld [vmem:[#allocation4 + $0x5b0] sm:$0xff]  ;;  %v442_v25 = vld [vmem:[#allocation4 + $0x5b8] sm:$0xff] }
  0x3e   : > { %720 = vmatpush.msrb.mxu3 %v562_v27  ;;  %661 = vmatpush.msrb.mxu0 %v391_v28  ;;  %v271_v26 = vld [vmem:[#allocation4 + $0x60] sm:$0xff]  ;;  %v272_v28 = vld [vmem:[#allocation4 + $0x68] sm:$0xff]  ;;  %v422_v36 = vld [vmem:[#allocation4 + $0x518] sm:$0xff] }
  0x3f   : > { %681 = vmatpush.msrb.mxu1 %v551_v29  ;;  %701 = vmatpush.msrb.mxu2 %v392_v30  ;;  %v431_v27 = vld [vmem:[#allocation4 + $0x560] sm:$0xff]  ;;  %v1240_v29 = vperm.slane %v5192_v45, 6  ;;  %v432_v30 = vld [vmem:[#allocation4 + $0x568] sm:$0xff] }
  0x40   : > { %721 = vmatpush.msrb.mxu3 %v552_v31  ;;  %1140 = vrot.lane.b32.xlu2 %v1125_v32, %s5052_s9  ;;  %v1239_v31 = vperm.slane %v5192_v45, 5  ;;  %v1241_v32 = vperm.slane %v5192_v45, 7  ;;  %v1346_v37 = vld [vmem:[#allocation6 + $0x3] ss:$8 sm:$0xf] }
  0x41   : > { %1132 = vrot.lane.b32.xlu1 %v1121_v33, %s5052_s9  ;;  %1136 = vrot.lane.b32.xlu0 %v1123_v34, %s5052_s9  ;;  %v261_v33 = vld [vmem:[#allocation4 + $0x10] sm:$0xff]  ;;  %v403_v45 = vld [vmem:[#allocation4 + $0x480] sm:$0xff] }
  0x42   : > { %662 = vmatpush.msrb.mxu0 %v381_v35  ;;  %682 = vmatpush.msrb.mxu1 %v541_v38  ;;  %v421_v34 = vld [vmem:[#allocation4 + $0x510] sm:$0xff]  ;;  %v262_v35 = vld [vmem:[#allocation4 + $0x18] sm:$0xff] }
  0x43   : > { %702 = vmatpush.msrb.mxu2 %v382_v39  ;;  %722 = vmatpush.msrb.mxu3 %v542_v40  ;;  %v1347_v38 = vld [vmem:[#allocation6 + $0x3] ss:$8 sm:$0xf0] }
  0x44   : > { %663 = vmatpush.msrb.mxu0 %v371_v41  ;;  %683 = vmatpush.msrb.mxu1 %v531_v42  ;;  %v413_v39 = vld [vmem:[#allocation4 + $0x4d0] sm:$0xff]  ;;  %v414_v41 = vld [vmem:[#allocation4 + $0x4d8] sm:$0xff] }
  0x45   : > { %703 = vmatpush.msrb.mxu2 %v372_v44  ;;  %723 = vmatpush.msrb.mxu3 %v532_v46  ;;  %v573_v40 = vld [vmem:[#allocation4 + $0x9d0] sm:$0xff]  ;;  %v574_v42 = vld [vmem:[#allocation4 + $0x9d8] sm:$0xff]  ;;  %v5214_v44 = vor.u32 %v1347_v38, %v1346_v37  ;;  %v563_v46 = vld [vmem:[#allocation4 + $0x980] sm:$0xff] }
  0x46   : > { %664 = vmatpush.msrb.mxu0 %v361_v47  ;;  %684 = vmatpush.msrb.mxu1 %v521_v48  ;;  %v404_v47 = vld [vmem:[#allocation4 + $0x488] sm:$0xff]  ;;  %v293_v38 = vld [vmem:[#allocation4 + $0x110] sm:$0xff] }
  0x47   : > { %704 = vmatpush.msrb.mxu2 %v362_v49  ;;  %724 = vmatpush.msrb.mxu3 %v522_v50  ;;  %v564_v48 = vld [vmem:[#allocation4 + $0x988] sm:$0xff]  ;;  %v393_v49 = vld [vmem:[#allocation4 + $0x430] sm:$0xff] }
  0x48   : > { %665 = vmatpush.msrb.mxu0 %v351_v51  ;;  %685 = vmatpush.msrb.mxu1 %v511_v52  ;;  %v553_v50 = vld [vmem:[#allocation4 + $0x930] sm:$0xff]  ;;  %v394_v51 = vld [vmem:[#allocation4 + $0x438] sm:$0xff]  ;;  %v464_v37 = vld [vmem:[#allocation4 + $0x668] sm:$0xff] }
  0x49   : > { %705 = vmatpush.msrb.mxu2 %v352_v53  ;;  %725 = vmatpush.msrb.mxu3 %v512_v55  ;;  %v554_v52 = vld [vmem:[#allocation4 + $0x938] sm:$0xff]  ;;  %v1352_v53 = vperm.slane %v5214_v44, 2  ;;  %v1350_v55 = vperm.slane %v5214_v44, 0 }
  0x4a   : > { %1242 = vrot.lane.b32.xlu2 %v1234_v54, %s5053_s14  ;;  %1138 = vrot.lane.b32.xlu1 %v1124_v56, %s5052_s9  ;;  %v1351_v54 = vperm.slane %v5214_v44, 1  ;;  %v383_v56 = vld [vmem:[#allocation4 + $0x3e0] sm:$0xff] }
  0x4b   : > { %1244 = vrot.lane.b32.xlu0 %v1235_v57, %s5053_s14  ;;  %666 = vmatpush.msrb.mxu0 %v341_v58  ;;  %v543_v57 = vld [vmem:[#allocation4 + $0x8e0] sm:$0xff]  ;;  %v384_v58 = vld [vmem:[#allocation4 + $0x3e8] sm:$0xff] }
  0x4c   : > { %686 = vmatpush.msrb.mxu1 %v501_v59  ;;  %706 = vmatpush.msrb.mxu2 %v342_v60  ;;  %v544_v59 = vld [vmem:[#allocation4 + $0x8e8] sm:$0xff]  ;;  %v373_v60 = vld [vmem:[#allocation4 + $0x390] sm:$0xff] }
  0x4d   : > { %726 = vmatpush.msrb.mxu3 %v502_v61  ;;  %667 = vmatpush.msrb.mxu0 %v331_v62  ;;  %v533_v61 = vld [vmem:[#allocation4 + $0x890] sm:$0xff]  ;;  %v374_v62 = vld [vmem:[#allocation4 + $0x398] sm:$0xff] }
  0x4e   : > { %687 = vmatpush.msrb.mxu1 %v491_v43  ;;  %707 = vmatpush.msrb.mxu2 %v332_v63  ;;  %v534_v43 = vld [vmem:[#allocation4 + $0x898] sm:$0xff]  ;;  %v363_v63 = vld [vmem:[#allocation4 + $0x340] sm:$0xff] }
  0x4f   : > { %727 = vmatpush.msrb.mxu3 %v492_v0  ;;  %668 = vmatpush.msrb.mxu0 %v321_v1  ;;  %v523_v0 = vld [vmem:[#allocation4 + $0x840] sm:$0xff]  ;;  %v364_v1 = vld [vmem:[#allocation4 + $0x348] sm:$0xff] }
  0x50   : > { %688 = vmatpush.msrb.mxu1 %v481_v2  ;;  %708 = vmatpush.msrb.mxu2 %v322_v3  ;;  %v524_v2 = vld [vmem:[#allocation4 + $0x848] sm:$0xff]  ;;  %v353_v3 = vld [vmem:[#allocation4 + $0x2f0] sm:$0xff] }
  0x51   : > { %728 = vmatpush.msrb.mxu3 %v482_v4  ;;  %669 = vmatpush.msrb.mxu0 %v311_v5  ;;  %v513_v4 = vld [vmem:[#allocation4 + $0x7f0] sm:$0xff]  ;;  %v354_v5 = vld [vmem:[#allocation4 + $0x2f8] sm:$0xff] }
  0x52   : > { %689 = vmatpush.msrb.mxu1 %v471_v6  ;;  %709 = vmatpush.msrb.mxu2 %v312_v7  ;;  %v1355_v6 = vperm.slane %v5214_v44, 5  ;;  %v514_v7 = vld [vmem:[#allocation4 + $0x7f8] sm:$0xff] }
  0x53   : > { %729 = vmatpush.msrb.mxu3 %v472_v8  ;;  %1248 = vrot.lane.b32.xlu2 %v1237_v9, %s5053_s14  ;;  %v1354_v8 = vperm.slane %v5214_v44, 4  ;;  %v1353_v9 = vperm.slane %v5214_v44, 3 }
  0x54   : > { %1246 = vrot.lane.b32.xlu1 %v1236_v10, %s5053_s14  ;;  %1250 = vrot.lane.b32.xlu0 %v1238_v11, %s5053_s14  ;;  %v343_v10 = vld [vmem:[#allocation4 + $0x2a0] sm:$0xff] }
  0x55   : > { %670 = vmatpush.msrb.mxu0 %v301_v12  ;;  %690 = vmatpush.msrb.mxu1 %v461_v13  ;;  %v503_v11 = vld [vmem:[#allocation4 + $0x7a0] sm:$0xff] }
  0x56   : > { %710 = vmatpush.msrb.mxu2 %v302_v14  ;;  %730 = vmatpush.msrb.mxu3 %v462_v15  ;;  %v1462_v12 = vld [vmem:[#allocation6 + $0x4] ss:$8 sm:$0xf] }
  0x57   : > { %671 = vmatpush.msrb.mxu0 %v291_v16  ;;  %691 = vmatpush.msrb.mxu1 %v451_v17  ;;  %v1463_v13 = vld [vmem:[#allocation6 + $0x4] ss:$8 sm:$0xf0] }
  0x58   : > { %711 = vmatpush.msrb.mxu2 %v292_v20  ;;  %731 = vmatpush.msrb.mxu3 %v452_v21  ;;  %v344_v14 = vld [vmem:[#allocation4 + $0x2a8] sm:$0xff]  ;;  %v333_v16 = vld [vmem:[#allocation4 + $0x250] sm:$0xff]  ;;  %v334_v20 = vld [vmem:[#allocation4 + $0x258] sm:$0xff] }
  0x59   : > { %672 = vmatpush.msrb.mxu0 %v281_v22  ;;  %692 = vmatpush.msrb.mxu1 %v441_v23  ;;  %v504_v15 = vld [vmem:[#allocation4 + $0x7a8] sm:$0xff]  ;;  %v493_v17 = vld [vmem:[#allocation4 + $0x750] sm:$0xff]  ;;  %v494_v21 = vld [vmem:[#allocation4 + $0x758] sm:$0xff]  ;;  %v5230_v22 = vor.u32 %v1463_v13, %v1462_v12 }
  0x5a   : > { %712 = vmatpush.msrb.mxu2 %v282_v24  ;;  %732 = vmatpush.msrb.mxu3 %v442_v25  ;;  %v323_v23 = vld [vmem:[#allocation4 + $0x200] sm:$0xff]  ;;  %v324_v25 = vld [vmem:[#allocation4 + $0x208] sm:$0xff] }
  0x5b   : > { %673 = vmatpush.msrb.mxu0 %v271_v26  ;;  %693 = vmatpush.msrb.mxu1 %v431_v27  ;;  %v483_v24 = vld [vmem:[#allocation4 + $0x700] sm:$0xff]  ;;  %v484_v26 = vld [vmem:[#allocation4 + $0x708] sm:$0xff]  ;;  %v313_v27 = vld [vmem:[#allocation4 + $0x1b0] sm:$0xff]  ;;  %v1473_v12 = vperm.slane %v5230_v22, 7  ;;  %v1469_v13 = vperm.slane %v5230_v22, 3 }
  0x5c   : > { %713 = vmatpush.msrb.mxu2 %v272_v28  ;;  %733 = vmatpush.msrb.mxu3 %v432_v30  ;;  %v473_v28 = vld [vmem:[#allocation4 + $0x6b0] sm:$0xff]  ;;  %v474_v30 = vld [vmem:[#allocation4 + $0x6b8] sm:$0xff] }
  0x5d   : > { %1254 = vrot.lane.b32.xlu2 %v1240_v29, %s5053_s14  ;;  %1252 = vrot.lane.b32.xlu1 %v1239_v31, %s5053_s14  ;;  %v314_v29 = vld [vmem:[#allocation4 + $0x1b8] sm:$0xff]  ;;  %v1467_v31 = vperm.slane %v5230_v22, 1 }
  0x5e   : > { %1256 = vrot.lane.b32.xlu0 %v1241_v32, %s5053_s14  ;;  %674 = vmatpush.msrb.mxu0 %v261_v33  ;;  %v1357_v32 = vperm.slane %v5214_v44, 7  ;;  %v1356_v33 = vperm.slane %v5214_v44, 6  ;;  %v443_v44 = vld [vmem:[#allocation4 + $0x5c0] sm:$0xff] }
  0x5f   : > { %694 = vmatpush.msrb.mxu1 %v421_v34  ;;  %714 = vmatpush.msrb.mxu2 %v262_v35  ;;  %v303_v34 = vld [vmem:[#allocation4 + $0x160] sm:$0xff] }
  0x60   : > { %734 = vmatpush.msrb.mxu3 %v422_v36  ;;  %675 = vmatmul.f32.vlgmr.msrb.gmra.mxu0 %v5177_v18  ;;  %v463_v35 = vld [vmem:[#allocation4 + $0x660] sm:$0xff]  ;;  %v304_v36 = vld [vmem:[#allocation4 + $0x168] sm:$0xff] }
  0x61   : > { %695 = vmatmul.f32.vlgmr.msrb.gmra.mxu1 %v5180_v19  ;;  %715 = vmatmul.f32.vlgmr.msrb.gmra.mxu2 %v5177_v18 }
  0x62   : > { %735 = vmatmul.f32.vlgmr.msrb.gmra.mxu3 %v5180_v19  ;;  %739 = vmatpush.msra.mxu0 %v413_v39  ;;  %v453_v39 = vld [vmem:[#allocation4 + $0x610] sm:$0xff] }
  0x63   : > { %759 = vmatpush.msra.mxu1 %v573_v40  ;;  %779 = vmatpush.msra.mxu2 %v414_v41  ;;  %v294_v40 = vld [vmem:[#allocation4 + $0x118] sm:$0xff] }
  0x64   : > { %799 = vmatpush.msra.mxu3 %v574_v42  ;;  %740 = vmatpush.msra.mxu0 %v403_v45  ;;  %v454_v41 = vld [vmem:[#allocation4 + $0x618] sm:$0xff]  ;;  %v283_v42 = vld [vmem:[#allocation4 + $0xc0] sm:$0xff]  ;;  %v284_v45 = vld [vmem:[#allocation4 + $0xc8] sm:$0xff] }
  0x65   : > { %760 = vmatpush.msra.mxu1 %v563_v46  ;;  %780 = vmatpush.msra.mxu2 %v404_v47  ;;  %v444_v46 = vld [vmem:[#allocation4 + $0x5c8] sm:$0xff]  ;;  %v273_v47 = vld [vmem:[#allocation4 + $0x70] sm:$0xff] }
  0x66   : > { %800 = vmatpush.msra.mxu3 %v564_v48  ;;  %741 = vmatpush.msra.mxu0 %v393_v49  ;;  %v433_v48 = vld [vmem:[#allocation4 + $0x570] sm:$0xff]  ;;  %v274_v49 = vld [vmem:[#allocation4 + $0x78] sm:$0xff] }
  0x67   : > { %761 = vmatpush.msra.mxu1 %v553_v50  ;;  %781 = vmatpush.msra.mxu2 %v394_v51  ;;  %v1470_v50 = vperm.slane %v5230_v22, 4  ;;  %v434_v51 = vld [vmem:[#allocation4 + $0x578] sm:$0xff] }
  0x68   : > { %801 = vmatpush.msra.mxu3 %v554_v52  ;;  %1362 = vrot.lane.b32.xlu2 %v1352_v53, %s5054_s15  ;;  %v1466_v52 = vperm.slane %v5230_v22, 0  ;;  %v1468_v53 = vperm.slane %v5230_v22, 2 }
  0x69   : > { %1360 = vrot.lane.b32.xlu1 %v1351_v54, %s5054_s15  ;;  %1358 = vrot.lane.b32.xlu0 %v1350_v55, %s5054_s15  ;;  %v263_v54 = vld [vmem:[#allocation4 + $0x20] sm:$0xff] }
  0x6a   : > { %742 = vmatpush.msra.mxu0 %v383_v56  ;;  %762 = vmatpush.msra.mxu1 %v543_v57  ;;  %v423_v55 = vld [vmem:[#allocation4 + $0x520] sm:$0xff]  ;;  %v264_v56 = vld [vmem:[#allocation4 + $0x28] sm:$0xff] }
  0x6b   : > { %782 = vmatpush.msra.mxu2 %v384_v58  ;;  %802 = vmatpush.msra.mxu3 %v544_v59  ;;  %v424_v57 = vld [vmem:[#allocation4 + $0x528] sm:$0xff]  ;;  %v415_v58 = vld [vmem:[#allocation4 + $0x4e0] sm:$0xff] }
  0x6c   : > { %743 = vmatpush.msra.mxu0 %v373_v60  ;;  %763 = vmatpush.msra.mxu1 %v533_v61  ;;  %v575_v59 = vld [vmem:[#allocation4 + $0x9e0] sm:$0xff]  ;;  %v416_v60 = vld [vmem:[#allocation4 + $0x4e8] sm:$0xff] }
  0x6d   : > { %783 = vmatpush.msra.mxu2 %v374_v62  ;;  %803 = vmatpush.msra.mxu3 %v534_v43  ;;  %v576_v61 = vld [vmem:[#allocation4 + $0x9e8] sm:$0xff]  ;;  %v405_v62 = vld [vmem:[#allocation4 + $0x490] sm:$0xff] }
  0x6e   : > { %744 = vmatpush.msra.mxu0 %v363_v63  ;;  %764 = vmatpush.msra.mxu1 %v523_v0  ;;  %v565_v43 = vld [vmem:[#allocation4 + $0x990] sm:$0xff]  ;;  %v406_v63 = vld [vmem:[#allocation4 + $0x498] sm:$0xff] }
  0x6f   : > { %784 = vmatpush.msra.mxu2 %v364_v1  ;;  %804 = vmatpush.msra.mxu3 %v524_v2  ;;  %v566_v0 = vld [vmem:[#allocation4 + $0x998] sm:$0xff]  ;;  %v395_v2 = vld [vmem:[#allocation4 + $0x440] sm:$0xff] }
  0x70   : > { %745 = vmatpush.msra.mxu0 %v353_v3  ;;  %765 = vmatpush.msra.mxu1 %v513_v4  ;;  %v555_v3 = vld [vmem:[#allocation4 + $0x940] sm:$0xff] }
  0x71   : > { %785 = vmatpush.msra.mxu2 %v354_v5  ;;  %805 = vmatpush.msra.mxu3 %v514_v7  ;;  %v396_v5 = vld [vmem:[#allocation4 + $0x448] sm:$0xff] }
  0x72   : > { %1368 = vrot.lane.b32.xlu2 %v1355_v6, %s5054_s15  ;;  %1366 = vrot.lane.b32.xlu1 %v1354_v8, %s5054_s15  ;;  %v556_v6 = vld [vmem:[#allocation4 + $0x948] sm:$0xff]  ;;  %v385_v8 = vld [vmem:[#allocation4 + $0x3f0] sm:$0xff] }
  0x73   : > { %1364 = vrot.lane.b32.xlu0 %v1353_v9, %s5054_s15  ;;  %746 = vmatpush.msra.mxu0 %v343_v10  ;;  %v545_v9 = vld [vmem:[#allocation4 + $0x8f0] sm:$0xff]  ;;  %v386_v10 = vld [vmem:[#allocation4 + $0x3f8] sm:$0xff] }
  0x74   : > { %766 = vmatpush.msra.mxu1 %v503_v11  ;;  %786 = vmatpush.msra.mxu2 %v344_v14  ;;  %v546_v11 = vld [vmem:[#allocation4 + $0x8f8] sm:$0xff]  ;;  %v1471_v14 = vperm.slane %v5230_v22, 5 }
  0x75   : > { %806 = vmatpush.msra.mxu3 %v504_v15  ;;  %747 = vmatpush.msra.mxu0 %v333_v16  ;;  %v5248_v1 = vpop.permute.xlu2 %1018  ;;  %v375_v15 = vld [vmem:[#allocation4 + $0x3a0] sm:$0xff] }
  0x76   : > { %767 = vmatpush.msra.mxu1 %v493_v17  ;;  %787 = vmatpush.msra.mxu2 %v334_v20  ;;  %v1577_v16 = vld [vmem:[#allocation6] ss:$8 sm:$0xf] }
  0x77   : > { %807 = vmatpush.msra.mxu3 %v494_v21  ;;  %748 = vmatpush.msra.mxu0 %v323_v23  ;;  %v1578_v17 = vld [vmem:[#allocation6] ss:$8 sm:$0xf0] }
  0x78   : > { %768 = vmatpush.msra.mxu1 %v483_v24  ;;  %788 = vmatpush.msra.mxu2 %v324_v25  ;;  %v535_v20 = vld [vmem:[#allocation4 + $0x8a0] sm:$0xff]  ;;  %v376_v21 = vld [vmem:[#allocation4 + $0x3a8] sm:$0xff]  ;;  %v365_v24 = vld [vmem:[#allocation4 + $0x350] sm:$0xff] }
  0x79   : > { %808 = vmatpush.msra.mxu3 %v484_v26  ;;  %749 = vmatpush.msra.mxu0 %v313_v27  ;;  %v536_v23 = vld [vmem:[#allocation4 + $0x8a8] sm:$0xff]  ;;  %v525_v25 = vld [vmem:[#allocation4 + $0x850] sm:$0xff]  ;;  %v366_v26 = vld [vmem:[#allocation4 + $0x358] sm:$0xff]  ;;  %v5260_v27 = vor.u32 %v1578_v17, %v1577_v16 }
  0x7a   : > { %769 = vmatpush.msra.mxu1 %v473_v28  ;;  %789 = vmatpush.msra.mxu2 %v314_v29  ;;  %v526_v28 = vld [vmem:[#allocation4 + $0x858] sm:$0xff]  ;;  %v355_v29 = vld [vmem:[#allocation4 + $0x300] sm:$0xff]  ;;  %v265_v16 = vld [vmem:[#allocation4 + $0x30] sm:$0xff] }
  0x7b   : > { %809 = vmatpush.msra.mxu3 %v474_v30  ;;  %1476 = vrot.lane.b32.xlu2 %v1467_v31, %s5055_s16  ;;  %v425_v17 = vld [vmem:[#allocation4 + $0x530] sm:$0xff] }
  0x7c   : > { %1372 = vrot.lane.b32.xlu1 %v1357_v32, %s5054_s15  ;;  %1370 = vrot.lane.b32.xlu0 %v1356_v33, %s5054_s15  ;;  %v515_v32 = vld [vmem:[#allocation4 + $0x800] sm:$0xff]  ;;  %v356_v33 = vld [vmem:[#allocation4 + $0x308] sm:$0xff] }
  0x7d   : > { %750 = vmatpush.msra.mxu0 %v303_v34  ;;  %770 = vmatpush.msra.mxu1 %v463_v35  ;;  %v5264_v31 = vpop.permute.xlu2 %1020  ;;  %v516_v35 = vld [vmem:[#allocation4 + $0x808] sm:$0xff] }
  0x7e   : > { %790 = vmatpush.msra.mxu2 %v304_v36  ;;  %810 = vmatpush.msra.mxu3 %v464_v37  ;;  %v345_v36 = vld [vmem:[#allocation4 + $0x2b0] sm:$0xff] }
  0x7f   : > { %751 = vmatpush.msra.mxu0 %v293_v38  ;;  %771 = vmatpush.msra.mxu1 %v453_v39  ;;  %v505_v37 = vld [vmem:[#allocation4 + $0x7b0] sm:$0xff]  ;;  %v346_v38 = vld [vmem:[#allocation4 + $0x2b8] sm:$0xff]  ;;  %v1581_v39 = vperm.slane %v5260_v27, 0 }
  0x80   : > { %791 = vmatpush.msra.mxu2 %v294_v40  ;;  %811 = vmatpush.msra.mxu3 %v454_v41  ;;  %v506_v40 = vld [vmem:[#allocation4 + $0x7b8] sm:$0xff]  ;;  %v1472_v41 = vperm.slane %v5230_v22, 6  ;;  %v485_v22 = vld [vmem:[#allocation4 + $0x710] sm:$0xff] }
  0x81   : > { %752 = vmatpush.msra.mxu0 %v283_v42  ;;  %772 = vmatpush.msra.mxu1 %v443_v44  ;;  %v1582_v42 = vperm.slane %v5260_v27, 1  ;;  %v335_v44 = vld [vmem:[#allocation4 + $0x260] sm:$0xff] }
  0x82   : > { %792 = vmatpush.msra.mxu2 %v284_v45  ;;  %812 = vmatpush.msra.mxu3 %v444_v46  ;;  %v495_v45 = vld [vmem:[#allocation4 + $0x760] sm:$0xff]  ;;  %v336_v46 = vld [vmem:[#allocation4 + $0x268] sm:$0xff] }
  0x83   : > { %753 = vmatpush.msra.mxu0 %v273_v47  ;;  %773 = vmatpush.msra.mxu1 %v433_v48  ;;  %v496_v47 = vld [vmem:[#allocation4 + $0x768] sm:$0xff]  ;;  %v325_v48 = vld [vmem:[#allocation4 + $0x210] sm:$0xff] }
  0x84   : > { %793 = vmatpush.msra.mxu2 %v274_v49  ;;  %813 = vmatpush.msra.mxu3 %v434_v51  ;;  %v326_v49 = vld [vmem:[#allocation4 + $0x218] sm:$0xff]  ;;  %v315_v51 = vld [vmem:[#allocation4 + $0x1c0] sm:$0xff] }
  0x85   : > { %1482 = vrot.lane.b32.xlu2 %v1470_v50, %s5055_s16  ;;  %1474 = vrot.lane.b32.xlu1 %v1466_v52, %s5055_s16  ;;  %v486_v50 = vld [vmem:[#allocation4 + $0x718] sm:$0xff]  ;;  %v475_v52 = vld [vmem:[#allocation4 + $0x6c0] sm:$0xff] }
  0x86   : > { %1478 = vrot.lane.b32.xlu0 %v1468_v53, %s5055_s16  ;;  %754 = vmatpush.msra.mxu0 %v263_v54  ;;  %v5276_v54 = vpop.permute.xlu2 %1128 }
  0x87   : > { %774 = vmatpush.msra.mxu1 %v423_v55  ;;  %794 = vmatpush.msra.mxu2 %v264_v56  ;;  %v316_v55 = vld [vmem:[#allocation4 + $0x1c8] sm:$0xff] }
  0x88   : > { %814 = vmatpush.msra.mxu3 %v424_v57  ;;  %755 = vmatmul.f32.vlgmr.msra.gmra.mxu0 %v5177_v18  ;;  %v476_v56 = vld [vmem:[#allocation4 + $0x6c8] sm:$0xff] }
  0x89   : > { %775 = vmatmul.f32.vlgmr.msra.gmra.mxu1 %v5180_v19  ;;  %795 = vmatmul.f32.vlgmr.msra.gmra.mxu2 %v5177_v18 }
  0x8a   : > { %815 = vmatmul.f32.vlgmr.msra.gmra.mxu3 %v5180_v19  ;;  %819 = vmatpush.msrb.mxu0 %v415_v58  ;;  %v305_v58 = vld [vmem:[#allocation4 + $0x170] sm:$0xff] }
  0x8b   : > { %839 = vmatpush.msrb.mxu1 %v575_v59  ;;  %859 = vmatpush.msrb.mxu2 %v416_v60  ;;  %v465_v59 = vld [vmem:[#allocation4 + $0x670] sm:$0xff]  ;;  %v306_v60 = vld [vmem:[#allocation4 + $0x178] sm:$0xff] }
  0x8c   : > { %879 = vmatpush.msrb.mxu3 %v576_v61  ;;  %820 = vmatpush.msrb.mxu0 %v405_v62  ;;  %v466_v61 = vld [vmem:[#allocation4 + $0x678] sm:$0xff]  ;;  %v1583_v62 = vperm.slane %v5260_v27, 2 }
  0x8d   : > { %v5250_v4 = vpop.permute.xlu1 %1014  ;;  %840 = vmatpush.msrb.mxu1 %v565_v43  ;;  %860 = vmatpush.msrb.mxu2 %v406_v63  ;;  %v1585_v43 = vperm.slane %v5260_v27, 4  ;;  %v295_v63 = vld [vmem:[#allocation4 + $0x120] sm:$0xff] }
  0x8e   : > { %v5252_v7 = vpop.permute.xlu0 %1010  ;;  %880 = vmatpush.msrb.mxu3 %v566_v0  ;;  %821 = vmatpush.msrb.mxu0 %v395_v2  ;;  %v455_v0 = vld [vmem:[#allocation4 + $0x620] sm:$0xff]  ;;  %v296_v2 = vld [vmem:[#allocation4 + $0x128] sm:$0xff] }
  0x8f   : > { %841 = vmatpush.msrb.mxu1 %v555_v3  ;;  %861 = vmatpush.msrb.mxu2 %v396_v5  ;;  %v456_v3 = vld [vmem:[#allocation4 + $0x628] sm:$0xff]  ;;  %v285_v5 = vld [vmem:[#allocation4 + $0xd0] sm:$0xff] }
  0x90   : > { %881 = vmatpush.msrb.mxu3 %v556_v6  ;;  %822 = vmatpush.msrb.mxu0 %v385_v8  ;;  %v445_v6 = vld [vmem:[#allocation4 + $0x5d0] sm:$0xff]  ;;  %v286_v8 = vld [vmem:[#allocation4 + $0xd8] sm:$0xff] }
  0x91   : > { %842 = vmatpush.msrb.mxu1 %v545_v9  ;;  %862 = vmatpush.msrb.mxu2 %v386_v10  ;;  %v446_v9 = vld [vmem:[#allocation4 + $0x5d8] sm:$0xff]  ;;  %v275_v10 = vld [vmem:[#allocation4 + $0x80] sm:$0xff] }
  0x92   : > { %882 = vmatpush.msrb.mxu3 %v546_v11  ;;  %1488 = vrot.lane.b32.xlu2 %v1473_v12, %s5055_s16  ;;  %v435_v11 = vld [vmem:[#allocation4 + $0x580] sm:$0xff]  ;;  %v276_v12 = vld [vmem:[#allocation4 + $0x88] sm:$0xff] }
  0x93   : > { %1480 = vrot.lane.b32.xlu1 %v1469_v13, %s5055_s16  ;;  %1484 = vrot.lane.b32.xlu0 %v1471_v14, %s5055_s16  ;;  %v436_v13 = vld [vmem:[#allocation4 + $0x588] sm:$0xff] }
  0x94   : > { %823 = vmatpush.msrb.mxu0 %v375_v15  ;;  %843 = vmatpush.msrb.mxu1 %v535_v20  ;;  %v5286_v15 = vpop.permute.xlu2 %1134 }
  0x95   : > { %863 = vmatpush.msrb.mxu2 %v376_v21  ;;  %v5262_v30 = vpop.permute.xlu1 %1016  ;;  %883 = vmatpush.msrb.mxu3 %v536_v23  ;;  %v266_v21 = vld [vmem:[#allocation4 + $0x38] sm:$0xff] }
  0x96   : > { %824 = vmatpush.msrb.mxu0 %v365_v24  ;;  %v5266_v34 = vpop.permute.xlu0 %1012  ;;  %844 = vmatpush.msrb.mxu1 %v525_v25  ;;  %v426_v23 = vld [vmem:[#allocation4 + $0x538] sm:$0xff]  ;;  %v1586_v24 = vperm.slane %v5260_v27, 5  ;;  %v1588_v25 = vperm.slane %v5260_v27, 7 }
  0x97   : > { %864 = vmatpush.msrb.mxu2 %v366_v26  ;;  %884 = vmatpush.msrb.mxu3 %v526_v28  ;;  %v1692_v26 = vld [vmem:[#allocation6 + $0x1] ss:$8 sm:$0xf] }
  0x98   : > { %825 = vmatpush.msrb.mxu0 %v355_v29  ;;  %845 = vmatpush.msrb.mxu1 %v515_v32  ;;  %v1693_v28 = vld [vmem:[#allocation6 + $0x1] ss:$8 sm:$0xf0] }
  0x99   : > { %865 = vmatpush.msrb.mxu2 %v356_v33  ;;  %885 = vmatpush.msrb.mxu3 %v516_v35  ;;  %v417_v29 = vld [vmem:[#allocation4 + $0x4f0] sm:$0xff]  ;;  %v5294_v33 = vor.u32 %v1693_v28, %v1692_v26  ;;  %v1584_v35 = vperm.slane %v5260_v27, 3 }
  0x9a   : > { %826 = vmatpush.msrb.mxu0 %v345_v36  ;;  %846 = vmatpush.msrb.mxu1 %v505_v37  ;;  %v577_v32 = vld [vmem:[#allocation4 + $0x9f0] sm:$0xff]  ;;  %v407_v36 = vld [vmem:[#allocation4 + $0x4a0] sm:$0xff] }
  0x9b   : > { %866 = vmatpush.msrb.mxu2 %v346_v38  ;;  %886 = vmatpush.msrb.mxu3 %v506_v40  ;;  %v567_v37 = vld [vmem:[#allocation4 + $0x9a0] sm:$0xff]  ;;  %v397_v38 = vld [vmem:[#allocation4 + $0x450] sm:$0xff]  ;;  %v1697_v40 = vperm.slane %v5294_v33, 1  ;;  %v1701_v26 = vperm.slane %v5294_v33, 5 }
  0x9c   : > { %1589 = vrot.lane.b32.xlu2 %v1581_v39, %s5056_s17  ;;  %1486 = vrot.lane.b32.xlu1 %v1472_v41, %s5055_s16  ;;  %v557_v39 = vld [vmem:[#allocation4 + $0x950] sm:$0xff]  ;;  %v1696_v41 = vperm.slane %v5294_v33, 0 }
  0x9d   : > { %1591 = vrot.lane.b32.xlu0 %v1582_v42, %s5056_s17  ;;  %827 = vmatpush.msrb.mxu0 %v335_v44  ;;  %v5274_v53 = vpop.permute.xlu1 %1024  ;;  %v5306_v44 = vpop.permute.xlu2 %1140 }
  0x9e   : > { %847 = vmatpush.msrb.mxu1 %v495_v45  ;;  %867 = vmatpush.msrb.mxu2 %v336_v46  ;;  %v5278_v57 = vpop.permute.xlu0 %1022  ;;  %v547_v45 = vld [vmem:[#allocation4 + $0x900] sm:$0xff]  ;;  %v377_v46 = vld [vmem:[#allocation4 + $0x3b0] sm:$0xff] }
  0x9f   : > { %887 = vmatpush.msrb.mxu3 %v496_v47  ;;  %828 = vmatpush.msrb.mxu0 %v325_v48  ;;  %v537_v47 = vld [vmem:[#allocation4 + $0x8b0] sm:$0xff]  ;;  %v1587_v48 = vperm.slane %v5260_v27, 6 }
  0xa0   : > { %848 = vmatpush.msrb.mxu1 %v485_v22  ;;  %868 = vmatpush.msrb.mxu2 %v326_v49  ;;  %v367_v22 = vld [vmem:[#allocation4 + $0x360] sm:$0xff] }
  0xa1   : > { %888 = vmatpush.msrb.mxu3 %v486_v50  ;;  %829 = vmatpush.msrb.mxu0 %v315_v51  ;;  %v527_v49 = vld [vmem:[#allocation4 + $0x860] sm:$0xff]  ;;  %v357_v50 = vld [vmem:[#allocation4 + $0x310] sm:$0xff] }
  0xa2   : > { %849 = vmatpush.msrb.mxu1 %v475_v52  ;;  %869 = vmatpush.msrb.mxu2 %v316_v55  ;;  %v517_v51 = vld [vmem:[#allocation4 + $0x810] sm:$0xff]  ;;  %v1700_v52 = vperm.slane %v5294_v33, 4  ;;  %v1699_v55 = vperm.slane %v5294_v33, 3 }
  0xa3   : > { %889 = vmatpush.msrb.mxu3 %v476_v56  ;;  %830 = vmatpush.msrb.mxu0 %v305_v58  ;;  %v347_v56 = vld [vmem:[#allocation4 + $0x2c0] sm:$0xff] }
  0xa4   : > { %850 = vmatpush.msrb.mxu1 %v465_v59  ;;  %870 = vmatpush.msrb.mxu2 %v306_v60  ;;  %v507_v58 = vld [vmem:[#allocation4 + $0x7c0] sm:$0xff] }
  0xa5   : > { %890 = vmatpush.msrb.mxu3 %v466_v61  ;;  %1593 = vrot.lane.b32.xlu1 %v1583_v62, %s5056_s17  ;;  %v5284_v14 = vpop.permute.xlu1 %1126  ;;  %v1243_v27 = vpop.permute.xlu2 %1242  ;;  %v337_v61 = vld [vmem:[#allocation4 + $0x270] sm:$0xff] }
  0xa6   : > { %1597 = vrot.lane.b32.xlu0 %v1585_v43, %s5056_s17  ;;  %831 = vmatpush.msrb.mxu0 %v295_v63  ;;  %v5288_v20 = vpop.permute.xlu0 %1130  ;;  %v497_v62 = vld [vmem:[#allocation4 + $0x770] sm:$0xff]  ;;  %v1698_v43 = vperm.slane %v5294_v33, 2 }
  0xa7   : > { %851 = vmatpush.msrb.mxu1 %v455_v0  ;;  %871 = vmatpush.msrb.mxu2 %v296_v2  ;;  %v327_v2 = vld [vmem:[#allocation4 + $0x220] sm:$0xff] }
  0xa8   : > { %891 = vmatpush.msrb.mxu3 %v456_v3  ;;  %832 = vmatpush.msrb.mxu0 %v285_v5  ;;  %v487_v3 = vld [vmem:[#allocation4 + $0x720] sm:$0xff] }
  0xa9   : > { %852 = vmatpush.msrb.mxu1 %v445_v6  ;;  %872 = vmatpush.msrb.mxu2 %v286_v8  ;;  %v317_v8 = vld [vmem:[#allocation4 + $0x1d0] sm:$0xff] }
  0xaa   : > { %892 = vmatpush.msrb.mxu3 %v446_v9  ;;  %833 = vmatpush.msrb.mxu0 %v275_v10  ;;  %v477_v9 = vld [vmem:[#allocation4 + $0x6d0] sm:$0xff]  ;;  %v1703_v10 = vperm.slane %v5294_v33, 7 }
  0xab   : > { %853 = vmatpush.msrb.mxu1 %v435_v11  ;;  %873 = vmatpush.msrb.mxu2 %v276_v12  ;;  %v1702_v11 = vperm.slane %v5294_v33, 6 }
  0xac   : > { %893 = vmatpush.msrb.mxu3 %v436_v13  ;;  %834 = vmatpush.msrb.mxu0 %v265_v16  ;;  %v307_v13 = vld [vmem:[#allocation4 + $0x180] sm:$0xff] }
  0xad   : > { %854 = vmatpush.msrb.mxu1 %v425_v17  ;;  %874 = vmatpush.msrb.mxu2 %v266_v21  ;;  %v467_v16 = vld [vmem:[#allocation4 + $0x680] sm:$0xff]  ;;  %v1143_v21 = vsel %vm1142_vm0, %v5284_v14, %v5276_v54 }
  0xae   : > { %894 = vmatpush.msrb.mxu3 %v426_v23  ;;  %1599 = vrot.lane.b32.xlu1 %v1586_v24, %s5056_s17  ;;  %v297_v24 = vld [vmem:[#allocation4 + $0x130] sm:$0xff] }
  0xaf   : > { %1603 = vrot.lane.b32.xlu0 %v1588_v25, %s5056_s17  ;;  %835 = vmatmul.f32.vlgmr.msrb.gmra.mxu0 %v5177_v18  ;;  %v457_v25 = vld [vmem:[#allocation4 + $0x630] sm:$0xff] }
  0xb0   : > { %855 = vmatmul.f32.vlgmr.msrb.gmra.mxu1 %v5180_v19  ;;  %875 = vmatmul.f32.vlgmr.msrb.gmra.mxu2 %v5177_v18 }
  0xb1   : > { %895 = vmatmul.f32.vlgmr.msrb.gmra.mxu3 %v5180_v19  ;;  %899 = vmatpush.msra.mxu0 %v417_v29  ;;  %v387_v19 = vld [vmem:[#allocation4 + $0x400] sm:$0xff] }
  0xb2   : > { %919 = vmatpush.msra.mxu1 %v577_v32  ;;  %1595 = vrot.lane.b32.xlu2 %v1584_v35, %s5056_s17  ;;  %v5342_v35 = vpop.permute.xlu2 %1248 }
  0xb3   : > { %v5304_v42 = vpop.permute.xlu1 %1132  ;;  %900 = vmatpush.msra.mxu0 %v407_v36  ;;  %v5308_v18 = vpop.permute.xlu0 %1136 }
  0xb4   : > { %920 = vmatpush.msra.mxu1 %v567_v37  ;;  %v287_v37 = vld [vmem:[#allocation4 + $0xe0] sm:$0xff] }
  0xb5   : > { %901 = vmatpush.msra.mxu0 %v397_v38  ;;  %v596_v5 = vpop.f32.mrf.mxu0  ;;  %v447_v38 = vld [vmem:[#allocation4 + $0x5e0] sm:$0xff] }
  0xb6   : > { %921 = vmatpush.msra.mxu1 %v557_v39  ;;  %1706 = vrot.lane.b32.xlu1 %v1697_v40, %s5057_s19  ;;  %v616_v6 = vpop.f32.mrf.mxu1  ;;  %v1027_v40 = vsel %vm7575_vm2, %v5252_v7, %v5266_v34 }
  0xb7   : > { %1704 = vrot.lane.b32.xlu0 %v1696_v41, %s5057_s19  ;;  %902 = vmatpush.msra.mxu0 %v387_v19  ;;  %v5328_v17 = vadd.f32 %v616_v6, %v596_v5  ;;  %v277_v41 = vld [vmem:[#allocation4 + $0x90] sm:$0xff] }
  0xb8   : > { %922 = vmatpush.msra.mxu1 %v547_v45  ;;  %v437_v19 = vld [vmem:[#allocation4 + $0x590] sm:$0xff] }
  0xb9   : > { %903 = vmatpush.msra.mxu0 %v377_v46  ;;  %v1275_v39 = vmul.f32 %v1243_v27, %v5328_v17  ;;  %v1159_v33 = vmul.f32 %v5284_v14, %v5328_v17  ;;  %v427_v14 = vld [vmem:[#allocation4 + $0x540] sm:$0xff] }
  0xba   : > { %923 = vmatpush.msra.mxu1 %v537_v47  ;;  %1601 = vrot.lane.b32.xlu2 %v1587_v48, %s5056_s17  ;;  %v267_v48 = vld [vmem:[#allocation4 + $0x40] sm:$0xff] }
  0xbb   : > { %904 = vmatpush.msra.mxu0 %v367_v22  ;;  %v1043_v22 = vmul.f32 %v5252_v7, %v5328_v17 }
  0xbc   : > { %924 = vmatpush.msra.mxu1 %v527_v49  ;;  %v5316_v59 = vpop.permute.xlu1 %1138  ;;  %v636_v63 = vpop.f32.mrf.mxu2 }
  0xbd   : > { %905 = vmatpush.msra.mxu0 %v357_v50  ;;  %v5318_v60 = vpop.permute.xlu0 %1244  ;;  %v656_v0 = vpop.f32.mrf.mxu3  ;;  %v4966_v50 = vld [vmem:[%s5172_s13] sm:$0xff] }
  0xbe   : > { %925 = vmatpush.msra.mxu1 %v517_v51  ;;  %1712 = vrot.lane.b32.xlu1 %v1700_v52, %s5057_s19  ;;  %v5326_v12 = vadd.f32 %v656_v0, %v636_v63  ;;  %v1259_v23 = vsel %vm1258_vm1, %v1243_v27, %v5318_v60  ;;  %v4967_v51 = vld [vmem:[%s5172_s13 + $0x8] sm:$0xff] }
  0xbf   : > { %1710 = vrot.lane.b32.xlu0 %v1699_v55, %s5057_s19  ;;  %906 = vmatpush.msra.mxu0 %v347_v56  ;;  %v5362_v55 = vpop.permute.xlu2 %1254 }
  0xc0   : > { %926 = vmatpush.msra.mxu1 %v507_v58  ;;  %v1276_v29 = vmul.f32 %v1259_v23, %v5326_v12  ;;  %v1160_v32 = vmul.f32 %v1143_v21, %v5326_v12  ;;  %v1044_v47 = vmul.f32 %v1027_v40, %v5326_v12 }
  0xc1   : > { %907 = vmatpush.msra.mxu0 %v337_v61 }
  0xc2   : > { %927 = vmatpush.msra.mxu1 %v497_v62  ;;  %1708 = vrot.lane.b32.xlu2 %v1698_v43, %s5057_s19  ;;  %v4495_v45 = vpack.i.bf16 %v1276_v29, %v1275_v39  ;;  %v4490_v46 = vpack.i.bf16 %v1160_v32, %v1159_v33  ;;  %v4485_v49 = vpack.i.bf16 %v1044_v47, %v1043_v22 }
  0xc3   : > { %908 = vmatpush.msra.mxu0 %v327_v2  ;;  %v1028_v33 = vsel %vm7575_vm2, %v5266_v34, %v5250_v4 }
  0xc4   : > { %928 = vmatpush.msra.mxu1 %v487_v3 }
  0xc5   : > { %909 = vmatpush.msra.mxu0 %v317_v8 }
  0xc6   : > { %929 = vmatpush.msra.mxu1 %v477_v9  ;;  %1718 = vrot.lane.b32.xlu1 %v1703_v10, %s5057_s19  ;;  %v5338_v28 = vpop.permute.xlu1 %1246  ;;  %v5344_v36 = vpop.permute.xlu0 %1250 }
  0xc7   : > { %1716 = vrot.lane.b32.xlu0 %v1702_v11, %s5057_s19  ;;  %910 = vmatpush.msra.mxu0 %v307_v13  ;;  %v1363_v58 = vpop.permute.xlu2 %1362 }
  0xc8   : > { %930 = vmatpush.msra.mxu1 %v467_v16 }
  0xc9   : > { %911 = vmatpush.msra.mxu0 %v297_v24 }
  0xca   : > { %931 = vmatpush.msra.mxu1 %v457_v25  ;;  %1714 = vrot.lane.b32.xlu2 %v1701_v26, %s5057_s19 }
  0xcb   : > { %912 = vmatpush.msra.mxu0 %v287_v37 }
  0xcc   : > { %932 = vmatpush.msra.mxu1 %v447_v38  ;;  %v1029_v38 = vsel %vm7575_vm2, %v5250_v4, %v5262_v30 }
  0xcd   : > { %913 = vmatpush.msra.mxu0 %v277_v41 }
  0xce   : > { %933 = vmatpush.msra.mxu1 %v437_v19  ;;  %4496 = vrot.lane.b32.xlu1 %v4495_v45, %s5058_s20 }
  0xcf   : > { %4491 = vrot.lane.b32.xlu0 %v4490_v46, %s5059_s21  ;;  %914 = vmatpush.msra.mxu0 %v267_v48  ;;  %v5360_v52 = vpop.permute.xlu1 %1252  ;;  %v5373_v2 = vpop.permute.xlu2 %1368 }
  0xd0   : > { %934 = vmatpush.msra.mxu1 %v427_v14  ;;  %915 = vmatmul.f32.vlgmr.msra.gmra.mxu0 %v4966_v50  ;;  %v5364_v7 = vpop.permute.xlu0 %1256 }
  0xd1   : > { %935 = vmatmul.f32.vlgmr.msra.gmra.mxu1 %v4967_v51 }
  0xd2   : > { %4486 = vrot.lane.b32.xlu2 %v4485_v49, %s5060_s23 }
  0xd7   : > { %v5379_v6 = vpop.permute.xlu2 %1476 }
  0xdb   : > { %v1361_v56 = vpop.permute.xlu1 %1360  ;;  %v1359_v27 = vpop.permute.xlu0 %1358 }
  0xdc   : > { %v1375_v61 = vsel %vm1374_vm3, %v1359_v27, %v1361_v56  ;;  %v1391_v62 = vmul.f32 %v1359_v27, %v5328_v17  ;;  %v1376_v14 = vsel %vm1374_vm3, %v1361_v56, %v1363_v58 }
  0xdd   : > { %v1392_v43 = vmul.f32 %v1375_v61, %v5326_v12  ;;  %v676_v24 = vpop.f32.mrf.mxu0 }
  0xde   : > { %v696_v25 = vpop.f32.mrf.mxu1 }
  0xdf   : > { %v4500_v63 = vpack.i.bf16 %v1392_v43, %v1391_v62  ;;  %v5386_v21 = vpop.permute.xlu2 %1482  ;;  %v5391_v37 = vadd.f32 %v696_v25, %v676_v24  ;;  %v1263_v43 = vsel %vm1258_vm1, %v5344_v36, %v5360_v52  ;;  %v1145_v25 = vsel %vm1142_vm0, %v5288_v20, %v5304_v42 }
  0xe1   : > { %4501 = vrot.lane.b32.xlu2 %v4500_v63, %s5061_s24  ;;  %v1045_v40 = vmul.f32 %v1028_v33, %v5391_v37  ;;  %v1393_v4 = vmul.f32 %v1376_v14, %v5391_v37 }
  0xe4   : > { %v5371_v0 = vpop.permute.xlu1 %1366  ;;  %v716_v10 = vpop.f32.mrf.mxu2 }
  0xe5   : > { %v5375_v3 = vpop.permute.xlu0 %1364  ;;  %v736_v11 = vpop.f32.mrf.mxu3 }
  0xe6   : > { %v5389_v26 = vadd.f32 %v736_v11, %v716_v10  ;;  %v1377_v47 = vsel %vm1374_vm3, %v1363_v58, %v5375_v3  ;;  %v1262_v10 = vsel %vm1258_vm1, %v5342_v35, %v5344_v36  ;;  %v1144_v36 = vsel %vm1142_vm0, %v5276_v54, %v5288_v20 }
  0xe7   : > { %v1161_v33 = vmul.f32 %v1144_v36, %v5391_v37  ;;  %v1378_v36 = vsel %vm1374_vm3, %v5375_v3, %v5371_v0 }
  0xe8   : > { %v1046_v39 = vmul.f32 %v1029_v38, %v5389_v26  ;;  %v1394_v48 = vmul.f32 %v1377_v47, %v5389_v26 }
  0xea   : > { %v4520_v19 = vpack.i.bf16 %v1046_v39, %v1045_v40  ;;  %v4535_v49 = vpack.i.bf16 %v1394_v48, %v1393_v4 }
  0xec   : > { %v5402_v41 = vpop.permute.xlu2 %1488 }
  0xee   : > { %v5377_v5 = vpop.permute.xlu1 %1372  ;;  %v5381_v8 = vpop.permute.xlu0 %1370 }
  0xf6   : > { %v1590_v27 = vpop.permute.xlu2 %1589 }
  0xf7   : > { %v1475_v9 = vpop.permute.xlu1 %1474  ;;  %v1622_v11 = vmul.f32 %v1590_v27, %v5328_v17 }
  0xf8   : > { %v1491_v13 = vsel %vm1490_vm4, %v1475_v9, %v5379_v6  ;;  %v1507_v16 = vmul.f32 %v1475_v9, %v5328_v17  ;;  %v1479_v29 = vpop.permute.xlu0 %1478 }
  0xf9   : > { %v1508_v23 = vmul.f32 %v1491_v13, %v5326_v12  ;;  %v1492_v47 = vsel %vm1490_vm4, %v5379_v6, %v1479_v29 }
  0xfa   : > { %v1509_v54 = vmul.f32 %v1492_v47, %v5391_v37  ;;  %v1260_v47 = vsel %vm1258_vm1, %v5318_v60, %v5338_v28  ;;  %v1149_v60 = vsel %vm1142_vm0, %v5316_v59, %v5306_v44 }
  0xfb   : > { %v4505_v32 = vpack.i.bf16 %v1508_v23, %v1507_v16 }
  0xfd   : > { %4506 = vrot.lane.b32.xlu0 %v4505_v32, %s5062_s25  ;;  %v1162_v32 = vmul.f32 %v1145_v25, %v5389_v26 }
  0xff   : > { %v4525_v40 = vpack.i.bf16 %v1162_v32, %v1161_v33  ;;  %v1261_v32 = vsel %vm1258_vm1, %v5338_v28, %v5342_v35  ;;  %v1265_v28 = vsel %vm1258_vm1, %v5362_v55, %v5364_v7 }
 0x105   : > { %v5404_v45 = vpop.permute.xlu1 %1480  ;;  %v5406_v46 = vpop.permute.xlu0 %1484  ;;  %4521 = vrot.lane.b32.xlu0 %v4520_v19, %s5060_s23 }
 0x106   : > { %v756_v34 = vpop.f32.mrf.mxu0  ;;  %v776_v22 = vpop.f32.mrf.mxu1  ;;  %v1493_v19 = vsel %vm1490_vm4, %v1479_v29, %v5404_v45  ;;  %v1031_v29 = vsel %vm7575_vm2, %v5248_v1, %v5264_v31 }
 0x107   : > { %v5414_v61 = vadd.f32 %v776_v22, %v756_v34  ;;  %v1510_v48 = vmul.f32 %v1493_v19, %v5389_v26  ;;  %v1278_v19 = vmul.f32 %v1261_v32, %v5389_v26 }
 0x109   : > { %v1279_v16 = vmul.f32 %v1262_v10, %v5414_v61 }
 0x10c   : > { %v796_v50 = vpop.f32.mrf.mxu2  ;;  %v1596_v14 = vpop.permute.xlu2 %1595 }
 0x10d   : > { %v816_v51 = vpop.f32.mrf.mxu3  ;;  %4536 = vrot.lane.b32.xlu0 %v4535_v49, %s5061_s24 }
 0x10e   : > { %v5416_v62 = vadd.f32 %v816_v51, %v796_v50  ;;  %v5422_v56 = vpop.permute.xlu1 %1486  ;;  %v4540_v51 = vpack.i.bf16 %v1510_v48, %v1509_v54  ;;  %v1277_v54 = vmul.f32 %v1260_v47, %v5391_v37 }
 0x10f   : > { %v5424_v58 = vpop.permute.xlu0 %1591 }
 0x110   : > { %7635 = vst [vmem:[#allocation10_spill] sm:$0xff] %v5416_v62  ;;  %v1606_v63 = vsel %vm1605_vm5, %v1590_v27, %v5424_v58  ;;  %v1280_v9 = vmul.f32 %v1263_v43, %v5416_v62  ;;  %v1048_v27 = vmul.f32 %v1031_v29, %v5416_v62  ;;  %v1030_v43 = vsel %vm7575_vm2, %v5262_v30, %v5248_v1 }
 0x111   : > { %v1623_v13 = vmul.f32 %v1606_v63, %v5326_v12  ;;  %v1047_v10 = vmul.f32 %v1030_v43, %v5414_v61  ;;  %v1379_v1 = vsel %vm1374_vm3, %v5371_v0, %v5373_v2  ;;  %v1148_v0 = vsel %vm1142_vm0, %v5308_v18, %v5316_v59 }
 0x112   : > { %v4560_v24 = vpack.i.bf16 %v1280_v9, %v1279_v16  ;;  %v1396_v25 = vmul.f32 %v1379_v1, %v5416_v62  ;;  %v1264_v59 = vsel %vm1258_vm1, %v5360_v52, %v5362_v55  ;;  %v1496_v55 = vsel %vm1490_vm4, %v5406_v46, %v5422_v56 }
 0x113   : > { %v4510_v23 = vpack.i.bf16 %v1623_v13, %v1622_v11 }
 0x114   : > { %v1602_v30 = vpop.permute.xlu2 %1601 }
 0x115   : > { %4511 = vrot.lane.b32.xlu1 %v4510_v23, %s5063_s26  ;;  %4561 = vrot.lane.b32.xlu0 %v4560_v24, %s5058_s20  ;;  %v4550_v23 = vpack.i.bf16 %v1048_v27, %v1047_v10 }
 0x117   : > { %v1594_v38 = vpop.permute.xlu1 %1593 }
 0x118   : > { %v1598_v39 = vpop.permute.xlu0 %1597 }
 0x119   : > { %v1609_v4 = vsel %vm1605_vm5, %v1596_v14, %v1598_v39 }
 0x11a   : > { %v1626_v49 = vmul.f32 %v1609_v4, %v5414_v61 }
 0x11c   : > { %v1709_v10 = vpop.permute.xlu2 %1708 }
 0x11d   : > { %4526 = vrot.lane.b32.xlu1 %v4525_v40, %s5059_s21  ;;  %v1395_v40 = vmul.f32 %v1378_v36, %v5414_v61 }
 0x11f   : > { %v4565_v4 = vpack.i.bf16 %v1396_v25, %v1395_v40  ;;  %v1147_v25 = vsel %vm1142_vm0, %v5286_v15, %v5308_v18  ;;  %v1146_v40 = vsel %vm1142_vm0, %v5304_v42, %v5286_v15 }
 0x120   : > { %v5453_v20 = vpop.permute.xlu1 %1599  ;;  %v1163_v18 = vmul.f32 %v1146_v40, %v5414_v61 }
 0x121   : > { %v5455_v34 = vpop.permute.xlu0 %1603  ;;  %v1610_v22 = vsel %vm1605_vm5, %v1598_v39, %v5453_v20  ;;  %v1611_v32 = vsel %vm1605_vm5, %v5453_v20, %v1602_v30 }
 0x122   : > { %v1627_v50 = vmul.f32 %v1610_v22, %v5416_v62 }
 0x124   : > { %v4575_v6 = vpack.i.bf16 %v1627_v50, %v1626_v49  ;;  %v4530_v49 = vpack.i.bf16 %v1278_v19, %v1277_v54  ;;  %v1607_v50 = vsel %vm1605_vm5, %v5424_v58, %v1594_v38  ;;  %v1715_v47 = vpop.permute.xlu2 %1714 }
 0x125   : > { %4541 = vrot.lane.b32.xlu1 %v4540_v51, %s5062_s25  ;;  %v1608_v51 = vsel %vm1605_vm5, %v1594_v38, %v1596_v14  ;;  %v1624_v43 = vmul.f32 %v1607_v50, %v5391_v37 }
 0x126   : > { %4576 = vrot.lane.b32.xlu0 %v4575_v6, %s5063_s26 }
 0x128   : > { %v5470_v63 = vpop.permute.xlu1 %1706 }
 0x129   : > { %v1705_v9 = vpop.permute.xlu0 %1704  ;;  %v1722_v20 = vsel %vm1720_vm6, %v5470_v63, %v1709_v10 }
 0x12a   : > { %v1721_v11 = vsel %vm1720_vm6, %v1705_v9, %v5470_v63  ;;  %v1737_v13 = vmul.f32 %v1705_v9, %v5328_v17  ;;  %v1625_v9 = vmul.f32 %v1608_v51, %v5389_v26  ;;  %v1739_v42 = vmul.f32 %v1722_v20, %v5391_v37 }
 0x12b   : > { %v1738_v16 = vmul.f32 %v1721_v11, %v5326_v12  ;;  %v1497_v11 = vsel %vm1490_vm4, %v5422_v56, %v5402_v41  ;;  %v1495_v63 = vsel %vm1490_vm4, %v5386_v21, %v5406_v46  ;;  %v1033_v46 = vsel %vm7575_vm2, %v5278_v57, %v5274_v53 }
 0x12c   : > { %v836_v39 = vpop.f32.mrf.mxu0 }
 0x12d   : > { %4551 = vrot.lane.b32.xlu1 %v4550_v23, %s5060_s23  ;;  %v4515_v24 = vpack.i.bf16 %v1738_v16, %v1737_v13  ;;  %v856_v33 = vpop.f32.mrf.mxu1  ;;  %v4545_v13 = vpack.i.bf16 %v1625_v9, %v1624_v43  ;;  %v1612_v16 = vsel %vm1605_vm5, %v1602_v30, %v5455_v34  ;;  %v1032_v43 = vsel %vm7575_vm2, %v5264_v31, %v5278_v57 }
 0x12e   : > { %v5494_v48 = vadd.f32 %v856_v33, %v836_v39  ;;  %v1164_v33 = vmul.f32 %v1147_v25, %v5416_v62  ;;  %v1380_v57 = vsel %vm1374_vm3, %v5373_v2, %v5381_v8 }
 0x12f   : > { %4516 = vrot.lane.b32.xlu2 %v4515_v24, %s5064_s27 }
 0x130   : > { %v1165_v6 = vmul.f32 %v1148_v0, %v5494_v48  ;;  %v1281_v38 = vmul.f32 %v1264_v59, %v5494_v48  ;;  %v1513_v24 = vmul.f32 %v1496_v55, %v5494_v48  ;;  %v1713_v36 = vpop.permute.xlu1 %1712  ;;  %v1628_v56 = vmul.f32 %v1611_v32, %v5494_v48 }
 0x131   : > { %v1711_v23 = vpop.permute.xlu0 %1710  ;;  %v1725_v30 = vsel %vm1720_vm6, %v1713_v36, %v1715_v47  ;;  %v4555_v15 = vpack.i.bf16 %v1164_v33, %v1163_v18  ;;  %v1397_v55 = vmul.f32 %v1380_v57, %v5494_v48  ;;  %v5626_v18 = vpop.permute.xlu2 %4486 }
 0x132   : > { %v1723_v19 = vsel %vm1720_vm6, %v1709_v10, %v1711_v23  ;;  %v1724_v54 = vsel %vm1720_vm6, %v1711_v23, %v1713_v36  ;;  %v1049_v10 = vmul.f32 %v1032_v43, %v5494_v48 }
 0x133   : > { %v876_v35 = vpop.f32.mrf.mxu2  ;;  %v1741_v0 = vmul.f32 %v1724_v54, %v5414_v61 }
 0x134   : > { %v896_v22 = vpop.f32.mrf.mxu3 }
 0x135   : > { %v5500_v3 = vadd.f32 %v896_v22, %v876_v35  ;;  %4566 = vrot.lane.b32.xlu1 %v4565_v4, %s5061_s24  ;;  %v1740_v35 = vmul.f32 %v1723_v19, %v5389_v26  ;;  %v1742_v22 = vmul.f32 %v1725_v30, %v5416_v62 }
 0x137   : > { %4531 = vrot.lane.b32.xlu2 %v4530_v49, %s5058_s20  ;;  %v1166_v29 = vmul.f32 %v1149_v60, %v5500_v3  ;;  %v1282_v27 = vmul.f32 %v1265_v28, %v5500_v3  ;;  %v1514_v52 = vmul.f32 %v1497_v11, %v5500_v3  ;;  %v1629_v1 = vmul.f32 %v1612_v16, %v5500_v3 }
 0x138   : > { %v4605_v49 = vpack.i.bf16 %v1740_v35, %v1739_v42  ;;  %v1512_v60 = vmul.f32 %v1495_v63, %v5416_v62  ;;  %v1494_v28 = vsel %vm1490_vm4, %v5404_v45, %v5386_v21  ;;  %v4615_v50 = vpack.i.bf16 %v1742_v22, %v1741_v0  ;;  %v1719_v11 = vpop.permute.xlu1 %1718 }
 0x139   : > { %v4585_v58 = vpack.i.bf16 %v1166_v29, %v1165_v6  ;;  %v4590_v14 = vpack.i.bf16 %v1282_v27, %v1281_v38  ;;  %v4600_v39 = vpack.i.bf16 %v1514_v52, %v1513_v24  ;;  %v4610_v4 = vpack.i.bf16 %v1629_v1, %v1628_v56 }
 0x13a   : > { %v1511_v51 = vmul.f32 %v1494_v28, %v5414_v61  ;;  %v1050_v45 = vmul.f32 %v1033_v46, %v5500_v3 }
 0x13b   : > { %4586 = vrot.lane.b32.xlu0 %v4585_v58, %s5059_s21 }
 0x13c   : > { %v4570_v6 = vpack.i.bf16 %v1512_v60, %v1511_v51  ;;  %v4580_v58 = vpack.i.bf16 %v1050_v45, %v1049_v10 }
 0x13d   : > { %4591 = vrot.lane.b32.xlu1 %v4590_v14, %s5058_s20  ;;  %v1808_v14 = vld [vmem:[#allocation6 + $0x2] ss:$8 sm:$0xf0] }
 0x13f   : > { %4546 = vrot.lane.b32.xlu2 %v4545_v13, %s5063_s26  ;;  %v1717_v13 = vpop.permute.xlu0 %1716 }
 0x140   : > { %v1726_v23 = vsel %vm1720_vm6, %v1715_v47, %v1717_v13  ;;  %v1727_v24 = vsel %vm1720_vm6, %v1717_v13, %v1719_v11 }
 0x141   : > { %v1743_v2 = vmul.f32 %v1726_v23, %v5494_v48 }
 0x143   : > { %4601 = vrot.lane.b32.xlu0 %v4600_v39, %s5062_s25 }
 0x145   : > { %4611 = vrot.lane.b32.xlu1 %v4610_v4, %s5063_s26 }
 0x147   : > { %4556 = vrot.lane.b32.xlu2 %v4555_v15, %s5059_s21  ;;  %v5610_v36 = vpop.permute.xlu0 %4491  ;;  %v5642_v15 = vpop.permute.xlu2 %4501 }
 0x14b   : > { %4606 = vrot.lane.b32.xlu0 %v4605_v49, %s5064_s27 }
 0x14d   : > { %4616 = vrot.lane.b32.xlu1 %v4615_v50, %s5064_s27  ;;  %v916_v29 = vpop.f32.mrf.mxu0 }
 0x14e   : > { %v936_v27 = vpop.f32.mrf.mxu1 }
 0x14f   : > { %v5569_v59 = vadd.f32 %v936_v27, %v916_v29  ;;  %4571 = vrot.lane.b32.xlu2 %v4570_v6, %s5062_s25 }
 0x151   : > { %v1051_v21 = vmul.f32 %v5274_v53, %v5569_v59  ;;  %v1167_v9 = vmul.f32 %v5306_v44, %v5569_v59  ;;  %v1381_v53 = vsel %vm1374_vm3, %v5381_v8, %v5377_v5  ;;  %v1399_v38 = vmul.f32 %v5377_v5, %v5569_v59  ;;  %v1807_v44 = vld [vmem:[#allocation6 + $0x2] ss:$8 sm:$0xf] }
 0x152   : > { %v1398_v31 = vmul.f32 %v1381_v53, %v5500_v3  ;;  %v1515_v52 = vmul.f32 %v5402_v41, %v5569_v59  ;;  %v1809_v16 = vor.u32 %v1808_v14, %v1807_v44  ;;  %v1744_v8 = vmul.f32 %v1727_v24, %v5500_v3 }
 0x153   : > { %1077 = vrot.lane.b32.xlu0 %v1051_v21, %s5060_s23  ;;  %v1745_v1 = vmul.f32 %v1719_v11, %v5569_v59  ;;  %v1283_v56 = vmul.f32 %v5364_v7, %v5569_v59  ;;  %v1630_v47 = vmul.f32 %v5455_v34, %v5569_v59  ;;  %v5637_v34 = vpop.permute.xlu1 %4496 }
 0x154   : > { %v4595_v5 = vpack.i.bf16 %v1398_v31, %v1397_v55  ;;  %v1811_v25 = vperm.slane %v1809_v16, 0  ;;  %v4620_v41 = vpack.i.bf16 %v1744_v8, %v1743_v2  ;;  %v1813_v32 = vperm.slane %v1809_v16, 2 }
 0x155   : > { %1193 = vrot.lane.b32.xlu1 %v1167_v9, %s5059_s21  ;;  %v1814_v39 = vperm.slane %v1809_v16, 3  ;;  %v1816_v33 = vperm.slane %v1809_v16, 5  ;;  %v1817_v19 = vperm.slane %v1809_v16, 6  ;;  %v1812_v30 = vperm.slane %v1809_v16, 1 }
 0x156   : > { %v1815_v0 = vperm.slane %v1809_v16, 4  ;;  %v1818_v28 = vperm.slane %v1809_v16, 7 }
 0x157   : > { %4581 = vrot.lane.b32.xlu2 %v4580_v58, %s5060_s23 }
 0x15b   : > { %1425 = vrot.lane.b32.xlu0 %v1399_v38, %s5061_s24 }
 0x15d   : > { %1541 = vrot.lane.b32.xlu1 %v1515_v52, %s5062_s25 }
 0x15f   : > { %4596 = vrot.lane.b32.xlu2 %v4595_v5, %s5061_s24 }
 0x163   : > { %1771 = vrot.lane.b32.xlu0 %v1745_v1, %s5064_s27 }
 0x165   : > { %1819 = vrot.lane.b32.xlu1 %v1811_v25, %s5065_s28 }
 0x167   : > { %4621 = vrot.lane.b32.xlu2 %v4620_v41, %s5064_s27 }
 0x16b   : > { %1823 = vrot.lane.b32.xlu0 %v1813_v32, %s5065_s28 }
 0x16d   : > { %1825 = vrot.lane.b32.xlu1 %v1814_v39, %s5065_s28 }
 0x16f   : > { %1309 = vrot.lane.b32.xlu2 %v1283_v56, %s5058_s20  ;;  %v5617_v40 = vpop.permute.xlu0 %4506 }
 0x173   : > { %1829 = vrot.lane.b32.xlu0 %v1816_v33, %s5065_s28 }
 0x175   : > { %1831 = vrot.lane.b32.xlu1 %v1817_v19, %s5065_s28 }
 0x177   : > { %1656 = vrot.lane.b32.xlu2 %v1630_v47, %s5063_s26  ;;  %v5624_v4 = vpop.permute.xlu0 %4521 }
 0x178   : > { %7636 = vst [vmem:[#allocation11_spill] sm:$0xff] %v5624_v4  ;;  %v7511_v7 = vunpack.i.h.bf16 %v5624_v4  ;;  %v7516_v20 = vunpack.i.l.bf16 %v5624_v4 }
 0x17a   : > { %v5635_v54 = vsel %vm1079_vm7, %v7516_v20, %v7511_v7 }
 0x17b   : > { %7637 = vst [vmem:[#allocation12_spill] sm:$0xff] %v5635_v54 }
 0x17f   : > { %1821 = vrot.lane.b32.xlu2 %v1812_v30, %s5065_s28  ;;  %v5640_v35 = vpop.permute.xlu0 %4536 }
 0x180   : > { %v7514_v42 = vunpack.i.h.bf16 %v5640_v35  ;;  %v7521_v22 = vunpack.i.l.bf16 %v5640_v35 }
 0x182   : > { %v5651_v63 = vsel %vm1427_vm8, %v7521_v22, %v7514_v42 }
 0x183   : > { %7638 = vst [vmem:[#allocation13_spill] sm:$0xff] %v5651_v63 }
 0x187   : > { %1827 = vrot.lane.b32.xlu2 %v1815_v0, %s5065_s28  ;;  %v5654_v49 = vpop.permute.xlu1 %4511  ;;  %v5689_v31 = vpop.permute.xlu0 %4561 }
 0x188   : > { %7642 = vst [vmem:[#allocation17_spill] sm:$0xff] %v5689_v31  ;;  %v2712_v31 = vld [vmem:[#allocation6] ss:$8 sm:$0xf] }
 0x189   : > { %v5656_v60 = vpop.permute.xlu2 %4516 }
 0x18f   : > { %1833 = vrot.lane.b32.xlu2 %v1818_v28, %s5065_s28  ;;  %v5659_v50 = vpop.permute.xlu1 %4526 }
 0x190   : > { %7639 = vst [vmem:[#allocation14_spill] sm:$0xff] %v5659_v50  ;;  %v7512_v51 = vunpack.i.h.bf16 %v5659_v50  ;;  %v7518_v6 = vunpack.i.l.bf16 %v5659_v50  ;;  %v2828_v50 = vld [vmem:[#allocation6 + $0x1] ss:$8 sm:$0xf0] }
 0x191   : > { %v5663_v29 = vpop.permute.xlu2 %4531 }
 0x192   : > { %v7513_v27 = vunpack.i.h.bf16 %v5663_v29  ;;  %v7520_v46 = vunpack.i.l.bf16 %v5663_v29  ;;  %v5672_v21 = vsel %vm1195_vm9, %v7518_v6, %v7512_v51 }
 0x193   : > { %7640 = vst [vmem:[#allocation15_spill] sm:$0xff] %v5672_v21 }
 0x194   : > { %v5679_v45 = vsel %vm1311_vm10, %v7520_v46, %v7513_v27 }
 0x195   : > { %7641 = vst [vmem:[#allocation16_spill] sm:$0xff] %v5679_v45 }
 0x197   : > { %v5681_v43 = vpop.permute.xlu1 %4541 }
 0x198   : > { %v7515_v9 = vunpack.i.h.bf16 %v5681_v43  ;;  %v7522_v10 = vunpack.i.l.bf16 %v5681_v43  ;;  %v5709_v13 = vpop.permute.xlu0 %4576 }
 0x199   : > { %v5685_v58 = vpop.permute.xlu2 %4546  ;;  %7647 = vst [vmem:[#allocation22_spill] sm:$0xff] %v5709_v13 }
 0x19a   : > { %v7517_v53 = vunpack.i.h.bf16 %v5685_v58  ;;  %v7523_v38 = vunpack.i.l.bf16 %v5685_v58  ;;  %v5696_v57 = vsel %vm1543_vm11, %v7522_v10, %v7515_v9 }
 0x19b   : > { %7643 = vst [vmem:[#allocation18_spill] sm:$0xff] %v5696_v57 }
 0x19c   : > { %v5703_v44 = vsel %vm7580_vm12, %v7523_v38, %v7517_v53 }
 0x19d   : > { %7644 = vst [vmem:[#allocation19_spill] sm:$0xff] %v5703_v44 }
 0x19f   : > { %v5705_v14 = vpop.permute.xlu1 %4551 }
 0x1a0   : > { %7645 = vst [vmem:[#allocation20_spill] sm:$0xff] %v5705_v14 }
 0x1a1   : > { %v5707_v11 = vpop.permute.xlu2 %4556 }
 0x1a2   : > { %7646 = vst [vmem:[#allocation21_spill] sm:$0xff] %v5707_v11 }
 0x1a7   : > { %v5711_v52 = vpop.permute.xlu1 %4566 }
 0x1a8   : > { %7648 = vst [vmem:[#allocation23_spill] sm:$0xff] %v5711_v52 }
 0x1a9   : > { %v5713_v55 = vpop.permute.xlu2 %4571 }
 0x1aa   : > { %7649 = vst [vmem:[#allocation24_spill] sm:$0xff] %v5713_v55 }
 0x1ad   : > { %v5715_v5 = vpop.permute.xlu0 %4586 }
 0x1ae   : > { %7650 = vst [vmem:[#allocation25_spill] sm:$0xff] %v5715_v5 }
 0x1af   : > { %v5717_v16 = vpop.permute.xlu1 %4591 }
 0x1b0   : > { %7651 = vst [vmem:[#allocation26_spill] sm:$0xff] %v5717_v16 }
 0x1b1   : > { %v5719_v23 = vpop.permute.xlu2 %4581 }
 0x1b2   : > { %7652 = vst [vmem:[#allocation27_spill] sm:$0xff] %v5719_v23 }
 0x1b5   : > { %v5721_v24 = vpop.permute.xlu0 %4601 }
 0x1b6   : > { %7653 = vst [vmem:[#allocation28_spill] sm:$0xff] %v5721_v24  ;;  %v2260_v24 = vld [vmem:[#allocation6 + $0x1] ss:$8 sm:$0xf] }
 0x1b7   : > { %v5723_v2 = vpop.permute.xlu1 %4611 }
 0x1b8   : > { %7654 = vst [vmem:[#allocation29_spill] sm:$0xff] %v5723_v2 }
 0x1b9   : > { %v5725_v8 = vpop.permute.xlu2 %4596 }
 0x1ba   : > { %7655 = vst [vmem:[#allocation30_spill] sm:$0xff] %v5725_v8 }
 0x1bd   : > { %v5727_v1 = vpop.permute.xlu0 %4606 }
 0x1be   : > { %v7519_v25 = vunpack.i.h.bf16 %v5727_v1  ;;  %v7524_v41 = vunpack.i.l.bf16 %v5727_v1 }
 0x1bf   : > { %v5731_v32 = vpop.permute.xlu1 %4616 }
 0x1c0   : > { %v5738_v39 = vsel %vm7632_vm13, %v7524_v41, %v7519_v25 }
 0x1c1   : > { %7656 = vst [vmem:[#allocation31_spill] sm:$0xff] %v5738_v39  ;;  %v5740_v56 = vpop.permute.xlu2 %4621 }
 0x1c2   : > { %7657 = vst [vmem:[#allocation32_spill] sm:$0xff] %v5740_v56 }
 0x1c5   : > { %v5742_v33 = vpop.permute.xlu0 %1077 }
 0x1c6   : > { %7658 = vst [vmem:[#allocation33_spill] sm:$0xff] %v5742_v33 }
 0x1c7   : > { %v5744_v19 = vpop.permute.xlu1 %1193 }
 0x1c8   : > { %7659 = vst [vmem:[#allocation34_spill] sm:$0xff] %v5744_v19 }
 0x1c9   : > { %v5746_v47 = vpop.permute.xlu2 %1309 }
 0x1ca   : > { %7660 = vst [vmem:[#allocation35_spill] sm:$0xff] %v5746_v47 }
 0x1cd   : > { %v5748_v30 = vpop.permute.xlu0 %1425 }
 0x1ce   : > { %7661 = vst [vmem:[#allocation36_spill] sm:$0xff] %v5748_v30  ;;  %v2147_v30 = vld [vmem:[#allocation6] ss:$8 sm:$0xf] }
 0x1cf   : > { %v5750_v0 = vpop.permute.xlu1 %1541 }
 0x1d0   : > { %7662 = vst [vmem:[#allocation37_spill] sm:$0xff] %v5750_v0 }
 0x1d1   : > { %v5752_v28 = vpop.permute.xlu2 %1656 }
 0x1d2   : > { %7663 = vst [vmem:[#allocation38_spill] sm:$0xff] %v5752_v28 }
 0x1d5   : > { %v5754_v7 = vpop.permute.xlu0 %1771 }
 0x1d6   : > { %7664 = vst [vmem:[#allocation39_spill] sm:$0xff] %v5754_v7 }
 0x1d7   : > { %v1820_v51 = vpop.permute.xlu1 %1819 }
 0x1d8   : > { %v1852_v27 = vmul.f32 %v1820_v51, %v5328_v17 }
 0x1d9   : > { %v1822_v42 = vpop.permute.xlu2 %1821 }
 0x1da   : > { %v1836_v9 = vsel %vm7633_vm14, %v1820_v51, %v1822_v42 }
 0x1db   : > { %v1853_v20 = vmul.f32 %v1836_v9, %v5326_v12 }
 0x1dd   : > { %v1824_v53 = vpop.permute.xlu0 %1823  ;;  %v4625_v6 = vpack.i.bf16 %v1853_v20, %v1852_v27 }
 0x1de   : > { %v1837_v25 = vsel %vm7633_vm14, %v1822_v42, %v1824_v53 }
 0x1df   : > { %4626 = vrot.lane.b32.xlu0 %v4625_v6, %s5065_s28  ;;  %v1826_v46 = vpop.permute.xlu1 %1825  ;;  %v1854_v10 = vmul.f32 %v1837_v25, %v5391_v37  ;;  %v1922_v25 = vld [vmem:[#allocation6 + $0x3] ss:$8 sm:$0xf0] }
 0x1e0   : > { %v1838_v22 = vsel %vm7633_vm14, %v1824_v53, %v1826_v46  ;;  %v1921_v53 = vld [vmem:[#allocation6 + $0x3] ss:$8 sm:$0xf] }
 0x1e1   : > { %v1855_v38 = vmul.f32 %v1838_v22, %v5389_v26  ;;  %v1828_v41 = vpop.permute.xlu2 %1827 }
 0x1e2   : > { %v1839_v21 = vsel %vm7633_vm14, %v1826_v46, %v1828_v41 }
 0x1e3   : > { %v4630_v54 = vpack.i.bf16 %v1855_v38, %v1854_v10  ;;  %v1856_v42 = vmul.f32 %v1839_v21, %v5414_v61  ;;  %v1923_v21 = vor.u32 %v1922_v25, %v1921_v53 }
 0x1e5   : > { %v1830_v51 = vpop.permute.xlu0 %1829  ;;  %4631 = vrot.lane.b32.xlu1 %v4630_v54, %s5065_s28  ;;  %v1932_v53 = vperm.slane %v1923_v21, 7 }
 0x1e6   : > { %v1840_v20 = vsel %vm7633_vm14, %v1828_v41, %v1830_v51 }
 0x1e7   : > { %v1857_v6 = vmul.f32 %v1840_v20, %v5416_v62  ;;  %v1832_v27 = vpop.permute.xlu1 %1831  ;;  %v1927_v20 = vperm.slane %v1923_v21, 2 }
 0x1e8   : > { %v1841_v9 = vsel %vm7633_vm14, %v1830_v51, %v1832_v27  ;;  %v1925_v51 = vperm.slane %v1923_v21, 0 }
 0x1e9   : > { %v1858_v22 = vmul.f32 %v1841_v9, %v5494_v48  ;;  %v4635_v45 = vpack.i.bf16 %v1857_v6, %v1856_v42  ;;  %v1834_v10 = vpop.permute.xlu2 %1833  ;;  %v1926_v42 = vperm.slane %v1923_v21, 1  ;;  %v1930_v6 = vperm.slane %v1923_v21, 5 }
 0x1ea   : > { %v1842_v46 = vsel %vm7633_vm14, %v1832_v27, %v1834_v10  ;;  %v1860_v38 = vmul.f32 %v1834_v10, %v5569_v59  ;;  %v1929_v27 = vperm.slane %v1923_v21, 4  ;;  %v1931_v9 = vperm.slane %v1923_v21, 6 }
 0x1eb   : > { %4636 = vrot.lane.b32.xlu2 %v4635_v45, %s5065_s28  ;;  %v1859_v54 = vmul.f32 %v1842_v46, %v5500_v3  ;;  %v1928_v45 = vperm.slane %v1923_v21, 3 }
 0x1ed   : > { %1886 = vrot.lane.b32.xlu1 %v1860_v38, %s5065_s28  ;;  %v4640_v41 = vpack.i.bf16 %v1859_v54, %v1858_v22 }
 0x1ef   : > { %4641 = vrot.lane.b32.xlu0 %v4640_v41, %s5065_s28 }
 0x1f3   : > { %1933 = vrot.lane.b32.xlu2 %v1925_v51, %s5064_s27 }
 0x1f5   : > { %1937 = vrot.lane.b32.xlu1 %v1927_v20, %s5064_s27 }
 0x1f7   : > { %1935 = vrot.lane.b32.xlu0 %v1926_v42, %s5064_s27 }
 0x1fb   : > { %1939 = vrot.lane.b32.xlu2 %v1928_v45, %s5064_s27 }
 0x1fd   : > { %1943 = vrot.lane.b32.xlu1 %v1930_v6, %s5064_s27 }
 0x1ff   : > { %1941 = vrot.lane.b32.xlu0 %v1929_v27, %s5064_s27 }
 0x203   : > { %1945 = vrot.lane.b32.xlu2 %v1931_v9, %s5064_s27 }
 0x207   : > { %1947 = vrot.lane.b32.xlu0 %v1932_v53, %s5064_s27 }
 0x245   : > { %v5785_v25 = vpop.permute.xlu2 %4636 }
 0x24d   : > { %v1934_v21 = vpop.permute.xlu2 %1933 }
 0x24e   : > { %v1965_v63 = vmul.f32 %v1934_v21, %v5328_v17 }
 0x251   : > { %v5791_v54 = vpop.permute.xlu0 %4626 }
 0x255   : > { %v1940_v20 = vpop.permute.xlu2 %1939 }
 0x257   : > { %v5787_v22 = vpop.permute.xlu1 %4631 }
 0x258   : > { %v7525_v10 = vunpack.i.h.bf16 %v5787_v22  ;;  %v7526_v46 = vunpack.i.l.bf16 %v5787_v22 }
 0x25a   : > { %v5798_v38 = vsel %vm7633_vm14, %v7526_v46, %v7525_v10 }
 0x25b   : > { %7665 = vst [vmem:[#allocation40_spill] sm:$0xff] %v5798_v38 }
 0x25d   : > { %v1946_v19 = vpop.permute.xlu2 %1945 }
 0x25f   : > { %v5800_v41 = vpop.permute.xlu1 %1886 }
 0x260   : > { %7666 = vst [vmem:[#allocation41_spill] sm:$0xff] %v5800_v41 }
 0x261   : > { %v5802_v51 = vpop.permute.xlu0 %4641 }
 0x262   : > { %7667 = vst [vmem:[#allocation42_spill] sm:$0xff] %v5802_v51 }
 0x267   : > { %v1938_v42 = vpop.permute.xlu1 %1937 }
 0x268   : > { %v1951_v45 = vsel %vm7632_vm13, %v1938_v42, %v1940_v20 }
 0x269   : > { %v1936_v6 = vpop.permute.xlu0 %1935  ;;  %v1968_v27 = vmul.f32 %v1951_v45, %v5389_v26 }
 0x26a   : > { %v1949_v9 = vsel %vm7632_vm13, %v1934_v21, %v1936_v6  ;;  %v1950_v53 = vsel %vm7632_vm13, %v1936_v6, %v1938_v42  ;;  %v2034_v6 = vld [vmem:[#allocation6 + $0x4] ss:$8 sm:$0xf] }
 0x26b   : > { %v1966_v10 = vmul.f32 %v1949_v9, %v5326_v12  ;;  %v1967_v46 = vmul.f32 %v1950_v53, %v5391_v37  ;;  %v2035_v9 = vld [vmem:[#allocation6 + $0x4] ss:$8 sm:$0xf0] }
 0x26d   : > { %v4645_v57 = vpack.i.bf16 %v1966_v10, %v1965_v63  ;;  %v4650_v44 = vpack.i.bf16 %v1968_v27, %v1967_v46  ;;  %v2036_v63 = vor.u32 %v2035_v9, %v2034_v6 }
 0x26f   : > { %4646 = vrot.lane.b32.xlu1 %v4645_v57, %s5057_s19  ;;  %4651 = vrot.lane.b32.xlu2 %v4650_v44, %s5057_s19  ;;  %v1944_v39 = vpop.permute.xlu1 %1943  ;;  %v2038_v27 = vperm.slane %v2036_v63, 0  ;;  %v2042_v6 = vperm.slane %v2036_v63, 4  ;;  %v2045_v9 = vperm.slane %v2036_v63, 7 }
 0x270   : > { %v1954_v57 = vsel %vm7632_vm13, %v1944_v39, %v1946_v19 }
 0x271   : > { %v1942_v38 = vpop.permute.xlu0 %1941 }
 0x272   : > { %v1952_v45 = vsel %vm7632_vm13, %v1940_v20, %v1942_v38  ;;  %v1953_v33 = vsel %vm7632_vm13, %v1942_v38, %v1944_v39  ;;  %v1971_v38 = vmul.f32 %v1954_v57, %v5494_v48  ;;  %v2039_v39 = vperm.slane %v2036_v63, 1 }
 0x273   : > { %v1969_v42 = vmul.f32 %v1952_v45, %v5414_v61  ;;  %v1970_v21 = vmul.f32 %v1953_v33, %v5416_v62  ;;  %v2040_v45 = vperm.slane %v2036_v63, 2 }
 0x275   : > { %v4655_v53 = vpack.i.bf16 %v1970_v21, %v1969_v42  ;;  %v2041_v42 = vperm.slane %v2036_v63, 3  ;;  %v2044_v21 = vperm.slane %v2036_v63, 6 }
 0x277   : > { %4656 = vrot.lane.b32.xlu0 %v4655_v53, %s5057_s19 }
 0x279   : > { %v1948_v44 = vpop.permute.xlu0 %1947 }
 0x27a   : > { %v1955_v10 = vsel %vm7632_vm13, %v1946_v19, %v1948_v44  ;;  %v1973_v46 = vmul.f32 %v1948_v44, %v5569_v59  ;;  %v2043_v19 = vperm.slane %v2036_v63, 5 }
 0x27b   : > { %v1972_v20 = vmul.f32 %v1955_v10, %v5500_v3 }
 0x27c   : > { %1999 = vrot.lane.b32.xlu2 %v1973_v46, %s5057_s19 }
 0x27d   : > { %v4660_v33 = vpack.i.bf16 %v1972_v20, %v1971_v38 }
 0x27f   : > { %2046 = vrot.lane.b32.xlu0 %v2038_v27, %s5063_s26  ;;  %4661 = vrot.lane.b32.xlu1 %v4660_v33, %s5057_s19 }
 0x284   : > { %2050 = vrot.lane.b32.xlu2 %v2040_v45, %s5063_s26 }
 0x287   : > { %2052 = vrot.lane.b32.xlu0 %v2041_v42, %s5063_s26  ;;  %2048 = vrot.lane.b32.xlu1 %v2039_v39, %s5063_s26 }
 0x28c   : > { %2056 = vrot.lane.b32.xlu2 %v2043_v19, %s5063_s26 }
 0x28f   : > { %2058 = vrot.lane.b32.xlu0 %v2044_v21, %s5063_s26  ;;  %2054 = vrot.lane.b32.xlu1 %v2042_v6, %s5063_s26 }
 0x297   : > { %2060 = vrot.lane.b32.xlu1 %v2045_v9, %s5063_s26 }
 0x2c9   : > { %v5833_v53 = vpop.permute.xlu2 %4651 }
 0x2ca   : > { %v7527_v57 = vunpack.i.h.bf16 %v5833_v53  ;;  %v7528_v44 = vunpack.i.l.bf16 %v5833_v53 }
 0x2cc   : > { %v5842_v10 = vsel %vm1720_vm6, %v7528_v44, %v7527_v57 }
 0x2cd   : > { %7668 = vst [vmem:[#allocation43_spill] sm:$0xff] %v5842_v10 }
 0x2d6   : > { %v5848_v63 = vpop.permute.xlu2 %1999 }
 0x2d7   : > { %7669 = vst [vmem:[#allocation44_spill] sm:$0xff] %v5848_v63  ;;  %v2373_v63 = vld [vmem:[#allocation6 + $0x2] ss:$8 sm:$0xf] }
 0x2de   : > { %v2051_v33 = vpop.permute.xlu2 %2050 }
 0x2e1   : > { %v5844_v46 = vpop.permute.xlu1 %4646 }
 0x2e6   : > { %v2057_v47 = vpop.permute.xlu2 %2056 }
 0x2e9   : > { %v5846_v38 = vpop.permute.xlu0 %4656 }
 0x2f1   : > { %v2047_v20 = vpop.permute.xlu0 %2046  ;;  %v5850_v27 = vpop.permute.xlu1 %4661 }
 0x2f2   : > { %7670 = vst [vmem:[#allocation45_spill] sm:$0xff] %v5850_v27  ;;  %v2078_v6 = vmul.f32 %v2047_v20, %v5328_v17  ;;  %v2486_v27 = vld [vmem:[#allocation6 + $0x3] ss:$8 sm:$0xf] }
 0x2f9   : > { %v2053_v45 = vpop.permute.xlu0 %2052  ;;  %v2049_v42 = vpop.permute.xlu1 %2048 }
 0x2fa   : > { %v2062_v39 = vsel %vm7580_vm12, %v2047_v20, %v2049_v42  ;;  %v2063_v19 = vsel %vm7580_vm12, %v2049_v42, %v2051_v33  ;;  %v2064_v21 = vsel %vm7580_vm12, %v2051_v33, %v2053_v45 }
 0x2fb   : > { %v2079_v9 = vmul.f32 %v2062_v39, %v5326_v12  ;;  %v2080_v57 = vmul.f32 %v2063_v19, %v5391_v37  ;;  %v2081_v44 = vmul.f32 %v2064_v21, %v5389_v26  ;;  %v2148_v19 = vld [vmem:[#allocation6] ss:$8 sm:$0xf0] }
 0x2fd   : > { %v4665_v10 = vpack.i.bf16 %v2079_v9, %v2078_v6  ;;  %v4670_v23 = vpack.i.bf16 %v2081_v44, %v2080_v57  ;;  %v2149_v57 = vor.u32 %v2148_v19, %v2147_v30 }
 0x2ff   : > { %4666 = vrot.lane.b32.xlu2 %v4665_v10, %s5056_s17  ;;  %4671 = vrot.lane.b32.xlu0 %v4670_v23, %s5056_s17  ;;  %v2151_v9 = vperm.slane %v2149_v57, 0  ;;  %v2153_v30 = vperm.slane %v2149_v57, 2  ;;  %v2158_v19 = vperm.slane %v2149_v57, 7 }
 0x301   : > { %v2055_v5 = vpop.permute.xlu1 %2054  ;;  %v2059_v16 = vpop.permute.xlu0 %2058 }
 0x302   : > { %v2065_v42 = vsel %vm7580_vm12, %v2053_v45, %v2055_v5  ;;  %v2066_v33 = vsel %vm7580_vm12, %v2055_v5, %v2057_v47  ;;  %v2067_v44 = vsel %vm7580_vm12, %v2057_v47, %v2059_v16  ;;  %v2154_v47 = vperm.slane %v2149_v57, 3 }
 0x303   : > { %v2082_v20 = vmul.f32 %v2065_v42, %v5414_v61  ;;  %v2083_v39 = vmul.f32 %v2066_v33, %v5416_v62  ;;  %v2084_v5 = vmul.f32 %v2067_v44, %v5494_v48  ;;  %v2152_v33 = vperm.slane %v2149_v57, 1 }
 0x305   : > { %v4675_v21 = vpack.i.bf16 %v2083_v39, %v2082_v20  ;;  %v2155_v20 = vperm.slane %v2149_v57, 4  ;;  %v2157_v39 = vperm.slane %v2149_v57, 6 }
 0x307   : > { %4676 = vrot.lane.b32.xlu1 %v4675_v21, %s5056_s17 }
 0x309   : > { %v2061_v23 = vpop.permute.xlu1 %2060 }
 0x30a   : > { %v2068_v10 = vsel %vm7580_vm12, %v2059_v16, %v2061_v23  ;;  %v2086_v45 = vmul.f32 %v2061_v23, %v5569_v59  ;;  %v2156_v16 = vperm.slane %v2149_v57, 5 }
 0x30b   : > { %v2085_v6 = vmul.f32 %v2068_v10, %v5500_v3 }
 0x30c   : > { %2112 = vrot.lane.b32.xlu0 %v2086_v45, %s5056_s17 }
 0x30d   : > { %v4680_v42 = vpack.i.bf16 %v2085_v6, %v2084_v5 }
 0x30f   : > { %4681 = vrot.lane.b32.xlu2 %v4680_v42, %s5056_s17  ;;  %2159 = vrot.lane.b32.xlu1 %v2151_v9, %s5062_s25 }
 0x314   : > { %2163 = vrot.lane.b32.xlu0 %v2153_v30, %s5062_s25 }
 0x317   : > { %2161 = vrot.lane.b32.xlu2 %v2152_v33, %s5062_s25  ;;  %2165 = vrot.lane.b32.xlu1 %v2154_v47, %s5062_s25 }
 0x31c   : > { %2169 = vrot.lane.b32.xlu0 %v2156_v16, %s5062_s25 }
 0x31f   : > { %2167 = vrot.lane.b32.xlu2 %v2155_v20, %s5062_s25  ;;  %2171 = vrot.lane.b32.xlu1 %v2157_v39, %s5062_s25 }
 0x327   : > { %2173 = vrot.lane.b32.xlu2 %v2158_v19, %s5062_s25 }
 0x359   : > { %v5881_v21 = vpop.permute.xlu2 %4666 }
 0x369   : > { %v5887_v45 = vpop.permute.xlu2 %4681 }
 0x36a   : > { %7671 = vst [vmem:[#allocation46_spill] sm:$0xff] %v5887_v45 }
 0x371   : > { %v5883_v44 = vpop.permute.xlu0 %4671  ;;  %v2162_v6 = vpop.permute.xlu2 %2161 }
 0x372   : > { %v7532_v23 = vunpack.i.h.bf16 %v5883_v44  ;;  %v7533_v10 = vunpack.i.l.bf16 %v5883_v44 }
 0x374   : > { %v5894_v5 = vsel %vm1605_vm5, %v7533_v10, %v7532_v23 }
 0x375   : > { %7672 = vst [vmem:[#allocation47_spill] sm:$0xff] %v5894_v5 }
 0x379   : > { %v5896_v57 = vpop.permute.xlu1 %4676  ;;  %v2168_v39 = vpop.permute.xlu2 %2167 }
 0x37e   : > { %v5898_v9 = vpop.permute.xlu0 %2112 }
 0x37f   : > { %7673 = vst [vmem:[#allocation48_spill] sm:$0xff] %v5898_v9 }
 0x381   : > { %v2160_v42 = vpop.permute.xlu1 %2159 }
 0x382   : > { %v2175_v30 = vsel %vm1543_vm11, %v2160_v42, %v2162_v6  ;;  %v2191_v33 = vmul.f32 %v2160_v42, %v5328_v17 }
 0x383   : > { %v2192_v47 = vmul.f32 %v2175_v30, %v5326_v12 }
 0x385   : > { %v4685_v16 = vpack.i.bf16 %v2192_v47, %v2191_v33 }
 0x386   : > { %v2164_v20 = vpop.permute.xlu0 %2163 }
 0x387   : > { %4686 = vrot.lane.b32.xlu0 %v4685_v16, %s5055_s16  ;;  %v2176_v19 = vsel %vm1543_vm11, %v2162_v6, %v2164_v20  ;;  %v2174_v6 = vpop.permute.xlu2 %2173 }
 0x388   : > { %v2193_v5 = vmul.f32 %v2176_v19, %v5391_v37 }
 0x389   : > { %v2166_v23 = vpop.permute.xlu1 %2165 }
 0x38a   : > { %v2177_v10 = vsel %vm1543_vm11, %v2164_v20, %v2166_v23  ;;  %v2178_v8 = vsel %vm1543_vm11, %v2166_v23, %v2168_v39  ;;  %v2261_v20 = vld [vmem:[#allocation6 + $0x1] ss:$8 sm:$0xf0] }
 0x38b   : > { %v2194_v0 = vmul.f32 %v2177_v10, %v5389_v26  ;;  %v2195_v33 = vmul.f32 %v2178_v8, %v5414_v61  ;;  %v2199_v8 = vmul.f32 %v2174_v6, %v5569_v59 }
 0x38d   : > { %v4690_v28 = vpack.i.bf16 %v2194_v0, %v2193_v5 }
 0x38e   : > { %v2170_v42 = vpop.permute.xlu0 %2169 }
 0x38f   : > { %v2179_v30 = vsel %vm1543_vm11, %v2168_v39, %v2170_v42  ;;  %4691 = vrot.lane.b32.xlu1 %v4690_v28, %s5055_s16  ;;  %v2262_v28 = vor.u32 %v2261_v20, %v2260_v24 }
 0x390   : > { %v2196_v47 = vmul.f32 %v2179_v30, %v5416_v62 }
 0x391   : > { %v2172_v16 = vpop.permute.xlu1 %2171  ;;  %v2264_v39 = vperm.slane %v2262_v28, 0  ;;  %v2266_v30 = vperm.slane %v2262_v28, 2  ;;  %v2270_v24 = vperm.slane %v2262_v28, 6 }
 0x392   : > { %v2180_v19 = vsel %vm1543_vm11, %v2170_v42, %v2172_v16  ;;  %v2181_v10 = vsel %vm1543_vm11, %v2172_v16, %v2174_v6  ;;  %v4695_v7 = vpack.i.bf16 %v2196_v47, %v2195_v33  ;;  %v2265_v42 = vperm.slane %v2262_v28, 1 }
 0x393   : > { %v2197_v0 = vmul.f32 %v2180_v19, %v5494_v48  ;;  %v2198_v23 = vmul.f32 %v2181_v10, %v5500_v3  ;;  %v2267_v33 = vperm.slane %v2262_v28, 3  ;;  %v2269_v47 = vperm.slane %v2262_v28, 5 }
 0x394   : > { %4696 = vrot.lane.b32.xlu2 %v4695_v7, %s5055_s16  ;;  %v2268_v7 = vperm.slane %v2262_v28, 4  ;;  %v2271_v6 = vperm.slane %v2262_v28, 7 }
 0x395   : > { %v4700_v5 = vpack.i.bf16 %v2198_v23, %v2197_v0 }
 0x397   : > { %2225 = vrot.lane.b32.xlu1 %v2199_v8, %s5055_s16  ;;  %4701 = vrot.lane.b32.xlu0 %v4700_v5, %s5055_s16 }
 0x39c   : > { %2272 = vrot.lane.b32.xlu2 %v2264_v39, %s5061_s24 }
 0x39f   : > { %2276 = vrot.lane.b32.xlu1 %v2266_v30, %s5061_s24  ;;  %2274 = vrot.lane.b32.xlu0 %v2265_v42, %s5061_s24 }
 0x3a4   : > { %2278 = vrot.lane.b32.xlu2 %v2267_v33, %s5061_s24 }
 0x3a7   : > { %2282 = vrot.lane.b32.xlu1 %v2269_v47, %s5061_s24  ;;  %2280 = vrot.lane.b32.xlu0 %v2268_v7, %s5061_s24 }
 0x3ac   : > { %2284 = vrot.lane.b32.xlu2 %v2270_v24, %s5061_s24 }
 0x3af   : > { %2286 = vrot.lane.b32.xlu0 %v2271_v6, %s5061_s24 }
 0x3ee   : > { %v5929_v16 = vpop.permute.xlu2 %4696 }
 0x3f6   : > { %v2273_v28 = vpop.permute.xlu2 %2272 }
 0x3f7   : > { %v2304_v24 = vmul.f32 %v2273_v28, %v5328_v17 }
 0x3f9   : > { %v5931_v20 = vpop.permute.xlu0 %4686 }
 0x3fe   : > { %v2279_v39 = vpop.permute.xlu2 %2278 }
 0x401   : > { %v5933_v19 = vpop.permute.xlu1 %4691 }
 0x402   : > { %v7536_v10 = vunpack.i.h.bf16 %v5933_v19  ;;  %v7537_v0 = vunpack.i.l.bf16 %v5933_v19 }
 0x404   : > { %v5942_v23 = vsel %vm1490_vm4, %v7537_v0, %v7536_v10 }
 0x405   : > { %7674 = vst [vmem:[#allocation49_spill] sm:$0xff] %v5942_v23 }
 0x409   : > { %v5944_v8 = vpop.permute.xlu1 %2225  ;;  %v5946_v5 = vpop.permute.xlu0 %4701 }
 0x40a   : > { %7675 = vst [vmem:[#allocation50_spill] sm:$0xff] %v5944_v8 }
 0x40b   : > { %7676 = vst [vmem:[#allocation51_spill] sm:$0xff] %v5946_v5 }
 0x411   : > { %v2277_v30 = vpop.permute.xlu1 %2276  ;;  %v2275_v42 = vpop.permute.xlu0 %2274 }
 0x412   : > { %v2288_v33 = vsel %vm1427_vm8, %v2273_v28, %v2275_v42  ;;  %v2289_v47 = vsel %vm1427_vm8, %v2275_v42, %v2277_v30  ;;  %v2290_v7 = vsel %vm1427_vm8, %v2277_v30, %v2279_v39 }
 0x413   : > { %v2305_v6 = vmul.f32 %v2288_v33, %v5326_v12  ;;  %v2306_v10 = vmul.f32 %v2289_v47, %v5391_v37  ;;  %v2307_v0 = vmul.f32 %v2290_v7, %v5389_v26  ;;  %v2374_v47 = vld [vmem:[#allocation6 + $0x2] ss:$8 sm:$0xf0]  ;;  %v2285_v7 = vpop.permute.xlu2 %2284 }
 0x415   : > { %v4705_v23 = vpack.i.bf16 %v2305_v6, %v2304_v24  ;;  %v4710_v2 = vpack.i.bf16 %v2307_v0, %v2306_v10  ;;  %v2375_v10 = vor.u32 %v2374_v47, %v2373_v63 }
 0x417   : > { %4706 = vrot.lane.b32.xlu1 %v4705_v23, %s5054_s15  ;;  %4711 = vrot.lane.b32.xlu2 %v4710_v2, %s5054_s15  ;;  %v2377_v6 = vperm.slane %v2375_v10, 0  ;;  %v2379_v63 = vperm.slane %v2375_v10, 2  ;;  %v2384_v47 = vperm.slane %v2375_v10, 7 }
 0x419   : > { %v2283_v41 = vpop.permute.xlu1 %2282  ;;  %v2281_v56 = vpop.permute.xlu0 %2280 }
 0x41a   : > { %v2291_v42 = vsel %vm1427_vm8, %v2279_v39, %v2281_v56  ;;  %v2292_v30 = vsel %vm1427_vm8, %v2281_v56, %v2283_v41  ;;  %v2293_v0 = vsel %vm1427_vm8, %v2283_v41, %v2285_v7  ;;  %v2378_v41 = vperm.slane %v2375_v10, 1 }
 0x41b   : > { %v2308_v28 = vmul.f32 %v2291_v42, %v5414_v61  ;;  %v2309_v33 = vmul.f32 %v2292_v30, %v5416_v62  ;;  %v2310_v56 = vmul.f32 %v2293_v0, %v5494_v48  ;;  %v2382_v30 = vperm.slane %v2375_v10, 5 }
 0x41d   : > { %v4715_v9 = vpack.i.bf16 %v2309_v33, %v2308_v28  ;;  %v2383_v28 = vperm.slane %v2375_v10, 6  ;;  %v2381_v33 = vperm.slane %v2375_v10, 4 }
 0x41f   : > { %4716 = vrot.lane.b32.xlu0 %v4715_v9, %s5054_s15  ;;  %v2380_v9 = vperm.slane %v2375_v10, 3 }
 0x421   : > { %v2287_v2 = vpop.permute.xlu0 %2286 }
 0x422   : > { %v2294_v23 = vsel %vm1427_vm8, %v2285_v7, %v2287_v2  ;;  %v2312_v39 = vmul.f32 %v2287_v2, %v5569_v59 }
 0x423   : > { %v2311_v24 = vmul.f32 %v2294_v23, %v5500_v3 }
 0x424   : > { %2338 = vrot.lane.b32.xlu2 %v2312_v39, %s5054_s15 }
 0x425   : > { %v4720_v42 = vpack.i.bf16 %v2311_v24, %v2310_v56 }
 0x427   : > { %2385 = vrot.lane.b32.xlu0 %v2377_v6, %s5058_s20  ;;  %4721 = vrot.lane.b32.xlu1 %v4720_v42, %s5054_s15 }
 0x42c   : > { %2389 = vrot.lane.b32.xlu2 %v2379_v63, %s5058_s20 }
 0x42f   : > { %2391 = vrot.lane.b32.xlu0 %v2380_v9, %s5058_s20  ;;  %2387 = vrot.lane.b32.xlu1 %v2378_v41, %s5058_s20 }
 0x434   : > { %2395 = vrot.lane.b32.xlu2 %v2382_v30, %s5058_s20 }
 0x437   : > { %2397 = vrot.lane.b32.xlu0 %v2383_v28, %s5058_s20  ;;  %2393 = vrot.lane.b32.xlu1 %v2381_v33, %s5058_s20 }
 0x43f   : > { %2399 = vrot.lane.b32.xlu1 %v2384_v47, %s5058_s20 }
 0x471   : > { %v5977_v7 = vpop.permute.xlu2 %4711 }
 0x472   : > { %v7540_v0 = vunpack.i.h.bf16 %v5977_v7  ;;  %v7541_v2 = vunpack.i.l.bf16 %v5977_v7 }
 0x474   : > { %v5986_v23 = vsel %vm1374_vm3, %v7541_v2, %v7540_v0 }
 0x475   : > { %7677 = vst [vmem:[#allocation52_spill] sm:$0xff] %v5986_v23 }
 0x47e   : > { %v5992_v10 = vpop.permute.xlu2 %2338 }
 0x47f   : > { %7678 = vst [vmem:[#allocation53_spill] sm:$0xff] %v5992_v10 }
 0x486   : > { %v2390_v42 = vpop.permute.xlu2 %2389 }
 0x489   : > { %v5988_v39 = vpop.permute.xlu1 %4706 }
 0x48e   : > { %v2396_v8 = vpop.permute.xlu2 %2395 }
 0x491   : > { %v5990_v56 = vpop.permute.xlu0 %4716 }
 0x499   : > { %v2386_v24 = vpop.permute.xlu0 %2385  ;;  %v5994_v6 = vpop.permute.xlu1 %4721 }
 0x49a   : > { %7679 = vst [vmem:[#allocation54_spill] sm:$0xff] %v5994_v6  ;;  %v2417_v33 = vmul.f32 %v2386_v24, %v5328_v17 }
 0x4a1   : > { %v2392_v63 = vpop.permute.xlu0 %2391  ;;  %v2388_v9 = vpop.permute.xlu1 %2387 }
 0x4a2   : > { %v2401_v41 = vsel %vm1311_vm10, %v2386_v24, %v2388_v9  ;;  %v2402_v30 = vsel %vm1311_vm10, %v2388_v9, %v2390_v42  ;;  %v2403_v28 = vsel %vm1311_vm10, %v2390_v42, %v2392_v63 }
 0x4a3   : > { %v2418_v47 = vmul.f32 %v2401_v41, %v5326_v12  ;;  %v2419_v0 = vmul.f32 %v2402_v30, %v5391_v37  ;;  %v2420_v2 = vmul.f32 %v2403_v28, %v5389_v26  ;;  %v2487_v30 = vld [vmem:[#allocation6 + $0x3] ss:$8 sm:$0xf0] }
 0x4a5   : > { %v4725_v23 = vpack.i.bf16 %v2418_v47, %v2417_v33  ;;  %v4730_v51 = vpack.i.bf16 %v2420_v2, %v2419_v0  ;;  %v2488_v0 = vor.u32 %v2487_v30, %v2486_v27 }
 0x4a7   : > { %4726 = vrot.lane.b32.xlu2 %v4725_v23, %s5053_s14  ;;  %4731 = vrot.lane.b32.xlu0 %v4730_v51, %s5053_s14  ;;  %v2490_v47 = vperm.slane %v2488_v0, 0  ;;  %v2492_v27 = vperm.slane %v2488_v0, 2  ;;  %v2497_v30 = vperm.slane %v2488_v0, 7 }
 0x4a9   : > { %v2394_v45 = vpop.permute.xlu1 %2393  ;;  %v2398_v10 = vpop.permute.xlu0 %2397 }
 0x4aa   : > { %v2404_v9 = vsel %vm1311_vm10, %v2392_v63, %v2394_v45  ;;  %v2405_v42 = vsel %vm1311_vm10, %v2394_v45, %v2396_v8  ;;  %v2406_v2 = vsel %vm1311_vm10, %v2396_v8, %v2398_v10  ;;  %v2493_v8 = vperm.slane %v2488_v0, 3 }
 0x4ab   : > { %v2421_v24 = vmul.f32 %v2404_v9, %v5414_v61  ;;  %v2422_v41 = vmul.f32 %v2405_v42, %v5416_v62  ;;  %v2423_v45 = vmul.f32 %v2406_v2, %v5494_v48  ;;  %v2491_v42 = vperm.slane %v2488_v0, 1 }
 0x4ad   : > { %v4735_v28 = vpack.i.bf16 %v2422_v41, %v2421_v24  ;;  %v2494_v24 = vperm.slane %v2488_v0, 4  ;;  %v2496_v41 = vperm.slane %v2488_v0, 6 }
 0x4af   : > { %4736 = vrot.lane.b32.xlu1 %v4735_v28, %s5053_s14 }
 0x4b1   : > { %v2400_v51 = vpop.permute.xlu1 %2399 }
 0x4b2   : > { %v2407_v23 = vsel %vm1311_vm10, %v2398_v10, %v2400_v51  ;;  %v2425_v63 = vmul.f32 %v2400_v51, %v5569_v59  ;;  %v2495_v10 = vperm.slane %v2488_v0, 5 }
 0x4b3   : > { %v2424_v33 = vmul.f32 %v2407_v23, %v5500_v3 }
 0x4b4   : > { %2451 = vrot.lane.b32.xlu0 %v2425_v63, %s5053_s14 }
 0x4b5   : > { %v4740_v9 = vpack.i.bf16 %v2424_v33, %v2423_v45 }
 0x4b7   : > { %4741 = vrot.lane.b32.xlu2 %v4740_v9, %s5053_s14  ;;  %2498 = vrot.lane.b32.xlu1 %v2490_v47, %s5059_s21 }
 0x4bc   : > { %2502 = vrot.lane.b32.xlu0 %v2492_v27, %s5059_s21 }
 0x4bf   : > { %2500 = vrot.lane.b32.xlu2 %v2491_v42, %s5059_s21  ;;  %2504 = vrot.lane.b32.xlu1 %v2493_v8, %s5059_s21 }
 0x4c4   : > { %2508 = vrot.lane.b32.xlu0 %v2495_v10, %s5059_s21 }
 0x4c7   : > { %2506 = vrot.lane.b32.xlu2 %v2494_v24, %s5059_s21  ;;  %2510 = vrot.lane.b32.xlu1 %v2496_v41, %s5059_s21 }
 0x4cf   : > { %2512 = vrot.lane.b32.xlu2 %v2497_v30, %s5059_s21 }
 0x501   : > { %v6025_v28 = vpop.permute.xlu2 %4726 }
 0x511   : > { %v4742_v2 = vpop.permute.xlu2 %4741 }
 0x512   : > { %v4744_v51 = vunpack.i.h.bf16 %v4742_v2  ;;  %v4743_v23 = vunpack.i.l.bf16 %v4742_v2 }
 0x514   : > { %v6028_v63 = vsel %vm1258_vm1, %v4743_v23, %v4744_v51 }
 0x515   : > { %7680 = vst [vmem:[#allocation55_spill] sm:$0xff] %v6028_v63 }
 0x519   : > { %v6030_v45 = vpop.permute.xlu0 %4731  ;;  %v2501_v24 = vpop.permute.xlu2 %2500 }
 0x51a   : > { %v7545_v33 = vunpack.i.h.bf16 %v6030_v45  ;;  %v7546_v47 = vunpack.i.l.bf16 %v6030_v45 }
 0x51c   : > { %v6039_v0 = vsel %vm1258_vm1, %v7546_v47, %v7545_v33 }
 0x51d   : > { %7681 = vst [vmem:[#allocation56_spill] sm:$0xff] %v6039_v0 }
 0x521   : > { %v6041_v9 = vpop.permute.xlu1 %4736  ;;  %v2507_v6 = vpop.permute.xlu2 %2506 }
 0x522   : > { %v4739_v27 = vunpack.i.h.bf16 %v6041_v9  ;;  %v7549_v42 = vunpack.i.l.bf16 %v6041_v9 }
 0x524   : > { %v6048_v8 = vsel %vm1258_vm1, %v7549_v42, %v4739_v27  ;;  %v6051_v10 = vsel %vm1258_vm1, %v4739_v27, %v4743_v23 }
 0x525   : > { %7682 = vst [vmem:[#allocation57_spill] sm:$0xff] %v6048_v8 }
 0x526   : > { %7683 = vst [vmem:[#allocation58_spill] sm:$0xff] %v6051_v10  ;;  %v2452_v41 = vpop.permute.xlu0 %2451 }
 0x527   : > { %v6054_v30 = vsel %vm1258_vm1, %v4744_v51, %v2452_v41 }
 0x528   : > { %7684 = vst [vmem:[#allocation59_spill] sm:$0xff] %v6054_v30  ;;  %v2599_v30 = vld [vmem:[#allocation6 + $0x4] ss:$8 sm:$0xf] }
 0x529   : > { %v2499_v2 = vpop.permute.xlu1 %2498 }
 0x52a   : > { %v2514_v33 = vsel %vm1195_vm9, %v2499_v2, %v2501_v24  ;;  %v2530_v47 = vmul.f32 %v2499_v2, %v5328_v17 }
 0x52b   : > { %v2531_v63 = vmul.f32 %v2514_v33, %v5326_v12 }
 0x52d   : > { %v4745_v0 = vpack.i.bf16 %v2531_v63, %v2530_v47 }
 0x52e   : > { %v2503_v5 = vpop.permute.xlu0 %2502 }
 0x52f   : > { %4746 = vrot.lane.b32.xlu0 %v4745_v0, %s5052_s9  ;;  %v2515_v23 = vsel %vm1195_vm9, %v2501_v24, %v2503_v5  ;;  %v2513_v0 = vpop.permute.xlu2 %2512 }
 0x530   : > { %v2532_v51 = vmul.f32 %v2515_v23, %v5391_v37 }
 0x531   : > { %v2505_v27 = vpop.permute.xlu1 %2504 }
 0x532   : > { %v2516_v42 = vsel %vm1195_vm9, %v2503_v5, %v2505_v27  ;;  %v2517_v8 = vsel %vm1195_vm9, %v2505_v27, %v2507_v6  ;;  %v2600_v5 = vld [vmem:[#allocation6 + $0x4] ss:$8 sm:$0xf0] }
 0x533   : > { %v2533_v41 = vmul.f32 %v2516_v42, %v5389_v26  ;;  %v2534_v63 = vmul.f32 %v2517_v8, %v5414_v61  ;;  %v2538_v8 = vmul.f32 %v2513_v0, %v5569_v59 }
 0x535   : > { %v4750_v10 = vpack.i.bf16 %v2533_v41, %v2532_v51 }
 0x536   : > { %v2509_v2 = vpop.permute.xlu0 %2508 }
 0x537   : > { %v2518_v33 = vsel %vm1195_vm9, %v2507_v6, %v2509_v2  ;;  %4751 = vrot.lane.b32.xlu1 %v4750_v10, %s5052_s9  ;;  %v2601_v6 = vor.u32 %v2600_v5, %v2599_v30 }
 0x538   : > { %v2535_v47 = vmul.f32 %v2518_v33, %v5416_v62 }
 0x539   : > { %v2511_v24 = vpop.permute.xlu1 %2510  ;;  %v2603_v41 = vperm.slane %v2601_v6, 0  ;;  %v2605_v33 = vperm.slane %v2601_v6, 2  ;;  %v2609_v30 = vperm.slane %v2601_v6, 6 }
 0x53a   : > { %v4755_v14 = vpack.i.bf16 %v2535_v47, %v2534_v63  ;;  %v2519_v23 = vsel %vm1195_vm9, %v2509_v2, %v2511_v24  ;;  %v2520_v42 = vsel %vm1195_vm9, %v2511_v24, %v2513_v0  ;;  %v2604_v63 = vperm.slane %v2601_v6, 1 }
 0x53b   : > { %v2536_v27 = vmul.f32 %v2519_v23, %v5494_v48  ;;  %v2537_v51 = vmul.f32 %v2520_v42, %v5500_v3  ;;  %v2606_v2 = vperm.slane %v2601_v6, 3  ;;  %v2608_v47 = vperm.slane %v2601_v6, 5 }
 0x53c   : > { %4756 = vrot.lane.b32.xlu2 %v4755_v14, %s5052_s9  ;;  %v2607_v14 = vperm.slane %v2601_v6, 4  ;;  %v2610_v0 = vperm.slane %v2601_v6, 7 }
 0x53d   : > { %v4760_v10 = vpack.i.bf16 %v2537_v51, %v2536_v27 }
 0x53f   : > { %2564 = vrot.lane.b32.xlu1 %v2538_v8, %s5052_s9  ;;  %4761 = vrot.lane.b32.xlu0 %v4760_v10, %s5052_s9 }
 0x544   : > { %2611 = vrot.lane.b32.xlu2 %v2603_v41, %s5060_s23 }
 0x547   : > { %2615 = vrot.lane.b32.xlu1 %v2605_v33, %s5060_s23  ;;  %2613 = vrot.lane.b32.xlu0 %v2604_v63, %s5060_s23 }
 0x54c   : > { %2617 = vrot.lane.b32.xlu2 %v2606_v2, %s5060_s23 }
 0x54f   : > { %2621 = vrot.lane.b32.xlu1 %v2608_v47, %s5060_s23  ;;  %2619 = vrot.lane.b32.xlu0 %v2607_v14, %s5060_s23 }
 0x554   : > { %2623 = vrot.lane.b32.xlu2 %v2609_v30, %s5060_s23 }
 0x557   : > { %2625 = vrot.lane.b32.xlu0 %v2610_v0, %s5060_s23 }
 0x596   : > { %v4757_v24 = vpop.permute.xlu2 %4756 }
 0x597   : > { %v4759_v5 = vunpack.i.h.bf16 %v4757_v24  ;;  %v4758_v23 = vunpack.i.l.bf16 %v4757_v24 }
 0x599   : > { %v6086_v42 = vsel %vm1142_vm0, %v4758_v23, %v4759_v5 }
 0x59a   : > { %7685 = vst [vmem:[#allocation60_spill] sm:$0xff] %v6086_v42 }
 0x59e   : > { %v2612_v2 = vpop.permute.xlu2 %2611 }
 0x5a1   : > { %v6088_v27 = vpop.permute.xlu0 %4746 }
 0x5a2   : > { %v7551_v8 = vunpack.i.h.bf16 %v6088_v27 }
 0x5a6   : > { %v2618_v42 = vpop.permute.xlu2 %2617 }
 0x5a9   : > { %v4752_v51 = vpop.permute.xlu1 %4751 }
 0x5aa   : > { %v4754_v10 = vunpack.i.h.bf16 %v4752_v51  ;;  %v4753_v41 = vunpack.i.l.bf16 %v4752_v51 }
 0x5ac   : > { %v6094_v6 = vsel %vm1142_vm0, %v7551_v8, %v4753_v41  ;;  %v6097_v33 = vsel %vm1142_vm0, %v4754_v10, %v4758_v23  ;;  %v6100_v63 = vsel %vm1142_vm0, %v4753_v41, %v4754_v10 }
 0x5ad   : > { %7686 = vst [vmem:[#allocation61_spill] sm:$0xff] %v6100_v63 }
 0x5b1   : > { %v2565_v47 = vpop.permute.xlu1 %2564  ;;  %v4762_v14 = vpop.permute.xlu0 %4761 }
 0x5b2   : > { %v4764_v30 = vunpack.i.h.bf16 %v4762_v14  ;;  %v4763_v0 = vunpack.i.l.bf16 %v4762_v14  ;;  %v2643_v14 = vmul.f32 %v2612_v2, %v5328_v17 }
 0x5b4   : > { %v6103_v24 = vsel %vm1142_vm0, %v4764_v30, %v2565_v47  ;;  %v6106_v51 = vsel %vm1142_vm0, %v4759_v5, %v4763_v0  ;;  %v6109_v8 = vsel %vm1142_vm0, %v4763_v0, %v4764_v30 }
 0x5b5   : > { %7687 = vst [vmem:[#allocation62_spill] sm:$0xff] %v6103_v24 }
 0x5b6   : > { %7688 = vst [vmem:[#allocation63_spill] sm:$0xff] %v6106_v51 }
 0x5b7   : > { %7689 = vst [vmem:[#allocation64_spill] sm:$0xff] %v6109_v8 }
 0x5b9   : > { %v2616_v23 = vpop.permute.xlu1 %2615  ;;  %v2614_v11 = vpop.permute.xlu0 %2613 }
 0x5ba   : > { %v2627_v10 = vsel %vm1079_vm7, %v2612_v2, %v2614_v11  ;;  %v2628_v41 = vsel %vm1079_vm7, %v2614_v11, %v2616_v23  ;;  %v2629_v63 = vsel %vm1079_vm7, %v2616_v23, %v2618_v42 }
 0x5bb   : > { %v2644_v47 = vmul.f32 %v2627_v10, %v5326_v12  ;;  %v2645_v24 = vmul.f32 %v2628_v41, %v5391_v37  ;;  %v2646_v5 = vmul.f32 %v2629_v63, %v5389_v26  ;;  %v2713_v41 = vld [vmem:[#allocation6] ss:$8 sm:$0xf0]  ;;  %v2624_v63 = vpop.permute.xlu2 %2623 }
 0x5bd   : > { %v4765_v51 = vpack.i.bf16 %v2644_v47, %v2643_v14  ;;  %v4770_v30 = vpack.i.bf16 %v2646_v5, %v2645_v24  ;;  %v2714_v24 = vor.u32 %v2713_v41, %v2712_v31 }
 0x5bf   : > { %4766 = vrot.lane.b32.xlu1 %v4765_v51, %s5051_s8  ;;  %4771 = vrot.lane.b32.xlu2 %v4770_v30, %s5051_s8  ;;  %v2716_v30 = vperm.slane %v2714_v24, 0  ;;  %v2719_v31 = vperm.slane %v2714_v24, 3  ;;  %v2723_v41 = vperm.slane %v2714_v24, 7 }
 0x5c1   : > { %v2622_v0 = vpop.permute.xlu1 %2621  ;;  %v2620_v8 = vpop.permute.xlu0 %2619 }
 0x5c2   : > { %v2630_v11 = vsel %vm1079_vm7, %v2618_v42, %v2620_v8  ;;  %v2631_v23 = vsel %vm1079_vm7, %v2620_v8, %v2622_v0  ;;  %v2632_v51 = vsel %vm1079_vm7, %v2622_v0, %v2624_v63  ;;  %v2717_v0 = vperm.slane %v2714_v24, 1 }
 0x5c3   : > { %v2647_v2 = vmul.f32 %v2630_v11, %v5414_v61  ;;  %v2648_v10 = vmul.f32 %v2631_v23, %v5416_v62  ;;  %v2649_v8 = vmul.f32 %v2632_v51, %v5494_v48  ;;  %v2721_v23 = vperm.slane %v2714_v24, 5 }
 0x5c5   : > { %v4775_v4 = vpack.i.bf16 %v2648_v10, %v2647_v2  ;;  %v2722_v2 = vperm.slane %v2714_v24, 6  ;;  %v2720_v10 = vperm.slane %v2714_v24, 4 }
 0x5c7   : > { %4776 = vrot.lane.b32.xlu0 %v4775_v4, %s5051_s8  ;;  %v2718_v4 = vperm.slane %v2714_v24, 2 }
 0x5c9   : > { %v2626_v14 = vpop.permute.xlu0 %2625 }
 0x5ca   : > { %v2633_v47 = vsel %vm1079_vm7, %v2624_v63, %v2626_v14  ;;  %v2651_v42 = vmul.f32 %v2626_v14, %v5569_v59 }
 0x5cb   : > { %v2650_v5 = vmul.f32 %v2633_v47, %v5500_v3 }
 0x5cc   : > { %2677 = vrot.lane.b32.xlu2 %v2651_v42, %s5051_s8 }
 0x5cd   : > { %v4780_v11 = vpack.i.bf16 %v2650_v5, %v2649_v8 }
 0x5cf   : > { %2724 = vrot.lane.b32.xlu0 %v2716_v30, %s5066_s29  ;;  %4781 = vrot.lane.b32.xlu1 %v4780_v11, %s5051_s8 }
 0x5d4   : > { %2728 = vrot.lane.b32.xlu2 %v2718_v4, %s5066_s29 }
 0x5d7   : > { %2730 = vrot.lane.b32.xlu0 %v2719_v31, %s5066_s29  ;;  %2726 = vrot.lane.b32.xlu1 %v2717_v0, %s5066_s29 }
 0x5dc   : > { %2734 = vrot.lane.b32.xlu2 %v2721_v23, %s5066_s29 }
 0x5df   : > { %2736 = vrot.lane.b32.xlu0 %v2722_v2, %s5066_s29  ;;  %2732 = vrot.lane.b32.xlu1 %v2720_v10, %s5066_s29 }
 0x5e7   : > { %2738 = vrot.lane.b32.xlu1 %v2723_v41, %s5066_s29 }
 0x619   : > { %v4772_v63 = vpop.permute.xlu2 %4771 }
 0x61a   : > { %v4774_v51 = vunpack.i.h.bf16 %v4772_v63  ;;  %v4773_v14 = vunpack.i.l.bf16 %v4772_v63 }
 0x61c   : > { %v6141_v47 = vsel %vm7575_vm2, %v4773_v14, %v4774_v51 }
 0x61d   : > { %7690 = vst [vmem:[#allocation65_spill] sm:$0xff] %v6141_v47 }
 0x626   : > { %v2678_v0 = vpop.permute.xlu2 %2677 }
 0x631   : > { %v6143_v42 = vpop.permute.xlu1 %4766 }
 0x632   : > { %v7556_v8 = vunpack.i.h.bf16 %v6143_v42 }
 0x634   : > { %v6149_v5 = vsel %vm7575_vm2, %v7556_v8, %v4773_v14 }
 0x639   : > { %v4777_v30 = vpop.permute.xlu0 %4776 }
 0x63a   : > { %v4779_v11 = vunpack.i.h.bf16 %v4777_v30  ;;  %v4778_v24 = vunpack.i.l.bf16 %v4777_v30  ;;  %v2729_v30 = vpop.permute.xlu2 %2728 }
 0x63c   : > { %v6152_v4 = vsel %vm7575_vm2, %v4774_v51, %v4778_v24  ;;  %v6155_v31 = vsel %vm7575_vm2, %v4778_v24, %v4779_v11 }
 0x63d   : > { %7691 = vst [vmem:[#allocation66_spill] sm:$0xff] %v6155_v31 }
 0x641   : > { %v2725_v23 = vpop.permute.xlu0 %2724  ;;  %v4782_v2 = vpop.permute.xlu1 %4781 }
 0x642   : > { %v4784_v10 = vunpack.i.h.bf16 %v4782_v2  ;;  %v4783_v41 = vunpack.i.l.bf16 %v4782_v2  ;;  %v2757_v2 = vmul.f32 %v2725_v23, %v5328_v17 }
 0x644   : > { %v6158_v63 = vsel %vm7575_vm2, %v4784_v10, %v2678_v0  ;;  %v6161_v14 = vsel %vm7575_vm2, %v4779_v11, %v4783_v41  ;;  %v6164_v8 = vsel %vm7575_vm2, %v4783_v41, %v4784_v10 }
 0x645   : > { %7692 = vst [vmem:[#allocation67_spill] sm:$0xff] %v6158_v63 }
 0x646   : > { %7693 = vst [vmem:[#allocation68_spill] sm:$0xff] %v6161_v14 }
 0x647   : > { %7694 = vst [vmem:[#allocation69_spill] sm:$0xff] %v6164_v8  ;;  %v2735_v8 = vpop.permute.xlu2 %2734 }
 0x649   : > { %v2731_v51 = vpop.permute.xlu0 %2730  ;;  %v2727_v47 = vpop.permute.xlu1 %2726 }
 0x64a   : > { %v2741_v24 = vsel %vm7562_vm15, %v2725_v23, %v2727_v47  ;;  %v2742_v31 = vsel %vm7562_vm15, %v2727_v47, %v2729_v30  ;;  %v2743_v52 = vsel %vm7562_vm15, %v2729_v30, %v2731_v51 }
 0x64b   : > { %v2758_v0 = vmul.f32 %v2741_v24, %v5326_v12  ;;  %v2759_v11 = vmul.f32 %v2742_v31, %v5391_v37  ;;  %v2760_v14 = vmul.f32 %v2743_v52, %v5389_v26  ;;  %v2827_v31 = vld [vmem:[#allocation6 + $0x1] ss:$8 sm:$0xf] }
 0x64d   : > { %v4785_v10 = vpack.i.bf16 %v2758_v0, %v2757_v2  ;;  %v4790_v41 = vpack.i.bf16 %v2760_v14, %v2759_v11  ;;  %v2829_v14 = vor.u32 %v2828_v50, %v2827_v31  ;;  %v418_v0 = vld [vmem:[#allocation4 + $0x4f8] sm:$0xff]  ;;  %v408_v11 = vld [vmem:[#allocation4 + $0x4a8] sm:$0xff] }
 0x64e   : > { %939 = vmatpush.msra.mxu2 %v418_v0 }
 0x64f   : > { %4786 = vrot.lane.b32.xlu2 %v4785_v10, %s5067_s30  ;;  %4791 = vrot.lane.b32.xlu0 %v4790_v41, %s5067_s30  ;;  %v2833_v50 = vperm.slane %v2829_v14, 2  ;;  %v2836_v31 = vperm.slane %v2829_v14, 5  ;;  %v2838_v0 = vperm.slane %v2829_v14, 7 }
 0x650   : > { %940 = vmatpush.msra.mxu2 %v408_v11  ;;  %v388_v11 = vld [vmem:[#allocation4 + $0x408] sm:$0xff] }
 0x651   : > { %v2733_v63 = vpop.permute.xlu1 %2732  ;;  %v2737_v52 = vpop.permute.xlu0 %2736 }
 0x652   : > { %v2744_v47 = vsel %vm7562_vm15, %v2731_v51, %v2733_v63  ;;  %v2745_v30 = vsel %vm7562_vm15, %v2733_v63, %v2735_v8  ;;  %v2746_v10 = vsel %vm7562_vm15, %v2735_v8, %v2737_v52  ;;  %v2832_v8 = vperm.slane %v2829_v14, 1 }
 0x653   : > { %v2761_v23 = vmul.f32 %v2744_v47, %v5414_v61  ;;  %v2762_v24 = vmul.f32 %v2745_v30, %v5416_v62  ;;  %v2763_v47 = vmul.f32 %v2746_v10, %v5494_v48  ;;  %v2831_v62 = vperm.slane %v2829_v14, 0  ;;  %v378_v10 = vld [vmem:[#allocation4 + $0x3b8] sm:$0xff] }
 0x655   : > { %v4795_v2 = vpack.i.bf16 %v2762_v24, %v2761_v23  ;;  %v2834_v24 = vperm.slane %v2829_v14, 3 }
 0x657   : > { %4796 = vrot.lane.b32.xlu1 %v4795_v2, %s5067_s30  ;;  %v2837_v2 = vperm.slane %v2829_v14, 6 }
 0x659   : > { %v2739_v41 = vpop.permute.xlu1 %2738 }
 0x65a   : > { %v2747_v51 = vsel %vm7562_vm15, %v2737_v52, %v2739_v41  ;;  %v2765_v63 = vmul.f32 %v2739_v41, %v5569_v59  ;;  %v2835_v52 = vperm.slane %v2829_v14, 4  ;;  %v368_v41 = vld [vmem:[#allocation4 + $0x368] sm:$0xff]  ;;  %v318_v14 = vld [vmem:[#allocation4 + $0x1d8] sm:$0xff]  ;;  %vm2793_vm15 = vcmask 15360  }
 0x65b   : > { %v2764_v30 = vmul.f32 %v2747_v51, %v5500_v3  ;;  %v358_v51 = vld [vmem:[#allocation4 + $0x318] sm:$0xff] }
 0x65c   : > { %2791 = vrot.lane.b32.xlu0 %v2765_v63, %s5067_s30  ;;  %v348_v63 = vld [vmem:[#allocation4 + $0x2c8] sm:$0xff] }
 0x65d   : > { %v4800_v23 = vpack.i.bf16 %v2764_v30, %v2763_v47  ;;  %v338_v47 = vld [vmem:[#allocation4 + $0x278] sm:$0xff]  ;;  %v328_v30 = vld [vmem:[#allocation4 + $0x228] sm:$0xff] }
 0x65f   : > { %4801 = vrot.lane.b32.xlu2 %v4800_v23, %s5067_s30  ;;  %2839 = vrot.lane.b32.xlu1 %v2831_v62, %s5068_s6  ;;  %v398_v62 = vld [vmem:[#allocation4 + $0x458] sm:$0xff]  ;;  %v308_v23 = vld [vmem:[#allocation4 + $0x188] sm:$0xff] }
 0x660   : > { %941 = vmatpush.msra.mxu2 %v398_v62 }
 0x662   : > { %942 = vmatpush.msra.mxu2 %v388_v11 }
 0x664   : > { %2843 = vrot.lane.b32.xlu0 %v2833_v50, %s5068_s6  ;;  %943 = vmatpush.msra.mxu2 %v378_v10  ;;  %v298_v50 = vld [vmem:[#allocation4 + $0x138] sm:$0xff] }
 0x665   : > { %v578_v10 = vld [vmem:[#allocation4 + $0x9f8] sm:$0xff] }
 0x666   : > { %944 = vmatpush.msra.mxu2 %v368_v41  ;;  %v4748_v41 = vunpack.i.l.bf16 %v6088_v27  ;;  %959 = vmatpush.msra.mxu3 %v578_v10  ;;  %v4688_v10 = vunpack.i.l.bf16 %v5931_v20 }
 0x667   : > { %2841 = vrot.lane.b32.xlu2 %v2832_v8, %s5068_s6  ;;  %2845 = vrot.lane.b32.xlu1 %v2834_v24, %s5068_s6  ;;  %v288_v8 = vld [vmem:[#allocation4 + $0xe8] sm:$0xff]  ;;  %v278_v24 = vld [vmem:[#allocation4 + $0x98] sm:$0xff] }
 0x668   : > { %945 = vmatpush.msra.mxu2 %v358_v51 }
 0x66a   : > { %946 = vmatpush.msra.mxu2 %v348_v63  ;;  %v7567_v63 = vunpack.i.h.bf16 %v6025_v28 }
 0x66c   : > { %2849 = vrot.lane.b32.xlu0 %v2836_v31, %s5068_s6  ;;  %947 = vmatpush.msra.mxu2 %v338_v47  ;;  %v268_v31 = vld [vmem:[#allocation4 + $0x48] sm:$0xff]  ;;  %v4728_v47 = vunpack.i.l.bf16 %v6025_v28 }
 0x66e   : > { %948 = vmatpush.msra.mxu2 %v328_v30  ;;  %v7695_v30 = vunpack.i.h.bf16 %v6143_v42 }
 0x66f   : > { %2847 = vrot.lane.b32.xlu2 %v2835_v52, %s5068_s6  ;;  %2851 = vrot.lane.b32.xlu1 %v2837_v2, %s5068_s6  ;;  %v4968_v52 = vld [vmem:[%s5172_s13] sm:$0xff] }
 0x670   : > { %949 = vmatpush.msra.mxu2 %v318_v14 }
 0x672   : > { %950 = vmatpush.msra.mxu2 %v308_v23  ;;  %v568_v23 = vld [vmem:[#allocation4 + $0x9a8] sm:$0xff] }
 0x673   : > { %960 = vmatpush.msra.mxu3 %v568_v23  ;;  %v4648_v23 = vunpack.i.l.bf16 %v5844_v46 }
 0x674   : > { %951 = vmatpush.msra.mxu2 %v298_v50  ;;  %v558_v50 = vld [vmem:[#allocation4 + $0x958] sm:$0xff] }
 0x675   : > { %961 = vmatpush.msra.mxu3 %v558_v50  ;;  %v7569_v50 = vunpack.i.h.bf16 %v5791_v54 }
 0x676   : > { %952 = vmatpush.msra.mxu2 %v288_v8  ;;  %v7563_v8 = vunpack.i.h.bf16 %v5988_v39 }
 0x677   : > { %2853 = vrot.lane.b32.xlu2 %v2838_v0, %s5068_s6  ;;  %v4768_v0 = vunpack.i.l.bf16 %v6143_v42  ;;  %v2453_v42 = vsel %vm1258_vm1, %v4728_v47, %v7567_v63 }
 0x678   : > { %953 = vmatpush.msra.mxu2 %v278_v24  ;;  %v4708_v24 = vunpack.i.l.bf16 %v5988_v39 }
 0x679   : > { %v2679_v14 = vsel %vm7575_vm2, %v4768_v0, %v7695_v30  ;;  %v7565_v0 = vunpack.i.h.bf16 %v5881_v21  ;;  %v538_v30 = vld [vmem:[#allocation4 + $0x8b8] sm:$0xff]  ;;  %vm2855_vm2 = vcmask 1039360  }
 0x67a   : > { %954 = vmatpush.msra.mxu2 %v268_v31  ;;  %v7696_v31 = vunpack.i.h.bf16 %v6088_v27  ;;  %v2340_v27 = vsel %vm1374_vm3, %v4708_v24, %v7563_v8  ;;  %v518_v8 = vld [vmem:[#allocation4 + $0x818] sm:$0xff] }
 0x67b   : > { %955 = vmatmul.f32.vlgmr.msra.gmra.mxu2 %v4968_v52 }
 0x67c   : > { %v2566_v52 = vsel %vm1142_vm0, %v4748_v41, %v7696_v31  ;;  %v548_v41 = vld [vmem:[#allocation4 + $0x908] sm:$0xff]  ;;  %v4628_v31 = vunpack.i.l.bf16 %v5791_v54 }
 0x67d   : > { %962 = vmatpush.msra.mxu3 %v548_v41 }
 0x67f   : > { %963 = vmatpush.msra.mxu3 %v538_v30  ;;  %v4513_v30 = vunpack.i.l.bf16 %v5654_v49 }
 0x6a9   : > { %v6196_v2 = vpop.permute.xlu2 %4786 }
 0x6aa   : > { %v7571_v62 = vunpack.i.h.bf16 %v6196_v2  ;;  %v4788_v11 = vunpack.i.l.bf16 %v6196_v2 }
 0x6ac   : > { %v2794_v51 = vsel %vm2793_vm15, %v4788_v11, %v7571_v62  ;;  %v7564_v11 = vunpack.i.h.bf16 %v5931_v20 }
 0x6ad   : > { %3980 = vmatpush.msrb.mxu0 %v2794_v51  ;;  %v4668_v51 = vunpack.i.l.bf16 %v5881_v21 }
 0x6ae   : > { %v2227_v47 = vsel %vm1490_vm4, %v4688_v10, %v7564_v11  ;;  %v4518_v10 = vunpack.i.l.bf16 %v5656_v60 }
 0x6af   : > { %3981 = vmatpush.msrb.mxu0 %v2679_v14  ;;  %v7566_v14 = vunpack.i.h.bf16 %v5844_v46  ;;  %v2114_v24 = vsel %vm1605_vm5, %v4668_v51, %v7565_v0  ;;  %v7573_v51 = vunpack.i.h.bf16 %v5654_v49 }
 0x6b1   : > { %3982 = vmatpush.msrb.mxu0 %v2566_v52  ;;  %v528_v52 = vld [vmem:[#allocation4 + $0x868] sm:$0xff]  ;;  %v2001_v11 = vsel %vm1720_vm6, %v4648_v23, %v7566_v14  ;;  %v4508_v14 = vunpack.i.l.bf16 %v5617_v40 }
 0x6b2   : > { %964 = vmatpush.msra.mxu3 %v528_v52  ;;  %v508_v23 = vld [vmem:[#allocation4 + $0x7c8] sm:$0xff]  ;;  %v498_v52 = vld [vmem:[#allocation4 + $0x778] sm:$0xff] }
 0x6b3   : > { %3983 = vmatpush.msrb.mxu0 %v2453_v42  ;;  %v7572_v42 = vunpack.i.h.bf16 %v5656_v60 }
 0x6b4   : > { %965 = vmatpush.msra.mxu3 %v518_v8  ;;  %v7574_v8 = vunpack.i.h.bf16 %v5642_v15 }
 0x6b5   : > { %3984 = vmatpush.msrb.mxu0 %v2340_v27  ;;  %v1774_v63 = vsel %vm7632_vm13, %v4518_v10, %v7572_v42  ;;  %v7698_v10 = vunpack.i.h.bf16 %v5617_v40  ;;  %v488_v42 = vld [vmem:[#allocation4 + $0x728] sm:$0xff] }
 0x6b6   : > { %966 = vmatpush.msra.mxu3 %v508_v23 }
 0x6b7   : > { %3985 = vmatpush.msrb.mxu0 %v2227_v47  ;;  %v1544_v23 = vsel %vm1543_vm11, %v4508_v14, %v7698_v10  ;;  %v468_v14 = vld [vmem:[#allocation4 + $0x688] sm:$0xff]  ;;  %v4489_v10 = vunpack.i.h.bf16 %v5626_v18 }
 0x6b8   : > { %967 = vmatpush.msra.mxu3 %v498_v52  ;;  %v4494_v52 = vunpack.i.h.bf16 %v5610_v36 }
 0x6b9   : > { %v6236_v27 = vpop.permute.xlu2 %4801  ;;  %3986 = vmatpush.msrb.mxu0 %v2114_v24  ;;  %v1888_v24 = vsel %vm7633_vm14, %v4628_v31, %v7569_v50  ;;  %v4503_v31 = vunpack.i.l.bf16 %v5642_v15 }
 0x6ba   : > { %v7568_v41 = vunpack.i.h.bf16 %v6236_v27  ;;  %v7570_v47 = vunpack.i.l.bf16 %v6236_v27  ;;  %968 = vmatpush.msra.mxu3 %v488_v42  ;;  %v7700_v42 = vunpack.i.h.bf16 %v5637_v34 }
 0x6bb   : > { %3987 = vmatpush.msrb.mxu0 %v2001_v11 }
 0x6bc   : > { %v6254_v0 = vsel %vm2793_vm15, %v7570_v47, %v7568_v41  ;;  %v4498_v47 = vunpack.i.l.bf16 %v5637_v34 }
 0x6bd   : > { %7697 = vst [vmem:[#allocation70_spill] sm:$0xff] %v6254_v0  ;;  %3988 = vmatpush.msrb.mxu0 %v1888_v24  ;;  %v1659_v24 = vsel %vm7580_vm12, %v4513_v30, %v7573_v51  ;;  %v478_v30 = vld [vmem:[#allocation4 + $0x6d8] sm:$0xff]  ;;  %v7699_v51 = vunpack.i.h.bf16 %v6196_v2 }
 0x6be   : > { %969 = vmatpush.msra.mxu3 %v478_v30  ;;  %v458_v2 = vld [vmem:[#allocation4 + $0x638] sm:$0xff]  ;;  %v7701_v30 = vunpack.i.l.bf16 %v6030_v45 }
 0x6bf   : > { %3989 = vmatpush.msrb.mxu0 %v1774_v63  ;;  %v1428_v63 = vsel %vm1427_vm8, %v4503_v31, %v7574_v8  ;;  %v4488_v31 = vunpack.i.l.bf16 %v5626_v18  ;;  %v7742_v18 = vld [vmem:[#allocation21_spill] sm:$0xff] }
 0x6c0   : > { %970 = vmatpush.msra.mxu3 %v468_v14  ;;  %v7703_v14 = vunpack.i.l.bf16 %v5977_v7 }
 0x6c1   : > { %v4792_v50 = vpop.permute.xlu0 %4791  ;;  %3990 = vmatpush.msrb.mxu0 %v1659_v24  ;;  %v4493_v24 = vunpack.i.l.bf16 %v5610_v36 }
 0x6c2   : > { %v4794_v62 = vunpack.i.h.bf16 %v4792_v50  ;;  %v4793_v11 = vunpack.i.l.bf16 %v4792_v50  ;;  %971 = vmatpush.msra.mxu3 %v458_v2  ;;  %v7705_v2 = vunpack.i.l.bf16 %v6236_v27 }
 0x6c3   : > { %3991 = vmatpush.msrb.mxu0 %v1544_v23  ;;  %v1312_v23 = vsel %vm1311_vm10, %v4498_v47, %v7700_v42  ;;  %v1080_v47 = vsel %vm1079_vm7, %v4488_v31, %v4489_v10  ;;  %v6309_v31 = vld [vmem:[%s7507_s2] sm:$0xff] }
 0x6c4   : > { %v2795_v50 = vsel %vm2793_vm15, %v7699_v51, %v4793_v11  ;;  %v6280_v41 = vsel %vm2793_vm15, %v4793_v11, %v4794_v62  ;;  %v1196_v51 = vsel %vm1195_vm9, %v4493_v24, %v4494_v52  ;;  %v438_v24 = vld [vmem:[#allocation4 + $0x598] sm:$0xff] }
 0x6c5   : > { %3992 = vmatpush.msrb.mxu0 %v1428_v63  ;;  %4020 = vmatpush.msrb.mxu2 %v2795_v50  ;;  %v448_v63 = vld [vmem:[#allocation4 + $0x5e8] sm:$0xff] }
 0x6c6   : > { %972 = vmatpush.msra.mxu3 %v448_v63  ;;  %v7708_v63 = vunpack.i.h.bf16 %v5931_v20 }
 0x6c7   : > { %3993 = vmatpush.msrb.mxu0 %v1312_v23  ;;  %4021 = vmatpush.msrb.mxu2 %v6149_v5  ;;  %v7702_v5 = vunpack.i.h.bf16 %v6025_v28 }
 0x6c8   : > { %973 = vmatpush.msra.mxu3 %v438_v24 }
 0x6c9   : > { %v4797_v11 = vpop.permute.xlu1 %4796  ;;  %3994 = vmatpush.msrb.mxu0 %v1196_v51  ;;  %4022 = vmatpush.msrb.mxu2 %v6094_v6  ;;  %v2454_v42 = vsel %vm1258_vm1, %v7702_v5, %v7701_v30  ;;  %v7704_v6 = vunpack.i.h.bf16 %v5988_v39  ;;  %v428_v39 = vld [vmem:[#allocation4 + $0x548] sm:$0xff] }
 0x6ca   : > { %v4799_v50 = vunpack.i.h.bf16 %v4797_v11  ;;  %v4798_v8 = vunpack.i.l.bf16 %v4797_v11  ;;  %974 = vmatpush.msra.mxu3 %v428_v39 }
 0x6cb   : > { %3995 = vmatpush.msrb.mxu0 %v1080_v47  ;;  %4023 = vmatpush.msrb.mxu2 %v2454_v42  ;;  %v2341_v23 = vsel %vm1374_vm3, %v7704_v6, %v7703_v14  ;;  %v2842_v47 = vpop.permute.xlu2 %2841  ;;  %v7710_v42 = vunpack.i.h.bf16 %v5881_v21  ;;  %v7714_v21 = vunpack.i.h.bf16 %v6030_v45 }
 0x6cc   : > { %v2797_v51 = vsel %vm2793_vm15, %v4794_v62, %v4798_v8  ;;  %v6312_v28 = vsel %vm2793_vm15, %v4798_v8, %v4799_v50  ;;  %v6317_v11 = vsel %vm2793_vm15, %v4799_v50, %v7705_v2  ;;  %v7707_v62 = vunpack.i.l.bf16 %v5933_v19  ;;  %3996 = vmatmul.f32.vlgmr.msrb.gmra.mxu0 %v6309_v31 }
 0x6cd   : > { %7706 = vst [vmem:[#allocation71_spill] sm:$0xff] %v6317_v11  ;;  %4024 = vmatpush.msrb.mxu2 %v2341_v23  ;;  %4100 = vmatpush.msra.mxu0 %v2797_v51  ;;  %v7600_v8 = vunpack.i.l.bf16 %v5990_v56  ;;  %v7709_v50 = vunpack.i.l.bf16 %v5883_v44  ;;  %v7712_v23 = vunpack.i.h.bf16 %v5844_v46  ;;  %v7713_v2 = vunpack.i.l.bf16 %v6041_v9 }
 0x6ce   : > { %v6319_v30 = vpop.permute.xlu0 %2791  ;;  %v2228_v5 = vsel %vm1490_vm4, %v7708_v63, %v7707_v62  ;;  %v4969_v62 = vld [vmem:[%s5172_s13 + $0x8] sm:$0xff]  ;;  %v7716_v63 = vunpack.i.h.bf16 %v5791_v54  ;;  %v7717_v9 = vunpack.i.h.bf16 %v5977_v7  ;;  %v7719_v54 = vunpack.i.h.bf16 %v5656_v60 }
 0x6cf   : > { %4025 = vmatpush.msrb.mxu2 %v2228_v5  ;;  %4101 = vmatpush.msra.mxu0 %v6152_v4  ;;  %v2115_v14 = vsel %vm1605_vm5, %v7710_v42, %v7709_v50  ;;  %v7711_v4 = vunpack.i.l.bf16 %v5833_v53  ;;  %v2456_v39 = vsel %vm1258_vm1, %v7714_v21, %v7713_v2  ;;  %v7598_v5 = vunpack.i.l.bf16 %v5896_v57 }
 0x6d0   : > { %975 = vmatmul.f32.vlgmr.msra.gmra.mxu3 %v4969_v62  ;;  %v2343_v45 = vsel %vm1374_vm3, %v7717_v9, %v7600_v8  ;;  %v7599_v50 = vunpack.i.l.bf16 %v5929_v16  ;;  %v7720_v7 = vunpack.i.h.bf16 %v5933_v19  ;;  %v7721_v60 = vunpack.i.l.bf16 %v5685_v58 }
 0x6d1   : > { %v2840_v20 = vpop.permute.xlu1 %2839  ;;  %4026 = vmatpush.msrb.mxu2 %v2115_v14  ;;  %4102 = vmatpush.msra.mxu0 %v6097_v33  ;;  %v2002_v51 = vsel %vm1720_vm6, %v7712_v23, %v7711_v4  ;;  %v7597_v4 = vunpack.i.l.bf16 %v5846_v38  ;;  %v7722_v2 = vunpack.i.h.bf16 %v5654_v49  ;;  %v7723_v62 = vunpack.i.h.bf16 %v5883_v44 }
 0x6d2   : > { %v2856_v24 = vsel %vm2855_vm2, %v2840_v20, %v2842_v47  ;;  %v2872_v6 = vmul.f32 %v2840_v20, %v5328_v17  ;;  %v7715_v17 = vunpack.i.l.bf16 %v5787_v22  ;;  %v7718_v20 = vunpack.i.l.bf16 %v5727_v1 }
 0x6d3   : > { %v2873_v33 = vmul.f32 %v2856_v24, %v5326_v12  ;;  %4027 = vmatpush.msrb.mxu2 %v2002_v51  ;;  %4103 = vmatpush.msra.mxu0 %v2456_v39  ;;  %v2848_v23 = vpop.permute.xlu2 %2847  ;;  %v1660_v21 = vsel %vm7580_vm12, %v7722_v2, %v7721_v60  ;;  %v7595_v19 = vunpack.i.l.bf16 %v5731_v32  ;;  %v7726_v44 = vunpack.i.h.bf16 %v5833_v53 }
 0x6d4   : > { %v1889_v46 = vsel %vm7633_vm14, %v7716_v63, %v7715_v17  ;;  %v1775_v24 = vsel %vm7632_vm13, %v7719_v54, %v7718_v20  ;;  %v7725_v63 = vunpack.i.h.bf16 %v5617_v40  ;;  %v7728_v40 = vunpack.i.h.bf16 %v5642_v15 }
 0x6d5   : > { %v4805_v42 = vpack.i.bf16 %v2873_v33, %v2872_v6  ;;  %4028 = vmatpush.msrb.mxu2 %v1889_v46  ;;  %4104 = vmatpush.msra.mxu0 %v2343_v45  ;;  %v2230_v6 = vsel %vm1490_vm4, %v7720_v7, %v7599_v50  ;;  %v2117_v33 = vsel %vm1605_vm5, %v7723_v62, %v7598_v5  ;;  %v7596_v46 = vunpack.i.l.bf16 %v5785_v25 }
 0x6d6   : > { %v2844_v14 = vpop.permute.xlu0 %2843  ;;  %v7594_v54 = vunpack.i.l.bf16 %v5709_v13  ;;  %v7730_v60 = vunpack.i.l.bf16 %v5663_v29  ;;  %v7731_v15 = vunpack.i.h.bf16 %v5637_v34  ;;  %v7734_v34 = vld [vmem:[#allocation14_spill] sm:$0xff] }
 0x6d7   : > { %4806 = vrot.lane.b32.xlu0 %v4805_v42, %s5069_s11  ;;  %4029 = vmatpush.msrb.mxu2 %v1775_v24  ;;  %v2857_v51 = vsel %vm2855_vm2, %v2842_v47, %v2844_v14  ;;  %v7724_v47 = vunpack.i.l.bf16 %v5681_v43  ;;  %v2004_v42 = vsel %vm1720_vm6, %v7726_v44, %v7597_v4  ;;  %v3099_v4 = vld [vmem:[#allocation6 + $0x4] ss:$8 sm:$0xf] }
 0x6d8   : > { %4105 = vmatpush.msra.mxu0 %v2230_v6  ;;  %v2874_v9 = vmul.f32 %v2857_v51, %v5391_v37  ;;  %v7729_v6 = vunpack.i.h.bf16 %v5787_v22  ;;  %v1313_v2 = vsel %vm1311_vm10, %v7731_v15, %v7730_v60  ;;  %v7732_v22 = vunpack.i.h.bf16 %v5727_v1 }
 0x6d9   : > { %v2846_v39 = vpop.permute.xlu1 %2845  ;;  %4030 = vmatpush.msrb.mxu2 %v1660_v21  ;;  %v1545_v49 = vsel %vm1543_vm11, %v7725_v63, %v7724_v47  ;;  %v7593_v21 = vunpack.i.l.bf16 %v5713_v55  ;;  %v7735_v63 = vunpack.i.l.bf16 %v7734_v34  ;;  %v7737_v1 = vunpack.i.h.bf16 %v5685_v58 }
 0x6da   : > { %v2858_v17 = vsel %vm2855_vm2, %v2844_v14, %v2846_v39  ;;  %4106 = vmatpush.msra.mxu0 %v2117_v33  ;;  %v7727_v14 = vunpack.i.l.bf16 %v5640_v35  ;;  %v2859_v7 = vsel %vm2855_vm2, %v2846_v39, %v2848_v23  ;;  %v1891_v53 = vsel %vm7633_vm14, %v7729_v6, %v7596_v46 }
 0x6db   : > { %v2875_v45 = vmul.f32 %v2858_v17, %v5389_v26  ;;  %4031 = vmatpush.msrb.mxu2 %v1545_v49  ;;  %v1777_v39 = vsel %vm7632_vm13, %v7732_v22, %v7595_v19  ;;  %v2876_v33 = vmul.f32 %v2859_v7, %v5414_v61  ;;  %v7733_v17 = vld [vmem:[#allocation10_spill] sm:$0xff]  ;;  %v7736_v49 = vld [vmem:[#allocation23_spill] sm:$0xff]  ;;  %v7590_v22 = vunpack.i.l.bf16 %v7742_v18 }
 0x6dc   : > { %4107 = vmatpush.msra.mxu0 %v2004_v42  ;;  %v1429_v20 = vsel %vm1427_vm8, %v7728_v40, %v7727_v14  ;;  %v1662_v42 = vsel %vm7580_vm12, %v7737_v1, %v7594_v54  ;;  %v2986_v14 = vld [vmem:[#allocation6 + $0x3] ss:$8 sm:$0xf] }
 0x6dd   : > { %v4810_v24 = vpack.i.bf16 %v2875_v45, %v2874_v9  ;;  %4032 = vmatpush.msrb.mxu2 %v1429_v20  ;;  %v7592_v9 = vunpack.i.l.bf16 %v7736_v49  ;;  %v2854_v45 = vpop.permute.xlu2 %2853  ;;  %v2987_v40 = vld [vmem:[#allocation6 + $0x3] ss:$8 sm:$0xf0] }
 0x6de   : > { %4108 = vmatpush.msra.mxu0 %v1891_v53  ;;  %v2850_v51 = vpop.permute.xlu0 %2849  ;;  %v7740_v53 = vld [vmem:[#allocation17_spill] sm:$0xff] }
 0x6df   : > { %v2860_v62 = vsel %vm2855_vm2, %v2848_v23, %v2850_v51  ;;  %4811 = vrot.lane.b32.xlu1 %v4810_v24, %s5069_s11  ;;  %4033 = vmatpush.msrb.mxu2 %v1313_v2  ;;  %v1197_v23 = vsel %vm1195_vm9, %v4494_v52, %v7735_v63  ;;  %v7738_v52 = vld [vmem:[#allocation11_spill] sm:$0xff]  ;;  %v7591_v60 = vunpack.i.l.bf16 %v7740_v53 }
 0x6e0   : > { %v2877_v47 = vmul.f32 %v2860_v62, %v7733_v17  ;;  %4109 = vmatpush.msra.mxu0 %v1777_v39  ;;  %v7739_v7 = vunpack.i.l.bf16 %v7738_v52  ;;  %v2988_v62 = vor.u32 %v2987_v40, %v2986_v14 }
 0x6e1   : > { %v2852_v44 = vpop.permute.xlu1 %2851  ;;  %4034 = vmatpush.msrb.mxu2 %v1197_v23  ;;  %v7745_v23 = vunpack.i.h.bf16 %v5663_v29  ;;  %v7748_v29 = vunpack.i.h.bf16 %v6236_v27  ;;  %v7752_v27 = vld [vmem:[#allocation51_spill] sm:$0xff] }
 0x6e2   : > { %v4815_v20 = vpack.i.bf16 %v2877_v47, %v2876_v33  ;;  %v2861_v24 = vsel %vm2855_vm2, %v2850_v51, %v2852_v44  ;;  %v2862_v36 = vsel %vm2855_vm2, %v2852_v44, %v2854_v45  ;;  %4110 = vmatpush.msra.mxu0 %v1662_v42  ;;  %v1081_v6 = vsel %vm1079_vm7, %v4489_v10, %v7739_v7 }
 0x6e3   : > { %v2878_v58 = vmul.f32 %v2861_v24, %v5494_v48  ;;  %v2879_v15 = vmul.f32 %v2862_v36, %v5500_v3  ;;  %4035 = vmatpush.msrb.mxu2 %v1081_v6  ;;  %v7741_v51 = vunpack.i.h.bf16 %v5681_v43  ;;  %v2880_v10 = vmul.f32 %v2854_v45, %v5569_v59  ;;  %v7744_v43 = vld [vmem:[#allocation20_spill] sm:$0xff]  ;;  %v7750_v36 = vld [vmem:[#allocation54_spill] sm:$0xff] }
 0x6e4   : > { %4816 = vrot.lane.b32.xlu2 %v4815_v20, %s5069_s11  ;;  %v7743_v33 = vunpack.i.h.bf16 %v5640_v35  ;;  %4036 = vmatmul.f32.vlgmr.msrb.gmra.mxu2 %v6309_v31  ;;  %v7589_v63 = vunpack.i.l.bf16 %v7744_v43  ;;  %v1315_v45 = vsel %vm1311_vm10, %v7745_v23, %v7591_v60  ;;  %v2990_v44 = vperm.slane %v2988_v62, 0  ;;  %v7751_v6 = vld [vmem:[#allocation62_spill] sm:$0xff] }
 0x6e5   : > { %v1547_v2 = vsel %vm1543_vm11, %v7741_v51, %v7593_v21  ;;  %v4820_v39 = vpack.i.bf16 %v2879_v15, %v2878_v58  ;;  %v7746_v35 = vunpack.i.h.bf16 %v7734_v34  ;;  %v7747_v42 = vunpack.i.h.bf16 %v7738_v52  ;;  %v7749_v34 = vld [vmem:[#allocation67_spill] sm:$0xff]  ;;  %v7754_v51 = vld [vmem:[#allocation53_spill] sm:$0xff] }
 0x6e6   : > { %4111 = vmatpush.msra.mxu0 %v1547_v2  ;;  %v1431_v47 = vsel %vm1427_vm8, %v7743_v33, %v7592_v9  ;;  %v2992_v40 = vperm.slane %v2988_v62, 2  ;;  %v2801_v20 = vsel %vm2793_vm15, %v7748_v29, %v6319_v30  ;;  %v2991_v24 = vperm.slane %v2988_v62, 1  ;;  %v7753_v58 = vld [vmem:[#allocation59_spill] sm:$0xff]  ;;  %v7760_v29 = vld [vmem:[#allocation44_spill] sm:$0xff] }
 0x6e7   : > { %2906 = vrot.lane.b32.xlu1 %v2880_v10, %s5069_s11  ;;  %4821 = vrot.lane.b32.xlu0 %v4820_v39, %s5069_s11  ;;  %v1199_v1 = vsel %vm1195_vm9, %v7746_v35, %v7590_v22  ;;  %v1083_v14 = vsel %vm1079_vm7, %v7747_v42, %v7589_v63  ;;  %v7588_v52 = vunpack.i.h.bf16 %v7750_v36  ;;  %v2993_v7 = vperm.slane %v2988_v62, 3  ;;  %v7755_v39 = vld [vmem:[#allocation45_spill] sm:$0xff]  ;;  %v7758_v35 = vld [vmem:[#allocation42_spill] sm:$0xff]  ;;  %v7759_v42 = vld [vmem:[#allocation48_spill] sm:$0xff] }
 0x6e8   : > { %4112 = vmatpush.msra.mxu0 %v1431_v47  ;;  %v7586_v30 = vunpack.i.h.bf16 %v7752_v27  ;;  %v2995_v15 = vperm.slane %v2988_v62, 5  ;;  %v2994_v10 = vperm.slane %v2988_v62, 4  ;;  %v7583_v33 = vunpack.i.h.bf16 %v7755_v39  ;;  %v7756_v47 = vld [vmem:[#allocation46_spill] sm:$0xff] }
 0x6e9   : > { %v2347_v2 = vsel %vm1374_vm3, %v7588_v52, %v7754_v51  ;;  %v7584_v23 = vunpack.i.h.bf16 %v7756_v47 }
 0x6ea   : > { %4113 = vmatpush.msra.mxu0 %v1315_v45  ;;  %v7757_v45 = vld [vmem:[#allocation50_spill] sm:$0xff] }
 0x6ec   : > { %4114 = vmatpush.msra.mxu0 %v1199_v1  ;;  %2998 = vrot.lane.b32.xlu2 %v2990_v44, %s5069_s11  ;;  %v2234_v44 = vsel %vm1490_vm4, %v7586_v30, %v7757_v45  ;;  %v7578_v1 = vunpack.i.h.bf16 %v7758_v35  ;;  %v7765_v45 = vld [vmem:[#allocation28_spill] sm:$0xff] }
 0x6ee   : > { %4115 = vmatpush.msra.mxu0 %v1083_v14  ;;  %v2121_v14 = vsel %vm1605_vm5, %v7584_v23, %v7759_v42  ;;  %v7766_v42 = vld [vmem:[#allocation38_spill] sm:$0xff] }
 0x6ef   : > { %4116 = vmatmul.f32.vlgmr.msra.gmra.mxu0 %v6309_v31  ;;  %3002 = vrot.lane.b32.xlu1 %v2992_v40, %s5069_s11  ;;  %v2996_v40 = vperm.slane %v2988_v62, 6 }
 0x6f0   : > { %4260 = vmatpush.msrb.mxu0 %v2801_v20  ;;  %3000 = vrot.lane.b32.xlu0 %v2991_v24, %s5069_s11  ;;  %v2008_v20 = vsel %vm1720_vm6, %v7583_v33, %v7760_v29  ;;  %v7761_v24 = vld [vmem:[#allocation32_spill] sm:$0xff]  ;;  %v7768_v29 = vld [vmem:[#allocation37_spill] sm:$0xff] }
 0x6f2   : > { %4261 = vmatpush.msrb.mxu0 %v7749_v34  ;;  %v7576_v34 = vunpack.i.h.bf16 %v7761_v24 }
 0x6f4   : > { %4262 = vmatpush.msrb.mxu0 %v7751_v6  ;;  %3004 = vrot.lane.b32.xlu2 %v2993_v7, %s5069_s11  ;;  %v7762_v7 = vld [vmem:[#allocation41_spill] sm:$0xff] }
 0x6f5   : > { %v1895_v6 = vsel %vm7633_vm14, %v7578_v1, %v7762_v7  ;;  %v7769_v7 = vld [vmem:[#allocation26_spill] sm:$0xff] }
 0x6f6   : > { %4263 = vmatpush.msrb.mxu0 %v7753_v58  ;;  %v2997_v58 = vperm.slane %v2988_v62, 7 }
 0x6f7   : > { %3008 = vrot.lane.b32.xlu1 %v2995_v15, %s5069_s11  ;;  %v7763_v15 = vld [vmem:[#allocation29_spill] sm:$0xff] }
 0x6f8   : > { %4264 = vmatpush.msrb.mxu0 %v2347_v2  ;;  %3006 = vrot.lane.b32.xlu0 %v2994_v10, %s5069_s11  ;;  %v7577_v51 = vunpack.i.h.bf16 %v7763_v15  ;;  %v7764_v2 = vld [vmem:[#allocation39_spill] sm:$0xff] }
 0x6f9   : > { %v1781_v10 = vsel %vm7632_vm13, %v7576_v34, %v7764_v2  ;;  %v7770_v2 = vld [vmem:[#allocation36_spill] sm:$0xff] }
 0x6fa   : > { %4265 = vmatpush.msrb.mxu0 %v2234_v44  ;;  %v7579_v44 = vunpack.i.h.bf16 %v7765_v45  ;;  %v1666_v62 = vsel %vm7580_vm12, %v7577_v51, %v7766_v42  ;;  %v7772_v42 = vld [vmem:[#allocation35_spill] sm:$0xff]  ;;  %vm2908_vm12 = vcmask 7168  }
 0x6fb   : > { %v7773_v51 = vld [vmem:[#allocation27_spill] sm:$0xff] }
 0x6fc   : > { %4266 = vmatpush.msrb.mxu0 %v2121_v14  ;;  %3010 = vrot.lane.b32.xlu2 %v2996_v40, %s5069_s11  ;;  %v7767_v14 = vld [vmem:[#allocation30_spill] sm:$0xff]  ;;  %v7587_v1 = vunpack.i.h.bf16 %v7773_v51 }
 0x6fd   : > { %v7582_v40 = vunpack.i.h.bf16 %v7767_v14 }
 0x6fe   : > { %4267 = vmatpush.msrb.mxu0 %v2008_v20  ;;  %v1551_v20 = vsel %vm1543_vm11, %v7579_v44, %v7768_v29  ;;  %v7774_v29 = vld [vmem:[#allocation34_spill] sm:$0xff]  ;;  %v7775_v44 = vld [vmem:[#allocation33_spill] sm:$0xff] }
 0x700   : > { %4268 = vmatpush.msrb.mxu0 %v1895_v6  ;;  %3012 = vrot.lane.b32.xlu0 %v2997_v58, %s5069_s11  ;;  %v7581_v6 = vunpack.i.h.bf16 %v7769_v7  ;;  %v1435_v58 = vsel %vm1427_vm8, %v7582_v40, %v7770_v2  ;;  %v1087_v2 = vsel %vm1079_vm7, %v7587_v1, %v7775_v44 }
 0x702   : > { %4269 = vmatpush.msrb.mxu0 %v1781_v10  ;;  %v7771_v10 = vld [vmem:[#allocation25_spill] sm:$0xff] }
 0x703   : > { %v7585_v34 = vunpack.i.h.bf16 %v7771_v10 }
 0x704   : > { %4270 = vmatpush.msrb.mxu0 %v1666_v62  ;;  %v1319_v62 = vsel %vm1311_vm10, %v7581_v6, %v7772_v42 }
 0x706   : > { %4271 = vmatpush.msrb.mxu0 %v1551_v20  ;;  %v1203_v20 = vsel %vm1195_vm9, %v7585_v34, %v7774_v29 }
 0x708   : > { %4272 = vmatpush.msrb.mxu0 %v1435_v58 }
 0x70a   : > { %4273 = vmatpush.msrb.mxu0 %v1319_v62 }
 0x70c   : > { %4274 = vmatpush.msrb.mxu0 %v1203_v20 }
 0x70e   : > { %4275 = vmatpush.msrb.mxu0 %v1087_v2 }
 0x70f   : > { %4276 = vmatmul.f32.vlgmr.msrb.gmra.mxu0 %v6309_v31 }
 0x73e   : > { %v4817_v58 = vpop.permute.xlu2 %4816 }
 0x73f   : > { %v4819_v42 = vunpack.i.h.bf16 %v4817_v58  ;;  %v4818_v62 = vunpack.i.l.bf16 %v4817_v58 }
 0x741   : > { %v6557_v6 = vsel %vm2908_vm12, %v4818_v62, %v4819_v42 }
 0x742   : > { %7776 = vst [vmem:[#allocation10_spill] sm:$0xff] %v6557_v6 }
 0x746   : > { %v2999_v58 = vpop.permute.xlu2 %2998 }
 0x749   : > { %v4807_v40 = vpop.permute.xlu0 %4806 }
 0x74a   : > { %v4809_v33 = vunpack.i.h.bf16 %v4807_v40  ;;  %v4808_v23 = vunpack.i.l.bf16 %v4807_v40 }
 0x74c   : > { %v6560_v29 = vsel %vm2908_vm12, %v4808_v23, %v4809_v33 }
 0x751   : > { %v4812_v20 = vpop.permute.xlu1 %4811 }
 0x752   : > { %v4814_v34 = vunpack.i.h.bf16 %v4812_v20  ;;  %v4813_v30 = vunpack.i.l.bf16 %v4812_v20  ;;  %v3005_v20 = vpop.permute.xlu2 %3004 }
 0x754   : > { %v6563_v44 = vsel %vm2908_vm12, %v4809_v33, %v4813_v30  ;;  %v6566_v31 = vsel %vm2908_vm12, %v4813_v30, %v4814_v34  ;;  %v6569_v2 = vsel %vm2908_vm12, %v4814_v34, %v4818_v62 }
 0x755   : > { %7777 = vst [vmem:[#allocation14_spill] sm:$0xff] %v6569_v2 }
 0x759   : > { %v2907_v1 = vpop.permute.xlu1 %2906  ;;  %v4822_v52 = vpop.permute.xlu0 %4821 }
 0x75a   : > { %v4824_v63 = vunpack.i.h.bf16 %v4822_v52  ;;  %v4823_v40 = vunpack.i.l.bf16 %v4822_v52 }
 0x75c   : > { %v6572_v23 = vsel %vm2908_vm12, %v4819_v42, %v4823_v40  ;;  %v6575_v22 = vsel %vm2908_vm12, %v4824_v63, %v2907_v1  ;;  %v6578_v33 = vsel %vm2908_vm12, %v4823_v40, %v4824_v63  ;;  %v3030_v42 = vmul.f32 %v2999_v58, %v5326_v12 }
 0x75d   : > { %7778 = vst [vmem:[#allocation11_spill] sm:$0xff] %v6572_v23 }
 0x75e   : > { %7779 = vst [vmem:[#allocation67_spill] sm:$0xff] %v6575_v22 }
 0x75f   : > { %7780 = vst [vmem:[#allocation62_spill] sm:$0xff] %v6578_v33 }
 0x761   : > { %v3003_v30 = vpop.permute.xlu1 %3002 }
 0x762   : > { %v3001_v60 = vpop.permute.xlu0 %3000  ;;  %v3016_v34 = vsel %vm2908_vm12, %v3003_v30, %v3005_v20 }
 0x763   : > { %v3014_v62 = vsel %vm2908_vm12, %v2999_v58, %v3001_v60  ;;  %v3015_v9 = vsel %vm2908_vm12, %v3001_v60, %v3003_v30  ;;  %v3033_v52 = vmul.f32 %v3016_v34, %v5414_v61  ;;  %v956_v34 = vpop.f32.mrf.mxu2 }
 0x764   : > { %v3031_v21 = vmul.f32 %v3014_v62, %v5391_v37  ;;  %v3032_v1 = vmul.f32 %v3015_v9, %v5389_v26  ;;  %v976_v62 = vpop.f32.mrf.mxu3  ;;  %v3100_v9 = vld [vmem:[#allocation6 + $0x4] ss:$8 sm:$0xf0] }
 0x766   : > { %v4825_v54 = vpack.i.bf16 %v3031_v21, %v3030_v42  ;;  %v4830_v63 = vpack.i.bf16 %v3033_v52, %v3032_v1  ;;  %v3011_v52 = vpop.permute.xlu2 %3010  ;;  %v6593_v42 = vadd.f32 %v976_v62, %v956_v34 }
 0x768   : > { %4826 = vrot.lane.b32.xlu1 %v4825_v54, %s5068_s6  ;;  %4831 = vrot.lane.b32.xlu2 %v4830_v63, %s5068_s6  ;;  %v3101_v54 = vor.u32 %v3100_v9, %v3099_v4 }
 0x769   : > { %v3009_v40 = vpop.permute.xlu1 %3008 }
 0x76a   : > { %v3007_v19 = vpop.permute.xlu0 %3006  ;;  %v3019_v1 = vsel %vm2908_vm12, %v3009_v40, %v3011_v52  ;;  %v3103_v5 = vperm.slane %v3101_v54, 0  ;;  %v3105_v4 = vperm.slane %v3101_v54, 2  ;;  %v3108_v34 = vperm.slane %v3101_v54, 5 }
 0x76b   : > { %v3017_v46 = vsel %vm2908_vm12, %v3005_v20, %v3007_v19  ;;  %v3018_v60 = vsel %vm2908_vm12, %v3007_v19, %v3009_v40  ;;  %v3036_v63 = vmul.f32 %v3019_v1, %v5500_v3  ;;  %v3104_v40 = vperm.slane %v3101_v54, 1 }
 0x76c   : > { %v3034_v30 = vmul.f32 %v3017_v46, %v7733_v17  ;;  %v3035_v58 = vmul.f32 %v3018_v60, %v5494_v48  ;;  %v3109_v62 = vperm.slane %v3101_v54, 6  ;;  %v3107_v9 = vperm.slane %v3101_v54, 4 }
 0x76e   : > { %v4835_v21 = vpack.i.bf16 %v3035_v58, %v3034_v30  ;;  %v3106_v58 = vperm.slane %v3101_v54, 3 }
 0x770   : > { %4836 = vrot.lane.b32.xlu0 %v4835_v21, %s5068_s6  ;;  %v3664_v21 = vld [vmem:[#allocation6 + $0x4] ss:$8 sm:$0xf] }
 0x772   : > { %v3013_v20 = vpop.permute.xlu0 %3012 }
 0x773   : > { %v3020_v19 = vsel %vm2908_vm12, %v3011_v52, %v3013_v20  ;;  %v3038_v46 = vmul.f32 %v3013_v20, %v6593_v42  ;;  %v3665_v52 = vld [vmem:[#allocation6 + $0x4] ss:$8 sm:$0xf0]  ;;  %v3110_v20 = vperm.slane %v3101_v54, 7  ;;  %vm7785_vm12 = vcmask 244736  }
 0x774   : > { %v3037_v60 = vmul.f32 %v3020_v19, %v5569_v59  ;;  %v3551_v19 = vld [vmem:[#allocation6 + $0x3] ss:$8 sm:$0xf]  ;;  %vm7786_vm13 = vmmov %vm7785_vm12 }
 0x775   : > { %3064 = vrot.lane.b32.xlu2 %v3038_v46, %s5068_s6  ;;  %v3552_v46 = vld [vmem:[#allocation6 + $0x3] ss:$8 sm:$0xf0]  ;;  %vm7787_vm14 = vmmov %vm7785_vm12 }
 0x776   : > { %v4840_v30 = vpack.i.bf16 %v3037_v60, %v3036_v63  ;;  %v6615_v63 = vor.u32 %v3552_v46, %v3551_v19  ;;  %v3213_v19 = vld [vmem:[#allocation6] ss:$8 sm:$0xf0] }
 0x778   : > { %3111 = vrot.lane.b32.xlu0 %v3103_v5, %s5067_s30  ;;  %4841 = vrot.lane.b32.xlu1 %v4840_v30, %s5068_s6  ;;  %v6610_v5 = vor.u32 %v3665_v52, %v3664_v21  ;;  %v3555_v60 = vperm.slane %v6615_v63, 0  ;;  %v3561_v35 = vperm.slane %v6615_v63, 6 }
 0x77a   : > { %v3668_v1 = vperm.slane %v6610_v5, 0  ;;  %v3669_v30 = vperm.slane %v6610_v5, 1 }
 0x77d   : > { %3115 = vrot.lane.b32.xlu2 %v3105_v4, %s5067_s30  ;;  %v3438_v4 = vld [vmem:[#allocation6 + $0x2] ss:$8 sm:$0xf] }
 0x780   : > { %3117 = vrot.lane.b32.xlu0 %v3106_v58, %s5067_s30  ;;  %3113 = vrot.lane.b32.xlu1 %v3104_v40, %s5067_s30  ;;  %v3439_v58 = vld [vmem:[#allocation6 + $0x2] ss:$8 sm:$0xf0] }
 0x781   : > { %v6621_v40 = vor.u32 %v3439_v58, %v3438_v4  ;;  %v3671_v4 = vperm.slane %v6610_v5, 3 }
 0x783   : > { %v3442_v54 = vperm.slane %v6621_v40, 0  ;;  %v3448_v47 = vperm.slane %v6621_v40, 6 }
 0x785   : > { %3121 = vrot.lane.b32.xlu2 %v3108_v34, %s5067_s30  ;;  %v3556_v34 = vperm.slane %v6615_v63, 1 }
 0x788   : > { %3123 = vrot.lane.b32.xlu0 %v3109_v62, %s5067_s30  ;;  %3119 = vrot.lane.b32.xlu1 %v3107_v9, %s5067_s30  ;;  %v3325_v62 = vld [vmem:[#allocation6 + $0x1] ss:$8 sm:$0xf] }
 0x789   : > { %v3326_v9 = vld [vmem:[#allocation6 + $0x1] ss:$8 sm:$0xf0] }
 0x78a   : > { %v6627_v21 = vor.u32 %v3326_v9, %v3325_v62  ;;  %v3559_v62 = vperm.slane %v6615_v63, 4 }
 0x78c   : > { %v3329_v52 = vperm.slane %v6627_v21, 0  ;;  %v3331_v10 = vperm.slane %v6627_v21, 2  ;;  %v3335_v39 = vperm.slane %v6627_v21, 6 }
 0x790   : > { %3676 = vrot.lane.b32.xlu0 %v3668_v1, %s5055_s16  ;;  %3125 = vrot.lane.b32.xlu1 %v3110_v20, %s5067_s30  ;;  %v3443_v1 = vperm.slane %v6621_v40, 1  ;;  %v3212_v20 = vld [vmem:[#allocation6] ss:$8 sm:$0xf] }
 0x791   : > { %v6633_v46 = vor.u32 %v3213_v19, %v3212_v20  ;;  %v3673_v20 = vperm.slane %v6610_v5, 5 }
 0x793   : > { %v3217_v58 = vperm.slane %v6633_v46, 1  ;;  %v3219_v9 = vperm.slane %v6633_v46, 3  ;;  %v3223_v51 = vperm.slane %v6633_v46, 7  ;;  %v3222_v27 = vperm.slane %v6633_v46, 6 }
 0x798   : > { %3563 = vrot.lane.b32.xlu0 %v3555_v60, %s5054_s15  ;;  %3678 = vrot.lane.b32.xlu1 %v3669_v30, %s5055_s16  ;;  %v3216_v60 = vperm.slane %v6633_v46, 0  ;;  %v3330_v30 = vperm.slane %v6627_v21, 1 }
 0x7a0   : > { %3450 = vrot.lane.b32.xlu0 %v3442_v54, %s5053_s14  ;;  %3565 = vrot.lane.b32.xlu1 %v3556_v34, %s5054_s15  ;;  %v3332_v54 = vperm.slane %v6627_v21, 3  ;;  %v3558_v34 = vperm.slane %v6615_v63, 3 }
 0x7a8   : > { %3337 = vrot.lane.b32.xlu0 %v3329_v52, %s5052_s9  ;;  %3452 = vrot.lane.b32.xlu1 %v3443_v1, %s5053_s14  ;;  %v3220_v52 = vperm.slane %v6633_v46, 4  ;;  %v3446_v1 = vperm.slane %v6621_v40, 4 }
 0x7b0   : > { %3224 = vrot.lane.b32.xlu0 %v3216_v60, %s5051_s8  ;;  %3339 = vrot.lane.b32.xlu1 %v3330_v30, %s5052_s9 }
 0x7b8   : > { %3682 = vrot.lane.b32.xlu0 %v3671_v4, %s5055_s16  ;;  %3226 = vrot.lane.b32.xlu1 %v3217_v58, %s5051_s8  ;;  %v3560_v58 = vperm.slane %v6615_v63, 5 }
 0x7c0   : > { %3343 = vrot.lane.b32.xlu0 %v3332_v54, %s5052_s9  ;;  %3569 = vrot.lane.b32.xlu1 %v3558_v34, %s5054_s15 }
 0x7c2   : > { %v6656_v19 = vpop.permute.xlu2 %4831 }
 0x7c3   : > { %v7601_v30 = vunpack.i.l.bf16 %v6656_v19 }
 0x7c8   : > { %3571 = vrot.lane.b32.xlu0 %v3559_v62, %s5054_s15  ;;  %3230 = vrot.lane.b32.xlu1 %v3219_v9, %s5051_s8  ;;  %v7604_v62 = vunpack.i.h.bf16 %v6656_v19 }
 0x7d0   : > { %3232 = vrot.lane.b32.xlu0 %v3220_v52, %s5051_s8  ;;  %3458 = vrot.lane.b32.xlu1 %v3446_v1, %s5053_s14  ;;  %v3447_v52 = vperm.slane %v6621_v40, 5 }
 0x7d8   : > { %3686 = vrot.lane.b32.xlu1 %v3673_v20, %s5055_s16  ;;  %v3065_v20 = vpop.permute.xlu2 %3064 }
 0x7da   : > { %v6659_v60 = vpop.permute.xlu1 %4826 }
 0x7db   : > { %v7602_v4 = vunpack.i.h.bf16 %v6659_v60 }
 0x7dd   : > { %v6669_v54 = vsel %vm2855_vm2, %v7602_v4, %v7601_v30  ;;  %v3334_v4 = vperm.slane %v6627_v21, 5 }
 0x7e0   : > { %3573 = vrot.lane.b32.xlu1 %v3560_v58, %s5054_s15  ;;  %v6703_v33 = vpop.permute.xlu2 %3115 }
 0x7e2   : > { %v6672_v34 = vpop.permute.xlu0 %4836 }
 0x7e3   : > { %7781 = vst [vmem:[#allocation59_spill] sm:$0xff] %v6672_v34  ;;  %v7603_v9 = vunpack.i.l.bf16 %v6672_v34  ;;  %v7606_v58 = vunpack.i.h.bf16 %v6672_v34  ;;  %v3449_v34 = vperm.slane %v6621_v40, 7 }
 0x7e5   : > { %v6682_v1 = vsel %vm2855_vm2, %v7604_v62, %v7603_v9 }
 0x7e8   : > { %3460 = vrot.lane.b32.xlu1 %v3447_v52, %s5053_s14 }
 0x7ea   : > { %v6685_v50 = vpop.permute.xlu1 %4841  ;;  %v3112_v62 = vpop.permute.xlu0 %3111 }
 0x7eb   : > { %7782 = vst [vmem:[#allocation53_spill] sm:$0xff] %v6685_v50  ;;  %v7609_v8 = vunpack.i.h.bf16 %v6685_v50  ;;  %v7605_v30 = vunpack.i.l.bf16 %v6685_v50  ;;  %v3143_v0 = vmul.f32 %v3112_v62, %v5326_v12 }
 0x7ed   : > { %v6696_v9 = vsel %vm2855_vm2, %v7606_v58, %v7605_v30  ;;  %v6701_v52 = vsel %vm2855_vm2, %v7609_v8, %v3065_v20  ;;  %v3221_v58 = vperm.slane %v6633_v46, 5  ;;  %v6717_v20 = vpop.permute.xlu2 %3121 }
 0x7ee   : > { %7783 = vst [vmem:[#allocation50_spill] sm:$0xff] %v6696_v9 }
 0x7ef   : > { %7784 = vst [vmem:[#allocation48_spill] sm:$0xff] %v6701_v52 }
 0x7f0   : > { %3347 = vrot.lane.b32.xlu1 %v3334_v4, %s5052_s9 }
 0x7f2   : > { %v6706_v22 = vpop.permute.xlu1 %3113  ;;  %v6713_v9 = vpop.permute.xlu0 %3117 }
 0x7f3   : > { %v3127_v23 = vsel %vm2793_vm15, %v3112_v62, %v6706_v22  ;;  %v3129_v55 = vsel %vm2793_vm15, %v6703_v33, %v6713_v9 }
 0x7f4   : > { %v3144_v30 = vmul.f32 %v3127_v23, %v5391_v37 }
 0x7f6   : > { %v4845_v50 = vpack.i.bf16 %v3144_v30, %v3143_v0  ;;  %v3675_v30 = vperm.slane %v6610_v5, 7 }
 0x7f8   : > { %3234 = vrot.lane.b32.xlu1 %v3221_v58, %s5051_s8  ;;  %4846 = vrot.lane.b32.xlu2 %v4845_v50, %s5066_s29  ;;  %v3670_v58 = vperm.slane %v6610_v5, 2  ;;  %v3557_v50 = vperm.slane %v6615_v63, 2 }
 0x7fa   : > { %v3120_v4 = vpop.permute.xlu1 %3119  ;;  %v6735_v52 = vpop.permute.xlu0 %3123 }
 0x7fb   : > { %v3130_v8 = vsel %vm2793_vm15, %v6713_v9, %v3120_v4  ;;  %v3131_v62 = vsel %vm2793_vm15, %v3120_v4, %v6717_v20 }
 0x7fc   : > { %v6724_v23 = vmul.f32 %v3130_v8, %v7733_v17  ;;  %v6727_v0 = vmul.f32 %v3131_v62, %v5494_v48 }
 0x800   : > { %3690 = vrot.lane.b32.xlu1 %v3675_v30, %s5055_s16  ;;  %3680 = vrot.lane.b32.xlu2 %v3670_v58, %s5055_s16  ;;  %v3218_v30 = vperm.slane %v6633_v46, 2  ;;  %v3146_v46 = vmul.f32 %v3129_v55, %v5414_v61 }
 0x802   : > { %v3126_v4 = vpop.permute.xlu1 %3125 }
 0x803   : > { %v3133_v8 = vsel %vm2793_vm15, %v6735_v52, %v3126_v4  ;;  %v6740_v62 = vmul.f32 %v3126_v4, %v6593_v42  ;;  %v3444_v4 = vperm.slane %v6621_v40, 2 }
 0x804   : > { %v6743_v6 = vmul.f32 %v3133_v8, %v5569_v59 }
 0x808   : > { %3464 = vrot.lane.b32.xlu1 %v3449_v34, %s5053_s14  ;;  %3567 = vrot.lane.b32.xlu2 %v3557_v50, %s5054_s15  ;;  %v3445_v50 = vperm.slane %v6621_v40, 3 }
 0x80a   : > { %v3679_v58 = vpop.permute.xlu1 %3678 }
 0x810   : > { %3238 = vrot.lane.b32.xlu1 %v3223_v51, %s5051_s8  ;;  %3454 = vrot.lane.b32.xlu2 %v3444_v4, %s5053_s14  ;;  %v3672_v51 = vperm.slane %v6610_v5, 4  ;;  %v6766_v4 = vpop.permute.xlu0 %3676 }
 0x811   : > { %v3692_v18 = vsel %vm1490_vm4, %v6766_v4, %v3679_v58 }
 0x812   : > { %v3566_v8 = vpop.permute.xlu1 %3565  ;;  %v3709_v40 = vmul.f32 %v3692_v18, %v5391_v37 }
 0x818   : > { %3341 = vrot.lane.b32.xlu2 %v3331_v10, %s5052_s9  ;;  %v3333_v10 = vperm.slane %v6627_v21, 4  ;;  %v3564_v15 = vpop.permute.xlu0 %3563 }
 0x81a   : > { %v3453_v7 = vpop.permute.xlu1 %3452 }
 0x820   : > { %3228 = vrot.lane.b32.xlu2 %v3218_v30, %s5051_s8  ;;  %v3674_v30 = vperm.slane %v6610_v5, 6 }
 0x822   : > { %v6759_v34 = vpop.permute.xlu1 %3339 }
 0x828   : > { %3456 = vrot.lane.b32.xlu2 %v3445_v50, %s5053_s14  ;;  %v6777_v50 = vpop.permute.xlu0 %3450 }
 0x82a   : > { %v6763_v14 = vpop.permute.xlu1 %3226 }
 0x830   : > { %3684 = vrot.lane.b32.xlu2 %v3672_v51, %s5055_s16  ;;  %v3338_v43 = vpop.permute.xlu0 %3337 }
 0x832   : > { %v6770_v45 = vpop.permute.xlu1 %3569 }
 0x838   : > { %3345 = vrot.lane.b32.xlu2 %v3333_v10, %s5052_s9 }
 0x83a   : > { %v6774_v24 = vpop.permute.xlu1 %3230 }
 0x840   : > { %3688 = vrot.lane.b32.xlu2 %v3674_v30, %s5055_s16  ;;  %v3225_v30 = vpop.permute.xlu0 %3224  ;;  %s4433_s16 = sshll.u32 %s7894_s22, 6 }
 0x842   : > { %v6781_v51 = vpop.permute.xlu1 %3458 }
 0x848   : > { %3575 = vrot.lane.b32.xlu2 %v3561_v35, %s5054_s15  ;;  %v6808_v11 = vpop.permute.xlu0 %3682 }
 0x84a   : > { %v6787_v5 = vpop.permute.xlu1 %3686 }
 0x850   : > { %3462 = vrot.lane.b32.xlu2 %v3448_v47, %s5053_s14 }
 0x852   : > { %v6785_v10 = vpop.permute.xlu2 %4846  ;;  %v6800_v49 = vpop.permute.xlu1 %3573 }
 0x858   : > { %3349 = vrot.lane.b32.xlu2 %v3335_v39, %s5052_s9  ;;  %v3128_v39 = vsel %vm2793_vm15, %v6706_v22, %v6703_v33 }
 0x859   : > { %v3145_v18 = vmul.f32 %v3128_v39, %v5389_v26 }
 0x85a   : > { %v6793_v35 = vpop.permute.xlu2 %3680  ;;  %v6818_v13 = vpop.permute.xlu1 %3460 }
 0x85b   : > { %v3693_v53 = vsel %vm1490_vm4, %v3679_v58, %v6793_v35  ;;  %v4875_v33 = vpack.i.bf16 %v3146_v46, %v3145_v18  ;;  %v3336_v18 = vperm.slane %v6627_v21, 7 }
 0x85c   : > { %v3710_v47 = vmul.f32 %v3693_v53, %v5389_v26  ;;  %v3579_v53 = vsel %vm1374_vm3, %v3564_v15, %v3566_v8 }
 0x85d   : > { %v3596_v22 = vmul.f32 %v3579_v53, %v5391_v37 }
 0x85e   : > { %v4850_v36 = vpack.i.bf16 %v3710_v47, %v3709_v40 }
 0x860   : > { %3236 = vrot.lane.b32.xlu2 %v3222_v27, %s5051_s8  ;;  %4851 = vrot.lane.b32.xlu0 %v4850_v36, %s5062_s25  ;;  %v3466_v36 = vsel %vm1258_vm1, %v6777_v50, %v3453_v7  ;;  %v6824_v27 = vpop.permute.xlu0 %3343 }
 0x861   : > { %v3483_v39 = vmul.f32 %v3466_v36, %v5391_v37  ;;  %v3369_v36 = vmul.f32 %v3338_v43, %v5326_v12 }
 0x862   : > { %v3568_v58 = vpop.permute.xlu2 %3567 }
 0x863   : > { %v3580_v40 = vsel %vm1374_vm3, %v3566_v8, %v3568_v58 }
 0x864   : > { %v3597_v47 = vmul.f32 %v3580_v40, %v5389_v26  ;;  %v3581_v40 = vsel %vm1374_vm3, %v3568_v58, %v6770_v45 }
 0x866   : > { %v4855_v9 = vpack.i.bf16 %v3597_v47, %v3596_v22  ;;  %v3353_v22 = vsel %vm1142_vm0, %v3338_v43, %v6759_v34  ;;  %v6839_v47 = vpop.permute.xlu1 %3347  ;;  %v3240_v43 = vsel %vm7785_vm12, %v3225_v30, %v6763_v14 }
 0x868   : > { %4876 = vrot.lane.b32.xlu2 %v4875_v33, %s5066_s29  ;;  %4856 = vrot.lane.b32.xlu0 %v4855_v9, %s5061_s24  ;;  %v3595_v9 = vmul.f32 %v3564_v15, %v5326_v12 }
 0x86a   : > { %v6826_v55 = vpop.permute.xlu2 %3454 }
 0x86b   : > { %v3467_v8 = vsel %vm1258_vm1, %v3453_v7, %v6826_v55  ;;  %v3598_v7 = vmul.f32 %v3581_v40, %v5414_v61 }
 0x86c   : > { %v3484_v53 = vmul.f32 %v3467_v8, %v5389_v26  ;;  %v3370_v8 = vmul.f32 %v3353_v22, %v5391_v37 }
 0x86e   : > { %v4860_v46 = vpack.i.bf16 %v3484_v53, %v3483_v39  ;;  %v3572_v39 = vpop.permute.xlu0 %3571 }
 0x86f   : > { %v3583_v15 = vsel %vm1374_vm3, %v3572_v39, %v6800_v49 }
 0x870   : > { %3351 = vrot.lane.b32.xlu2 %v3336_v18, %s5052_s9  ;;  %4861 = vrot.lane.b32.xlu0 %v4860_v46, %s5058_s20  ;;  %v4885_v46 = vpack.i.bf16 %v3598_v7, %v3595_v9  ;;  %v3600_v22 = vmul.f32 %v3583_v15, %v5494_v48 }
 0x872   : > { %v3342_v33 = vpop.permute.xlu2 %3341 }
 0x873   : > { %v3355_v21 = vsel %vm1142_vm0, %v3342_v33, %v6824_v27  ;;  %v3354_v58 = vsel %vm1142_vm0, %v6759_v34, %v3342_v33  ;;  %v3582_v34 = vsel %vm1374_vm3, %v6770_v45, %v3572_v39  ;;  %v3256_v33 = vmul.f32 %v3225_v30, %v5326_v12 }
 0x874   : > { %v3372_v53 = vmul.f32 %v3355_v21, %v5414_v61  ;;  %v3371_v18 = vmul.f32 %v3354_v58, %v5389_v26  ;;  %v3257_v58 = vmul.f32 %v3240_v43, %v5391_v37 }
 0x876   : > { %v4895_v40 = vpack.i.bf16 %v3372_v53, %v3369_v36  ;;  %v4865_v2 = vpack.i.bf16 %v3371_v18, %v3370_v8  ;;  %v3599_v36 = vmul.f32 %v3582_v34, %v7733_v17  ;;  %v6868_v8 = vpop.permute.xlu1 %3234  ;;  %v3233_v39 = vpop.permute.xlu0 %3232 }
 0x878   : > { %4886 = vrot.lane.b32.xlu2 %v4885_v46, %s5061_s24  ;;  %4896 = vrot.lane.b32.xlu1 %v4895_v40, %s5059_s21  ;;  %v4910_v53 = vpack.i.bf16 %v3600_v22, %v3599_v36  ;;  %v3244_v46 = vsel %vm7785_vm12, %v3233_v39, %v6868_v8  ;;  %v3470_v40 = vsel %vm1258_vm1, %v6781_v51, %v6818_v13 }
 0x879   : > { %4866 = vrot.lane.b32.xlu0 %v4865_v2, %s5059_s21  ;;  %v3261_v15 = vmul.f32 %v3244_v46, %v5494_v48 }
 0x87a   : > { %v3229_v7 = vpop.permute.xlu2 %3228 }
 0x87b   : > { %v3242_v9 = vsel %vm7786_vm13, %v3229_v7, %v6774_v24  ;;  %v3241_v21 = vsel %vm7787_vm14, %v6763_v14, %v3229_v7  ;;  %vm7788_vm13 = vmmov %vm7785_vm12  ;;  %v3487_v7 = vmul.f32 %v3470_v40, %v5494_v48 }
 0x87c   : > { %v3259_v45 = vmul.f32 %v3242_v9, %v5414_v61  ;;  %v3258_v2 = vmul.f32 %v3241_v21, %v5389_v26  ;;  %v3243_v14 = vsel %vm7788_vm13, %v6774_v24, %v3233_v39  ;;  %v3562_v24 = vperm.slane %v6615_v63, 7  ;;  %vm7792_vm14 = vmmov %vm7785_vm12 }
 0x87d   : > { %v3260_v22 = vmul.f32 %v3243_v14, %v7733_v17 }
 0x87e   : > { %v4900_v18 = vpack.i.bf16 %v3259_v45, %v3256_v33  ;;  %v4870_v30 = vpack.i.bf16 %v3258_v2, %v3257_v58  ;;  %v3694_v58 = vsel %vm1490_vm4, %v6793_v35, %v6808_v11  ;;  %v3708_v45 = vmul.f32 %v6766_v4, %v5326_v12  ;;  %v3691_v40 = vpop.permute.xlu1 %3690 }
 0x87f   : > { %v4925_v9 = vpack.i.bf16 %v3261_v15, %v3260_v22  ;;  %v3711_v36 = vmul.f32 %v3694_v58, %v5414_v61  ;;  %v7789_v35 = vpack.i.bf16 %v6727_v0, %v6724_v23 }
 0x880   : > { %4911 = vrot.lane.b32.xlu1 %v4910_v53, %s5061_s24  ;;  %4901 = vrot.lane.b32.xlu2 %v4900_v18, %s5060_s23  ;;  %v3482_v18 = vmul.f32 %v6777_v50, %v5326_v12 }
 0x881   : > { %4871 = vrot.lane.b32.xlu0 %v4870_v30, %s5060_s23  ;;  %v4880_v2 = vpack.i.bf16 %v3711_v36, %v3708_v45 }
 0x882   : > { %v3457_v43 = vpop.permute.xlu2 %3456 }
 0x883   : > { %v3469_v34 = vsel %vm1258_vm1, %v3457_v43, %v6781_v51  ;;  %v3468_v63 = vsel %vm1258_vm1, %v6826_v55, %v3457_v43 }
 0x884   : > { %v3486_v33 = vmul.f32 %v3469_v34, %v7733_v17  ;;  %v3485_v53 = vmul.f32 %v3468_v63, %v5414_v61 }
 0x886   : > { %v4915_v21 = vpack.i.bf16 %v3487_v7, %v3486_v33  ;;  %v4890_v30 = vpack.i.bf16 %v3485_v53, %v3482_v18  ;;  %v7790_v18 = vpack.i.bf16 %v6740_v62, %v6743_v6  ;;  %v3132_v6 = vsel %vm2793_vm15, %v6717_v20, %v6735_v52  ;;  %vm7793_vm15 = vmmov %vm7785_vm12 }
 0x888   : > { %4926 = vrot.lane.b32.xlu1 %v4925_v9, %s5060_s23  ;;  %4916 = vrot.lane.b32.xlu2 %v4915_v21, %s5058_s20 }
 0x889   : > { %3577 = vrot.lane.b32.xlu0 %v3562_v24, %s5054_s15 }
 0x88a   : > { %v3685_v51 = vpop.permute.xlu2 %3684 }
 0x88b   : > { %v3695_v4 = vsel %vm1490_vm4, %v6808_v11, %v3685_v51  ;;  %v3696_v55 = vsel %vm1490_vm4, %v3685_v51, %v6787_v5 }
 0x88c   : > { %v3712_v23 = vmul.f32 %v3695_v4, %v7733_v17  ;;  %v3713_v0 = vmul.f32 %v3696_v55, %v5494_v48 }
 0x88e   : > { %v4905_v14 = vpack.i.bf16 %v3713_v0, %v3712_v23 }
 0x890   : > { %4931 = vrot.lane.b32.xlu2 %v7789_v35, %s5066_s29  ;;  %v3716_v35 = vmul.f32 %v3691_v40, %v6593_v42 }
 0x891   : > { %4881 = vrot.lane.b32.xlu0 %v4880_v2, %s5062_s25 }
 0x892   : > { %v3346_v39 = vpop.permute.xlu2 %3345 }
 0x893   : > { %v3356_v15 = vsel %vm1142_vm0, %v6824_v27, %v3346_v39  ;;  %v3357_v50 = vsel %vm1142_vm0, %v3346_v39, %v6839_v47  ;;  %v3465_v27 = vpop.permute.xlu1 %3464 }
 0x894   : > { %v3373_v43 = vmul.f32 %v3356_v15, %v7733_v17  ;;  %v3374_v34 = vmul.f32 %v3357_v50, %v5494_v48  ;;  %v3149_v15 = vmul.f32 %v3132_v6, %v5500_v3 }
 0x896   : > { %v4920_v22 = vpack.i.bf16 %v3374_v34, %v3373_v43 }
 0x899   : > { %4891 = vrot.lane.b32.xlu0 %v4890_v30, %s5058_s20 }
 0x89a   : > { %v3689_v46 = vpop.permute.xlu2 %3688 }
 0x89b   : > { %v3697_v7 = vsel %vm1490_vm4, %v6787_v5, %v3689_v46  ;;  %v3698_v33 = vsel %vm1490_vm4, %v3689_v46, %v3691_v40 }
 0x89c   : > { %v3714_v9 = vmul.f32 %v3697_v7, %v5500_v3  ;;  %v3715_v21 = vmul.f32 %v3698_v33, %v5569_v59 }
 0x89e   : > { %v4935_v2 = vpack.i.bf16 %v3715_v21, %v3714_v9 }
 0x8a1   : > { %4906 = vrot.lane.b32.xlu0 %v4905_v14, %s5062_s25 }
 0x8a2   : > { %v6920_v11 = vpop.permute.xlu2 %3575 }
 0x8a9   : > { %4921 = vrot.lane.b32.xlu0 %v4920_v22, %s5059_s21 }
 0x8aa   : > { %v3463_v24 = vpop.permute.xlu2 %3462 }
 0x8ab   : > { %v3471_v58 = vsel %vm1258_vm1, %v6818_v13, %v3463_v24  ;;  %v3472_v51 = vsel %vm1258_vm1, %v3463_v24, %v3465_v27  ;;  %v3490_v13 = vmul.f32 %v3465_v27, %v6593_v42  ;;  %vm3976_vm1 = vcmask 588800  }
 0x8ac   : > { %v3488_v36 = vmul.f32 %v3471_v58, %v5500_v3  ;;  %v3489_v45 = vmul.f32 %v3472_v51, %v5569_v59  ;;  %v2941_v51 = vld [vmem:[#allocation6 + $0x2] ss:$8 sm:$0xf] }
 0x8ae   : > { %v4945_v5 = vpack.i.bf16 %v3489_v45, %v3488_v36  ;;  %v2942_v36 = vld [vmem:[#allocation6 + $0x2] ss:$8 sm:$0xf0] }
 0x8b0   : > { %4946 = vrot.lane.b32.xlu2 %v4945_v5, %s5058_s20 }
 0x8b1   : > { %4936 = vrot.lane.b32.xlu0 %v4935_v2, %s5062_s25 }
 0x8b2   : > { %v3350_v63 = vpop.permute.xlu2 %3349 }
 0x8b3   : > { %v3358_v30 = vsel %vm1142_vm0, %v6839_v47, %v3350_v63 }
 0x8b4   : > { %v3375_v46 = vmul.f32 %v3358_v30, %v5500_v3 }
 0x8b8   : > { %3742 = vrot.lane.b32.xlu2 %v3716_v35, %s5062_s25  ;;  %v6999_v35 = vor.u32 %v2942_v36, %v2941_v51 }
 0x8ba   : > { %v6939_v39 = vpop.permute.xlu2 %3236  ;;  %v2946_v30 = vperm.slane %v6999_v35, 1 }
 0x8c0   : > { %3516 = vrot.lane.b32.xlu2 %v3490_v13, %s5058_s20  ;;  %v4849_v13 = vunpack.i.h.bf16 %v6785_v10  ;;  %s7492_s20 = scalar_lea.vmem %s7510_s5, %s4433_s16 }
 0x8c2   : > { %v6943_v53 = vpop.permute.xlu2 %4876 }
 0x8c3   : > { %v4878_v5 = vunpack.i.l.bf16 %v6943_v53 }
 0x8c8   : > { %4961 = vrot.lane.b32.xlu2 %v7790_v18, %s5066_s29 }
 0x8ca   : > { %v3352_v4 = vpop.permute.xlu2 %3351 }
 0x8cb   : > { %v3359_v55 = vsel %vm1142_vm0, %v3350_v63, %v3352_v4  ;;  %v3377_v20 = vmul.f32 %v3352_v4, %v6593_v42  ;;  %vm7791_vm0 = vcmask 1031168  }
 0x8cc   : > { %v3376_v23 = vmul.f32 %v3359_v55, %v5569_v59  ;;  %v3180_v4 = vsel %vm7791_vm0, %v4849_v13, %v4878_v5  ;;  %v3584_v55 = vsel %vm1374_vm3, %v6800_v49, %v6920_v11  ;;  %v7027_v49 = vpop.permute.xlu1 %3238  ;;  %vm7794_vm12 = vmmov %vm7791_vm0 }
 0x8cd   : > { %v3601_v6 = vmul.f32 %v3584_v55, %v5500_v3  ;;  %vm7795_vm13 = vmmov %vm7791_vm0 }
 0x8ce   : > { %v4950_v0 = vpack.i.bf16 %v3376_v23, %v3375_v46  ;;  %v2962_v23 = vmul.f32 %v2946_v30, %v5391_v37  ;;  %v3245_v37 = vsel %vm7792_vm14, %v6868_v8, %v6939_v39  ;;  %vm7817_vm14 = vcmask 523264  }
 0x8d0   : > { %4951 = vrot.lane.b32.xlu0 %v4950_v0, %s5059_s21 }
 0x8d2   : > { %v6955_v14 = vpop.permute.xlu0 %4851 }
 0x8d3   : > { %v4854_v62 = vunpack.i.h.bf16 %v6955_v14  ;;  %v4853_v47 = vunpack.i.l.bf16 %v6955_v14 }
 0x8d5   : > { %v3745_v40 = vsel %vm1543_vm11, %v4853_v47, %v4854_v62 }
 0x8d6   : > { %4047 = vmatpush.msrb.mxu3 %v3745_v40 }
 0x8d8   : > { %3173 = vrot.lane.b32.xlu0 %v3149_v15, %s5066_s29  ;;  %v7025_v15 = vld [vmem:[%s7507_s2 + $0x8] sm:$0xff] }
 0x8da   : > { %v6967_v50 = vpop.permute.xlu0 %4856 }
 0x8db   : > { %v4859_v43 = vunpack.i.h.bf16 %v6967_v50  ;;  %v4858_v34 = vunpack.i.l.bf16 %v6967_v50 }
 0x8dd   : > { %v3632_v52 = vsel %vm1427_vm8, %v4858_v34, %v4859_v43 }
 0x8de   : > { %4048 = vmatpush.msrb.mxu3 %v3632_v52  ;;  %v7029_v52 = vpop.permute.xlu2 %4886 }
 0x8df   : > { %v4888_v36 = vunpack.i.l.bf16 %v7029_v52 }
 0x8e0   : > { %3403 = vrot.lane.b32.xlu0 %v3377_v20, %s5059_s21  ;;  %v3262_v20 = vmul.f32 %v3245_v37, %v5500_v3 }
 0x8e2   : > { %v6976_v22 = vpop.permute.xlu0 %4861 }
 0x8e3   : > { %v4864_v7 = vunpack.i.h.bf16 %v6976_v22  ;;  %v4863_v33 = vunpack.i.l.bf16 %v6976_v22 }
 0x8e5   : > { %v3519_v27 = vsel %vm1311_vm10, %v4863_v33, %v4864_v7 }
 0x8e6   : > { %4049 = vmatpush.msrb.mxu3 %v3519_v27  ;;  %v7051_v55 = vpop.permute.xlu2 %4901 }
 0x8e7   : > { %v4904_v22 = vunpack.i.h.bf16 %v7051_v55 }
 0x8eb   : > { %v6985_v24 = vpop.permute.xlu0 %4866 }
 0x8ec   : > { %v4869_v9 = vunpack.i.h.bf16 %v6985_v24  ;;  %v4868_v21 = vunpack.i.l.bf16 %v6985_v24  ;;  %v2945_v24 = vperm.slane %v6999_v35, 0 }
 0x8ee   : > { %v3406_v58 = vsel %vm1195_vm9, %v4868_v21, %v4869_v9 }
 0x8ef   : > { %4050 = vmatpush.msrb.mxu3 %v3406_v58 }
 0x8f3   : > { %v6994_v45 = vpop.permute.xlu0 %4871 }
 0x8f4   : > { %v4874_v2 = vunpack.i.h.bf16 %v6994_v45  ;;  %v4873_v63 = vunpack.i.l.bf16 %v6994_v45 }
 0x8f6   : > { %v3293_v18 = vsel %vm1079_vm7, %v4873_v63, %v4874_v2 }
 0x8f7   : > { %4051 = vmatpush.msrb.mxu3 %v3293_v18  ;;  %v7044_v18 = vpop.permute.xlu1 %4896 }
 0x8f9   : > { %4052 = vmatpush.msrb.mxu3 %v3180_v4  ;;  %v4889_v4 = vunpack.i.h.bf16 %v7029_v52 }
 0x8fb   : > { %v3578_v46 = vpop.permute.xlu0 %3577  ;;  %4053 = vmatpush.msrb.mxu3 %v6669_v54 }
 0x8fc   : > { %v3585_v0 = vsel %vm1374_vm3, %v6920_v11, %v3578_v46  ;;  %v3246_v11 = vsel %vm7793_vm15, %v6939_v39, %v7027_v49  ;;  %v3603_v50 = vmul.f32 %v3578_v46, %v6593_v42  ;;  %v4828_v46 = vunpack.i.l.bf16 %v6659_v60 }
 0x8fd   : > { %v3602_v40 = vmul.f32 %v3585_v0, %v5569_v59  ;;  %4054 = vmatpush.msrb.mxu3 %v2962_v23  ;;  %v3263_v27 = vmul.f32 %v3246_v11, %v5569_v59  ;;  %v3631_v23 = vsel %vm1427_vm8, %v4888_v36, %v4858_v34  ;;  %v2947_v36 = vperm.slane %v6999_v35, 2 }
 0x8fe   : > { %vm7822_vm15 = vcmask 531456  }
 0x8ff   : > { %v4940_v54 = vpack.i.bf16 %v3602_v40, %v3601_v6  ;;  %4055 = vmatpush.msrb.mxu3 %v6563_v44  ;;  %v4955_v30 = vpack.i.bf16 %v3263_v27, %v3262_v20  ;;  %v4899_v40 = vunpack.i.h.bf16 %v7044_v18  ;;  %v7069_v37 = vpop.permute.xlu1 %4911  ;;  %v7081_v20 = vpop.permute.xlu2 %4916 }
 0x900   : > { %4423 = vmatmul.msk.f32.vlgmr.msrb.gmra.mxu3 %vm3976_vm1, %v7025_v15 }
 0x901   : > { %4941 = vrot.lane.b32.xlu1 %v4940_v54, %s5061_s24  ;;  %v4903_v54 = vunpack.i.l.bf16 %v7051_v55  ;;  %v4918_v55 = vunpack.i.l.bf16 %v7081_v20 }
 0x903   : > { %v4882_v58 = vpop.permute.xlu0 %4881 }
 0x904   : > { %v4884_v51 = vunpack.i.h.bf16 %v4882_v58  ;;  %v4883_v44 = vunpack.i.l.bf16 %v4882_v58  ;;  %v3294_v58 = vsel %vm1079_vm7, %v4874_v2, %v4904_v22  ;;  %v7796_v2 = vunpack.i.h.bf16 %v6659_v60 }
 0x905   : > { %v2963_v60 = vmul.f32 %v2947_v36, %v5389_v26  ;;  %v7813_v36 = vld [vmem:[#allocation43_spill] sm:$0xff] }
 0x906   : > { %v3744_v8 = vsel %vm1543_vm11, %v4883_v44, %v4853_v47  ;;  %v3746_v39 = vsel %vm1543_vm11, %v4854_v62, %v4884_v51  ;;  %v3633_v47 = vsel %vm1427_vm8, %v4859_v43, %v4889_v4  ;;  %v4898_v62 = vunpack.i.l.bf16 %v7044_v18 }
 0x907   : > { %4007 = vmatpush.msrb.mxu1 %v3744_v8  ;;  %4087 = vmatpush.msra.mxu3 %v3746_v39  ;;  %v4848_v43 = vunpack.i.l.bf16 %v6785_v10  ;;  %v3066_v18 = vsel %vm2855_vm2, %v4828_v46, %v7796_v2  ;;  %v7797_v8 = vunpack.i.h.bf16 %v6656_v19  ;;  %v7798_v39 = vunpack.i.l.bf16 %v6656_v19  ;;  %v7131_v26 = vpop.permute.xlu2 %4931  ;;  %v7808_v46 = vld [vmem:[#allocation49_spill] sm:$0xff]  ;;  %v7815_v2 = vld [vmem:[#allocation71_spill] sm:$0xff] }
 0x908   : > { %v3405_v11 = vsel %vm1195_vm9, %v4898_v62, %v4868_v21  ;;  %v3292_v21 = vsel %vm1079_vm7, %v4903_v54, %v4873_v63  ;;  %v4913_v63 = vunpack.i.l.bf16 %v7069_v37 }
 0x909   : > { %4956 = vrot.lane.b32.xlu1 %v4955_v30, %s5060_s23  ;;  %4008 = vmatpush.msrb.mxu1 %v3631_v23  ;;  %v3179_v44 = vsel %vm7794_vm12, %v4848_v43, %v4849_v13  ;;  %v3264_v13 = vmul.f32 %v7027_v49, %v6593_v42  ;;  %v3068_v30 = vsel %vm2855_vm2, %v7798_v39, %v7797_v8  ;;  %v7123_v49 = vpop.permute.xlu1 %4926  ;;  %v4933_v23 = vunpack.i.l.bf16 %v7131_v26  ;;  %v7819_v8 = vld [vmem:[#allocation24_spill] sm:$0xff] }
 0x90a   : > { %4088 = vmatpush.msra.mxu3 %v3633_v47  ;;  %v3634_v42 = vsel %vm1427_vm8, %v4889_v4, %v4913_v63  ;;  %v4928_v4 = vunpack.i.l.bf16 %v7123_v49  ;;  %v7800_v47 = vld [vmem:[#allocation66_spill] sm:$0xff]  ;;  %v7805_v43 = vunpack.i.l.bf16 %v5990_v56  ;;  %v4574_v39 = vunpack.i.h.bf16 %v7819_v8 }
 0x90b   : > { %v4892_v14 = vpop.permute.xlu0 %4891  ;;  %vm7828_vm12 = vcmask 539648  }
 0x90c   : > { %v4894_v0 = vunpack.i.h.bf16 %v4892_v14  ;;  %v4893_v6 = vunpack.i.l.bf16 %v4892_v14  ;;  %v7802_v14 = vld [vmem:[#allocation60_spill] sm:$0xff]  ;;  %v3295_v62 = vsel %vm1079_vm7, %v4904_v22, %v4928_v4  ;;  %v4659_v22 = vunpack.i.h.bf16 %v5846_v38 }
 0x90e   : > { %v3518_v52 = vsel %vm1311_vm10, %v4893_v6, %v4863_v33  ;;  %v3520_v34 = vsel %vm1311_vm10, %v4864_v7, %v4894_v0  ;;  %v4879_v33 = vunpack.i.h.bf16 %v6943_v53  ;;  %v3407_v7 = vsel %vm1195_vm9, %v4869_v9, %v4899_v40 }
 0x90f   : > { %4009 = vmatpush.msrb.mxu1 %v3518_v52  ;;  %4089 = vmatpush.msra.mxu3 %v3520_v34  ;;  %v2948_v6 = vperm.slane %v6999_v35, 3  ;;  %v7804_v52 = vld [vmem:[#allocation57_spill] sm:$0xff] }
 0x910   : > { %v3181_v45 = vsel %vm7795_vm13, %v4878_v5, %v4879_v33  ;;  %v2961_v5 = vmul.f32 %v2945_v24, %v5326_v12  ;;  %v3521_v12 = vsel %vm1311_vm10, %v4894_v0, %v4918_v55  ;;  %v4699_v0 = vunpack.i.h.bf16 %v5929_v16  ;;  %v7810_v24 = vld [vmem:[#allocation47_spill] sm:$0xff]  ;;  %vm7850_vm13 = vmmov %vm7817_vm14 }
 0x911   : > { %3629 = vrot.lane.b32.xlu1 %v3603_v50, %s5061_s24  ;;  %4010 = vmatpush.msrb.mxu1 %v3405_v11  ;;  %v3182_v34 = vsel %vm7791_vm0, %v4879_v33, %v4933_v23  ;;  %v4679_v50 = vunpack.i.h.bf16 %v5896_v57  ;;  %v7806_v11 = vld [vmem:[#allocation52_spill] sm:$0xff]  ;;  %v2964_v33 = vmul.f32 %v2948_v6, %v5414_v61  ;;  %v7812_v61 = vunpack.i.l.bf16 %v5846_v38  ;;  %v7829_v6 = vld [vmem:[#allocation51_spill] sm:$0xff]  ;;  %vm7852_vm0 = vmmov %vm7822_vm15 }
 0x912   : > { %4090 = vmatpush.msra.mxu3 %v3407_v7  ;;  %v7807_v7 = vunpack.i.l.bf16 %v5929_v16  ;;  %v7811_v16 = vld [vmem:[#allocation14_spill] sm:$0xff] }
 0x913   : > { %v7086_v27 = vpop.permute.xlu0 %4906  ;;  %4011 = vmatpush.msrb.mxu1 %v3292_v21  ;;  %v7809_v21 = vunpack.i.l.bf16 %v5896_v57 }
 0x914   : > { %v4908_v9 = vunpack.i.l.bf16 %v7086_v27  ;;  %4091 = vmatpush.msra.mxu3 %v3294_v58  ;;  %v2231_v53 = vsel %vm1490_vm4, %v7807_v7, %v4699_v0 }
 0x915   : > { %4012 = vmatpush.msrb.mxu1 %v3179_v44  ;;  %v2118_v58 = vsel %vm1605_vm5, %v7809_v21, %v4679_v50  ;;  %v2005_v44 = vsel %vm1720_vm6, %v7812_v61, %v4659_v22 }
 0x916   : > { %4092 = vmatpush.msra.mxu3 %v3181_v45  ;;  %v3747_v10 = vsel %vm1543_vm11, %v4884_v51, %v4908_v9  ;;  %v7814_v45 = vld [vmem:[#allocation22_spill] sm:$0xff] }
 0x917   : > { %4013 = vmatpush.msrb.mxu1 %v3066_v18  ;;  %4127 = vmatpush.msra.mxu2 %v3747_v10  ;;  %v4579_v57 = vunpack.i.h.bf16 %v7814_v45  ;;  %v7816_v18 = vunpack.i.l.bf16 %v5785_v25 }
 0x918   : > { %4093 = vmatpush.msra.mxu3 %v3068_v30  ;;  %v7820_v30 = vld [vmem:[#allocation68_spill] sm:$0xff] }
 0x919   : > { %3290 = vrot.lane.b32.xlu1 %v3264_v13, %s5060_s23  ;;  %4014 = vmatpush.msrb.mxu1 %v2961_v5  ;;  %v7818_v13 = vld [vmem:[#allocation40_spill] sm:$0xff]  ;;  %v7821_v5 = vunpack.i.l.bf16 %v5731_v32 }
 0x91a   : > { %4094 = vmatpush.msra.mxu3 %v2963_v60  ;;  %4128 = vmatpush.msra.mxu2 %v3634_v42  ;;  %v7823_v42 = vld [vmem:[#allocation54_spill] sm:$0xff] }
 0x91b   : > { %v7125_v19 = vpop.permute.xlu0 %4921  ;;  %4015 = vmatpush.msrb.mxu1 %v6560_v29 }
 0x91c   : > { %v4923_v51 = vunpack.i.l.bf16 %v7125_v19  ;;  %4095 = vmatpush.msra.mxu3 %v6566_v31  ;;  %4129 = vmatpush.msra.mxu2 %v3521_v12  ;;  %v7799_v31 = vld [vmem:[#allocation65_spill] sm:$0xff]  ;;  %v4723_v12 = vunpack.i.l.bf16 %v7823_v42 }
 0x91d   : > { %4060 = vmatpush.msra.mxu1 %v6280_v41  ;;  %4424 = vmatmul.msk.f32.vlgmr.msra.gmra.mxu3 %vm3976_vm1, %v7025_v15  ;;  %v4719_v41 = vunpack.i.h.bf16 %v5990_v56  ;;  %v4639_v56 = vunpack.i.h.bf16 %v5785_v25 }
 0x91e   : > { %4140 = vmatpush.msrb.mxu3 %v6312_v28  ;;  %v3408_v29 = vsel %vm1195_vm9, %v4899_v40, %v4923_v51  ;;  %4422 = vmatmul.msk.f32.vlgmr.msrb.gmra.mxu1 %vm3976_vm1, %v7025_v15  ;;  %v7801_v28 = vld [vmem:[#allocation61_spill] sm:$0xff]  ;;  %v7803_v40 = vld [vmem:[#allocation56_spill] sm:$0xff] }
 0x91f   : > { %4061 = vmatpush.msra.mxu1 %v7799_v31  ;;  %4130 = vmatpush.msra.mxu2 %v3408_v29  ;;  %v2344_v54 = vsel %vm1374_vm3, %v7805_v43, %v4719_v41  ;;  %v1892_v10 = vsel %vm7817_vm14, %v7816_v18, %v4639_v56  ;;  %v7824_v29 = vld [vmem:[#allocation31_spill] sm:$0xff]  ;;  %v7839_v18 = vld [vmem:[#allocation13_spill] sm:$0xff]  ;;  %vm7854_vm14 = vmmov %vm7828_vm12 }
 0x920   : > { %4141 = vmatpush.msrb.mxu3 %v7800_v47  ;;  %v7825_v31 = vld [vmem:[#allocation23_spill] sm:$0xff] }
 0x921   : > { %4062 = vmatpush.msra.mxu1 %v7801_v28  ;;  %4131 = vmatpush.msra.mxu2 %v3295_v62  ;;  %v4569_v47 = vunpack.i.h.bf16 %v7825_v31  ;;  %v7826_v28 = vld [vmem:[#allocation63_spill] sm:$0xff] }
 0x922   : > { %4142 = vmatpush.msrb.mxu3 %v7802_v14  ;;  %v7827_v14 = vunpack.i.l.bf16 %v7814_v45  ;;  %v7855_v45 = vld [vmem:[#allocation26_spill] sm:$0xff] }
 0x923   : > { %4063 = vmatpush.msra.mxu1 %v7803_v40  ;;  %4132 = vmatpush.msra.mxu2 %v3182_v34  ;;  %v4703_v40 = vunpack.i.l.bf16 %v7829_v6  ;;  %v7831_v34 = vld [vmem:[#allocation17_spill] sm:$0xff] }
 0x924   : > { %4143 = vmatpush.msrb.mxu3 %v7804_v52  ;;  %v1663_v62 = vsel %vm7828_vm12, %v7827_v14, %v4579_v57  ;;  %v7830_v52 = vld [vmem:[#allocation19_spill] sm:$0xff]  ;;  %v4564_v43 = vunpack.i.h.bf16 %v7831_v34  ;;  %v7843_v14 = vld [vmem:[#allocation16_spill] sm:$0xff] }
 0x925   : > { %4064 = vmatpush.msra.mxu1 %v7806_v11  ;;  %4133 = vmatpush.msra.mxu2 %v6682_v1  ;;  %v4619_v1 = vunpack.i.h.bf16 %v5731_v32  ;;  %v7833_v11 = vunpack.i.l.bf16 %v7819_v8 }
 0x926   : > { %4144 = vmatpush.msrb.mxu3 %v2344_v54  ;;  %v7832_v54 = vld [vmem:[#allocation58_spill] sm:$0xff] }
 0x927   : > { %4065 = vmatpush.msra.mxu1 %v7808_v46  ;;  %4134 = vmatpush.msra.mxu2 %v2964_v33  ;;  %v1778_v60 = vsel %vm7822_vm15, %v7821_v5, %v4619_v1  ;;  %v1548_v7 = vsel %vm1543_vm11, %v7833_v11, %v4574_v39  ;;  %v2345_v33 = vsel %vm1374_vm3, %v4719_v41, %v4723_v12  ;;  %v7835_v46 = vld [vmem:[#allocation21_spill] sm:$0xff]  ;;  %v7845_v11 = vld [vmem:[#allocation32_spill] sm:$0xff]  ;;  %vm7858_vm15 = vcmask 1031168  }
 0x928   : > { %4145 = vmatpush.msrb.mxu3 %v2231_v53  ;;  %v7834_v53 = vld [vmem:[#allocation18_spill] sm:$0xff]  ;;  %v4559_v21 = vunpack.i.h.bf16 %v7835_v46  ;;  %v2232_v41 = vsel %vm1490_vm4, %v4699_v0, %v4703_v40 }
 0x929   : > { %4066 = vmatpush.msra.mxu1 %v7810_v24  ;;  %4135 = vmatpush.msra.mxu2 %v7811_v16  ;;  %v7837_v16 = vld [vmem:[#allocation45_spill] sm:$0xff] }
 0x92a   : > { %4146 = vmatpush.msrb.mxu3 %v2118_v58  ;;  %v7836_v58 = vunpack.i.l.bf16 %v7825_v31  ;;  %v4663_v61 = vunpack.i.l.bf16 %v7837_v16  ;;  %4425 = vmatmul.msk.f32.vlgmr.msra.gmra.mxu2 %vm3976_vm1, %v7025_v15 }
 0x92b   : > { %4067 = vmatpush.msra.mxu1 %v7813_v36  ;;  %4180 = vmatpush.msrb.mxu2 %v7815_v2  ;;  %v7233_v2 = vpop.permute.xlu0 %4936 }
 0x92c   : > { %4147 = vmatpush.msrb.mxu3 %v2005_v44  ;;  %v1432_v24 = vsel %vm1427_vm8, %v7836_v58, %v4569_v47  ;;  %v7838_v44 = vld [vmem:[#allocation46_spill] sm:$0xff] }
 0x92d   : > { %4068 = vmatpush.msra.mxu1 %v7818_v13  ;;  %4181 = vmatpush.msrb.mxu2 %v7820_v30  ;;  %v4683_v36 = vunpack.i.l.bf16 %v7838_v44  ;;  %v7841_v30 = vunpack.i.l.bf16 %v7831_v34 }
 0x92e   : > { %4148 = vmatpush.msrb.mxu3 %v1892_v10  ;;  %v7840_v10 = vld [vmem:[#allocation20_spill] sm:$0xff] }
 0x92f   : > { %4069 = vmatpush.msra.mxu1 %v7824_v29  ;;  %4182 = vmatpush.msrb.mxu2 %v7826_v28  ;;  %v4554_v13 = vunpack.i.h.bf16 %v7840_v10  ;;  %v1316_v5 = vsel %vm1311_vm10, %v7841_v30, %v4564_v43  ;;  %v4909_v28 = vunpack.i.h.bf16 %v7086_v27  ;;  %v2119_v0 = vsel %vm1605_vm5, %v4679_v50, %v4683_v36 }
 0x930   : > { %4149 = vmatpush.msrb.mxu3 %v1778_v60  ;;  %v7842_v60 = vld [vmem:[#allocation42_spill] sm:$0xff]  ;;  %v2006_v50 = vsel %vm1720_vm6, %v4659_v22, %v4663_v61  ;;  %v7847_v58 = vunpack.i.l.bf16 %v7840_v10  ;;  %v4919_v30 = vunpack.i.h.bf16 %v7081_v20  ;;  %v7865_v10 = vld [vmem:[#allocation64_spill] sm:$0xff] }
 0x931   : > { %4070 = vmatpush.msra.mxu1 %v7830_v52  ;;  %4183 = vmatpush.msrb.mxu2 %v7832_v54  ;;  %v4643_v29 = vunpack.i.l.bf16 %v7842_v60  ;;  %v7844_v52 = vunpack.i.l.bf16 %v7835_v46  ;;  %v3748_v22 = vsel %vm1543_vm11, %v4908_v9, %v4909_v28  ;;  %v7853_v9 = vld [vmem:[#allocation30_spill] sm:$0xff] }
 0x932   : > { %4150 = vmatpush.msrb.mxu3 %v1663_v62  ;;  %v4938_v62 = vunpack.i.l.bf16 %v7233_v2 }
 0x933   : > { %4071 = vmatpush.msra.mxu1 %v7834_v53  ;;  %4184 = vmatpush.msrb.mxu2 %v2345_v33  ;;  %v1200_v54 = vsel %vm1195_vm9, %v7844_v52, %v4559_v21  ;;  %v4914_v53 = vunpack.i.h.bf16 %v7069_v37  ;;  %v7846_v33 = vld [vmem:[#allocation15_spill] sm:$0xff]  ;;  %v1893_v38 = vsel %vm7850_vm13, %v4639_v56, %v4643_v29  ;;  %v4598_v56 = vunpack.i.l.bf16 %v7853_v9 }
 0x934   : > { %4151 = vmatpush.msrb.mxu3 %v1548_v7  ;;  %v4623_v7 = vunpack.i.l.bf16 %v7845_v11 }
 0x935   : > { %4072 = vmatpush.msra.mxu1 %v7839_v18  ;;  %4185 = vmatpush.msrb.mxu2 %v2232_v41  ;;  %v7848_v18 = vld [vmem:[#allocation29_spill] sm:$0xff]  ;;  %v3635_v27 = vsel %vm1427_vm8, %v4913_v63, %v4914_v53  ;;  %v3522_v63 = vsel %vm1311_vm10, %v4918_v55, %v4919_v30 }
 0x936   : > { %4152 = vmatpush.msrb.mxu3 %v1432_v24  ;;  %v1084_v24 = vsel %vm1079_vm7, %v7847_v58, %v4554_v13  ;;  %v4613_v41 = vunpack.i.l.bf16 %v7848_v18  ;;  %v1779_v25 = vsel %vm7852_vm0, %v4619_v1, %v4623_v7  ;;  %v7315_v1 = vld [vmem:[%s7507_s2] sm:$0xff] }
 0x937   : > { %4073 = vmatpush.msra.mxu1 %v7843_v14  ;;  %4186 = vmatpush.msrb.mxu2 %v2119_v0  ;;  %v3749_v14 = vsel %vm1543_vm11, %v4909_v28, %v4938_v62  ;;  %v7851_v0 = vld [vmem:[#allocation28_spill] sm:$0xff]  ;;  %v4929_v28 = vunpack.i.h.bf16 %v7123_v49 }
 0x938   : > { %4153 = vmatpush.msrb.mxu3 %v1316_v5  ;;  %v7849_v5 = vld [vmem:[#allocation12_spill] sm:$0xff]  ;;  %v4603_v52 = vunpack.i.l.bf16 %v7851_v0  ;;  %v1664_v32 = vsel %vm7854_vm14, %v4579_v57, %v4613_v41  ;;  %v4934_v57 = vunpack.i.h.bf16 %v7131_v26 }
 0x939   : > { %4074 = vmatpush.msra.mxu1 %v7846_v33  ;;  %4187 = vmatpush.msrb.mxu2 %v2006_v50  ;;  %v7300_v33 = vpop.permute.xlu2 %4946  ;;  %v4593_v50 = vunpack.i.l.bf16 %v7855_v45  ;;  %v3296_v8 = vsel %vm1079_vm7, %v4928_v4, %v4929_v28  ;;  %v3970_v4 = vld [vmem:[%s7508_s3] sm:$0xff] }
 0x93a   : > { %4154 = vmatpush.msrb.mxu3 %v1200_v54  ;;  %v4924_v54 = vunpack.i.h.bf16 %v7125_v19  ;;  %v1549_v55 = vsel %vm1543_vm11, %v4574_v39, %v4603_v52  ;;  %v7857_v39 = vld [vmem:[#allocation27_spill] sm:$0xff]  ;;  %v3183_v31 = vsel %vm7858_vm15, %v4933_v23, %v4934_v57 }
 0x93b   : > { %4075 = vmatpush.msra.mxu1 %v7849_v5  ;;  %4188 = vmatpush.msrb.mxu2 %v1893_v38  ;;  %v1433_v38 = vsel %vm1427_vm8, %v4569_v47, %v4598_v56  ;;  %v5070_v47 = vmov 0  }
 0x93c   : > { %4155 = vmatpush.msrb.mxu3 %v1084_v24  ;;  %4076 = vmatmul.f32.vlgmr.msra.gmra.mxu1 %v7315_v1  ;;  %v3409_v58 = vsel %vm1195_vm9, %v4923_v51, %v4924_v54  ;;  %v7856_v24 = vld [vmem:[#allocation25_spill] sm:$0xff]  ;;  %v2949_v51 = vperm.slane %v6999_v35, 4 }
 0x93d   : > { %4167 = vmatpush.msrb.mxu1 %v3748_v22  ;;  %4189 = vmatpush.msrb.mxu2 %v1779_v25  ;;  %v4588_v5 = vunpack.i.l.bf16 %v7856_v24  ;;  %v4583_v22 = vunpack.i.l.bf16 %v7857_v39  ;;  %v4939_v25 = vunpack.i.h.bf16 %v7233_v2 }
 0x93e   : > { %4207 = vmatpush.msra.mxu3 %v3749_v14  ;;  %v1317_v14 = vsel %vm1311_vm10, %v4564_v43, %v4593_v50  ;;  %4965 = vset.pattern.permute.xlu0 %v5070_v47  ;;  %v7859_v43 = vld [vmem:[#allocation59_spill] sm:$0xff]  ;;  %v7869_v47 = vunpack.i.h.bf16 %v7838_v44 }
 0x93f   : > { %4168 = vmatpush.msrb.mxu1 %v3635_v27  ;;  %4156 = vmatmul.f32.vlgmr.msrb.gmra.mxu3 %v7315_v1  ;;  %v1201_v34 = vsel %vm1195_vm9, %v4559_v21, %v4588_v5  ;;  %v7860_v27 = vunpack.i.h.bf16 %v7859_v43  ;;  %v7862_v21 = vld [vmem:[#allocation10_spill] sm:$0xff] }
 0x940   : > { %4190 = vmatpush.msrb.mxu2 %v1664_v32  ;;  %v7861_v32 = vunpack.i.l.bf16 %v7859_v43  ;;  %3973 = vperm.xlu0 %4965, %v3970_v4   ;;  %v2120_v4 = vsel %vm1605_vm5, %v4683_v36, %v7869_v47  ;;  %v7875_v36 = vunpack.i.h.bf16 %v7848_v18  ;;  %vm7876_vm5 = vmmov %vm7828_vm12  ;;  %v7886_v47 = vld [vmem:[#allocation48_spill] sm:$0xff] }
 0x941   : > { %4169 = vmatpush.msrb.mxu1 %v3522_v63  ;;  %v2965_v63 = vmul.f32 %v2949_v51, %v7733_v17  ;;  %v7864_v17 = vld [vmem:[#allocation69_spill] sm:$0xff] }
 0x942   : > { %4191 = vmatpush.msrb.mxu2 %v1549_v55  ;;  %v3070_v23 = vsel %vm2855_vm2, %v7861_v32, %v7860_v27  ;;  %v3743_v55 = vpop.permute.xlu2 %3742  ;;  %v4948_v27 = vunpack.i.l.bf16 %v7300_v33 }
 0x943   : > { %4170 = vmatpush.msrb.mxu1 %v3409_v58  ;;  %v1085_v58 = vsel %vm1079_vm7, %v4554_v13, %v4583_v22  ;;  %v3751_v46 = vsel %vm1543_vm11, %v4939_v25, %v3743_v55  ;;  %v7866_v13 = vld [vmem:[#allocation55_spill] sm:$0xff]  ;;  %v4949_v55 = vunpack.i.h.bf16 %v7300_v33 }
 0x944   : > { %4192 = vmatpush.msrb.mxu2 %v1433_v38  ;;  %v7863_v38 = vld [vmem:[#allocation70_spill] sm:$0xff] }
 0x945   : > { %4171 = vmatpush.msrb.mxu1 %v3296_v8  ;;  %v7867_v8 = vunpack.i.h.bf16 %v7823_v42 }
 0x946   : > { %4193 = vmatpush.msrb.mxu2 %v1317_v14  ;;  %v7868_v14 = vunpack.i.h.bf16 %v7829_v6 }
 0x947   : > { %4172 = vmatpush.msrb.mxu1 %v3183_v31  ;;  %v2346_v51 = vsel %vm1374_vm3, %v4723_v12, %v7867_v8  ;;  %v7871_v12 = vunpack.i.h.bf16 %v7842_v60  ;;  %vm7872_vm3 = vmmov %vm7850_vm13  ;;  %v3524_v8 = vsel %vm1311_vm10, %v4948_v27, %v4949_v55 }
 0x948   : > { %4194 = vmatpush.msrb.mxu2 %v1201_v34  ;;  %v2233_v31 = vsel %vm1490_vm4, %v4703_v40, %v7868_v14  ;;  %v7870_v34 = vunpack.i.h.bf16 %v7837_v16  ;;  %v7873_v40 = vunpack.i.h.bf16 %v7845_v11  ;;  %vm7874_vm4 = vmmov %vm7852_vm0  ;;  %v1665_v16 = vsel %vm7876_vm5, %v4613_v41, %v7875_v36  ;;  %v7891_v36 = vld [vmem:[#allocation67_spill] sm:$0xff] }
 0x949   : > { %4173 = vmatpush.msrb.mxu1 %v3070_v23  ;;  %v1894_v6 = vsel %vm7872_vm3, %v4643_v29, %v7871_v12  ;;  %v7878_v29 = vunpack.i.h.bf16 %v7853_v9  ;;  %v7880_v41 = vunpack.i.h.bf16 %v7856_v24  ;;  %v4952_v9 = vpop.permute.xlu0 %4951  ;;  %v3523_v24 = vsel %vm1311_vm10, %v4919_v30, %v4948_v27 }
 0x94a   : > { %4195 = vmatpush.msrb.mxu2 %v1085_v58  ;;  %v2007_v42 = vsel %vm1720_vm6, %v4663_v61, %v7870_v34  ;;  %v1780_v44 = vsel %vm7874_vm4, %v4623_v7, %v7873_v40  ;;  %v7877_v61 = vunpack.i.h.bf16 %v7851_v0  ;;  %v7879_v7 = vunpack.i.h.bf16 %v7855_v45  ;;  %v3517_v23 = vpop.permute.xlu2 %3516  ;;  %vm7882_vm6 = vmmov %vm7858_vm15 }
 0x94b   : > { %4174 = vmatpush.msrb.mxu1 %v2965_v63  ;;  %4196 = vmatmul.f32.vlgmr.msrb.gmra.mxu2 %v7315_v1  ;;  %v1434_v11 = vsel %vm1427_vm8, %v4598_v56, %v7878_v29  ;;  %v1202_v43 = vsel %vm1195_vm9, %v4588_v5, %v7880_v41  ;;  %v7881_v0 = vunpack.i.h.bf16 %v7857_v39  ;;  %v4953_v32 = vunpack.i.l.bf16 %v4952_v9 }
 0x94c   : > { %4287 = vmatpush.msra.mxu2 %v3751_v46  ;;  %v1550_v60 = vsel %vm1543_vm11, %v4603_v52, %v7877_v61  ;;  %v1318_v18 = vsel %vm1311_vm10, %v4593_v50, %v7879_v7  ;;  %v3525_v46 = vsel %vm1311_vm10, %v4949_v55, %v3517_v23  ;;  %vm7887_vm10 = vmmov %vm7882_vm6 }
 0x94d   : > { %4175 = vmatpush.msrb.mxu1 %v7862_v21  ;;  %v1086_v52 = vsel %vm1079_vm7, %v4583_v22, %v7881_v0  ;;  %v7884_v21 = vld [vmem:[#allocation11_spill] sm:$0xff] }
 0x94e   : > { %4426 = vmatmul.msk.f32.vlgmr.msrb.gmra.mxu1 %vm3976_vm1, %v7025_v15 }
 0x94f   : > { %4220 = vmatpush.msra.mxu1 %v7863_v38 }
 0x951   : > { %4221 = vmatpush.msra.mxu1 %v7864_v17  ;;  %v3174_v5 = vpop.permute.xlu0 %3173 }
 0x952   : > { %v3184_v20 = vsel %vm7882_vm6, %v4934_v57, %v3174_v5  ;;  %v4962_v26 = vpop.permute.xlu2 %4961 }
 0x953   : > { %4222 = vmatpush.msra.mxu1 %v7865_v10  ;;  %v4964_v38 = vunpack.i.h.bf16 %v4962_v26  ;;  %v4963_v17 = vunpack.i.l.bf16 %v4962_v26 }
 0x955   : > { %4223 = vmatpush.msra.mxu1 %v7866_v13 }
 0x957   : > { %4224 = vmatpush.msra.mxu1 %v2346_v51 }
 0x959   : > { %4225 = vmatpush.msra.mxu1 %v2233_v31  ;;  %v3404_v58 = vpop.permute.xlu0 %3403  ;;  %v2951_v31 = vperm.slane %v6999_v35, 6 }
 0x95b   : > { %4226 = vmatpush.msra.mxu1 %v2120_v4  ;;  %v3185_v4 = vsel %vm7887_vm10, %v3174_v5, %v4963_v17 }
 0x95d   : > { %4227 = vmatpush.msra.mxu1 %v2007_v42  ;;  %v7888_v42 = vld [vmem:[#allocation53_spill] sm:$0xff] }
 0x95e   : > { %v7889_v12 = vunpack.i.h.bf16 %v7888_v42 }
 0x95f   : > { %4228 = vmatpush.msra.mxu1 %v1894_v6  ;;  %v7890_v6 = vunpack.i.l.bf16 %v7888_v42 }
 0x961   : > { %4229 = vmatpush.msra.mxu1 %v1780_v44  ;;  %v3072_v40 = vsel %vm2855_vm2, %v7890_v6, %v7889_v12  ;;  %v2967_v44 = vmul.f32 %v2951_v31, %v5500_v3 }
 0x963   : > { %4230 = vmatpush.msra.mxu1 %v1665_v16 }
 0x965   : > { %4231 = vmatpush.msra.mxu1 %v1550_v60  ;;  %v4037_v60 = vpop.f32.mrf.mxu2 }
 0x967   : > { %4232 = vmatpush.msra.mxu1 %v1434_v11 }
 0x969   : > { %4233 = vmatpush.msra.mxu1 %v1318_v18 }
 0x96b   : > { %4234 = vmatpush.msra.mxu1 %v1202_v43 }
 0x96d   : > { %4235 = vmatpush.msra.mxu1 %v1086_v52 }
 0x96e   : > { %4236 = vmatmul.f32.vlgmr.msra.gmra.mxu1 %v7315_v1  ;;  %v3410_v1 = vsel %vm1195_vm9, %v4924_v54, %v4953_v32  ;;  %v7883_v54 = vld [vmem:[#allocation50_spill] sm:$0xff] }
 0x973   : > { %v4942_v56 = vpop.permute.xlu1 %4941 }
 0x974   : > { %v4943_v45 = vunpack.i.l.bf16 %v4942_v56  ;;  %v4944_v19 = vunpack.i.h.bf16 %v4942_v56 }
 0x976   : > { %v3636_v50 = vsel %vm1427_vm8, %v4914_v53, %v4943_v45  ;;  %v2950_v53 = vperm.slane %v6999_v35, 5  ;;  %v3637_v57 = vsel %vm1427_vm8, %v4943_v45, %v4944_v19 }
 0x977   : > { %4208 = vmatpush.msra.mxu3 %v3636_v50 }
 0x978   : > { %v2966_v63 = vmul.f32 %v2950_v53, %v5494_v48  ;;  %v3750_v48 = vsel %vm1543_vm11, %v4938_v62, %v4939_v25  ;;  %v2952_v25 = vperm.slane %v6999_v35, 7  ;;  %v7892_v35 = vld [vmem:[#allocation62_spill] sm:$0xff] }
 0x979   : > { %4209 = vmatpush.msra.mxu3 %v3523_v24 }
 0x97a   : > { %v2968_v34 = vmul.f32 %v2952_v25, %v5569_v59  ;;  %v3997_v59 = vpop.f32.mrf.mxu0 }
 0x97b   : > { %v4957_v39 = vpop.permute.xlu1 %4956  ;;  %4210 = vmatpush.msra.mxu3 %v3410_v1 }
 0x97c   : > { %v4958_v22 = vunpack.i.l.bf16 %v4957_v39  ;;  %v4959_v10 = vunpack.i.h.bf16 %v4957_v39 }
 0x97e   : > { %v3297_v37 = vsel %vm1079_vm7, %v4929_v28, %v4958_v22  ;;  %v4954_v28 = vunpack.i.h.bf16 %v4952_v9  ;;  %v3298_v14 = vsel %vm1079_vm7, %v4958_v22, %v4959_v10 }
 0x97f   : > { %4211 = vmatpush.msra.mxu3 %v3297_v37 }
 0x980   : > { %v3412_v33 = vsel %vm1195_vm9, %v4954_v28, %v3404_v58  ;;  %v3411_v62 = vsel %vm1195_vm9, %v4953_v32, %v4954_v28 }
 0x981   : > { %4212 = vmatpush.msra.mxu3 %v3184_v20 }
 0x982   : > { %v4117_v18 = vpop.f32.mrf.mxu0 }
 0x983   : > { %v3630_v30 = vpop.permute.xlu1 %3629  ;;  %4213 = vmatpush.msra.mxu3 %v7883_v54  ;;  %v4057_v16 = vpop.f32.mrf.mxu3 }
 0x984   : > { %v3638_v49 = vsel %vm1427_vm8, %v4944_v19, %v3630_v30  ;;  %vm7885_vm8 = vmmov %vm7882_vm6 }
 0x985   : > { %4214 = vmatpush.msra.mxu3 %v2966_v63  ;;  %4288 = vmatpush.msra.mxu2 %v3638_v49  ;;  %v3186_v51 = vsel %vm7885_vm8, %v4963_v17, %v4964_v38 }
 0x987   : > { %4215 = vmatpush.msra.mxu3 %v7884_v21  ;;  %4289 = vmatpush.msra.mxu2 %v3525_v46 }
 0x988   : > { %4427 = vmatmul.msk.f32.vlgmr.msra.gmra.mxu3 %vm3976_vm1, %v7025_v15 }
 0x989   : > { %4247 = vmatpush.msrb.mxu3 %v3750_v48  ;;  %4290 = vmatpush.msra.mxu2 %v3412_v33 }
 0x98a   : > { %v4277_v46 = vpop.f32.mrf.mxu0 }
 0x98b   : > { %4248 = vmatpush.msrb.mxu3 %v3637_v57  ;;  %v3291_v13 = vpop.permute.xlu1 %3290 }
 0x98c   : > { %v3299_v2 = vsel %vm1079_vm7, %v4959_v10, %v3291_v13 }
 0x98d   : > { %4249 = vmatpush.msrb.mxu3 %v3524_v8  ;;  %4291 = vmatpush.msra.mxu2 %v3299_v2 }
 0x98f   : > { %4250 = vmatpush.msrb.mxu3 %v3411_v62  ;;  %4292 = vmatpush.msra.mxu2 %v3186_v51 }
 0x991   : > { %4251 = vmatpush.msrb.mxu3 %v3298_v14  ;;  %4293 = vmatpush.msra.mxu2 %v7886_v47 }
 0x993   : > { %4252 = vmatpush.msrb.mxu3 %v3185_v4  ;;  %4294 = vmatpush.msra.mxu2 %v2968_v34 }
 0x995   : > { %4253 = vmatpush.msrb.mxu3 %v3072_v40  ;;  %4295 = vmatpush.msra.mxu2 %v7891_v36 }
 0x996   : > { %4429 = vmatmul.msk.f32.vlgmr.msra.gmra.mxu2 %vm3976_vm1, %v7025_v15 }
 0x997   : > { %4254 = vmatpush.msrb.mxu3 %v2967_v44 }
 0x999   : > { %4255 = vmatpush.msrb.mxu3 %v7892_v35 }
 0x99a   : > { %4428 = vmatmul.msk.f32.vlgmr.msrb.gmra.mxu3 %vm3976_vm1, %v7025_v15 }
 0x99b   : > { %v4017_v61 = vpop.f32.mrf.mxu1 }
 0x9a0   : > { %v4097_v0 = vpop.f32.mrf.mxu3 }
 0x9ad   : > { %v4137_v50 = vpop.f32.mrf.mxu2 }
 0x9b2   : > { %v3974_v29 = vpop.permute.xlu0 %3973 }
 0x9b3   : > { %v4038_v11 = vadd.f32 %v4037_v60, %v3974_v29  ;;  %v3998_v7 = vadd.f32 %v3997_v59, %v3974_v29  ;;  %v4118_v9 = vadd.f32 %v4117_v18, %v3974_v29  ;;  %v4278_v26 = vadd.f32 %v4277_v46, %v3974_v29 }
 0x9b5   : > { %v4058_v3 = vadd.f32 %v4057_v16, %v4038_v11  ;;  %v4018_v41 = vadd.f32 %v4017_v61, %v3998_v7  ;;  %v4138_v1 = vadd.f32 %v4137_v50, %v4118_v9 }
 0x9b7   : > { %vm4301_vm2 = vcmp.gt.f32.partialorder %v4058_v3, 0.0  ;;  %v4309_v15 = vmul.f32 0.1, %v4058_v3  ;;  %vm4300_vm7 = vcmp.gt.f32.partialorder %v4018_v41, 0.0  ;;  %v4308_v56 = vmul.f32 0.1, %v4018_v41 }
 0x9b8   : > { %vm4303_vm11 = vcmp.gt.f32.partialorder %v4138_v1, 0.0  ;;  %v4311_v39 = vmul.f32 0.1, %v4138_v1 }
 0x9b9   : > { %v4077_v43 = vpop.f32.mrf.mxu1  ;;  %v4317_v45 = vsel %vm4301_vm2, %v4058_v3, %v4309_v15  ;;  %v4316_v32 = vsel %vm4300_vm7, %v4018_v41, %v4308_v56 }
 0x9ba   : > { %v4078_v52 = vadd.f32 %v4077_v43, %v3974_v29  ;;  %4325 = vst [vmem:[%s7492_s20 + $0x8] sm:$0xff] %v4317_v45  ;;  %v4319_v22 = vsel %vm4303_vm11, %v4138_v1, %v4311_v39 }
 0x9bb   : > { %4324 = vst [vmem:[%s7492_s20] sm:$0xff] %v4316_v32 }
 0x9bc   : > { %v4098_v27 = vadd.f32 %v4097_v0, %v4078_v52  ;;  %4327 = vst [vmem:[%s7492_s20 + $0x18] sm:$0xff] %v4319_v22 }
 0x9be   : > { %vm4302_vm9 = vcmp.gt.f32.partialorder %v4098_v27, 0.0  ;;  %v4310_v24 = vmul.f32 0.1, %v4098_v27 }
 0x9c0   : > { %v4318_v5 = vsel %vm4302_vm9, %v4098_v27, %v4310_v24 }
 0x9c1   : > { %4326 = vst [vmem:[%s7492_s20 + $0x10] sm:$0xff] %v4318_v5 }
 0x9c2   : > { %v4157_v23 = vpop.f32.mrf.mxu3 }
 0x9c3   : > { %v4158_v37 = vadd.f32 %v4157_v23, %v3974_v29 }
 0x9cb   : > { %v4177_v53 = vpop.f32.mrf.mxu1 }
 0x9cc   : > { %v4178_v20 = vadd.f32 %v4177_v53, %v4158_v37 }
 0x9ce   : > { %vm4304_vm1 = vcmp.gt.f32.partialorder %v4178_v20, 0.0  ;;  %v4312_v19 = vmul.f32 0.1, %v4178_v20  ;;  %v4197_v54 = vpop.f32.mrf.mxu2 }
 0x9cf   : > { %v4198_v63 = vadd.f32 %v4197_v54, %v3974_v29 }
 0x9d0   : > { %v4320_v30 = vsel %vm4304_vm1, %v4178_v20, %v4312_v19 }
 0x9d1   : > { %4328 = vst [vmem:[%s7492_s20 + $0x20] sm:$0xff] %v4320_v30 }
 0x9eb   : > { %v4237_v21 = vpop.f32.mrf.mxu1 }
 0x9ec   : > { %v4238_v48 = vadd.f32 %v4237_v21, %v3974_v29 }
 0xa0b   : > { %v4217_v55 = vpop.f32.mrf.mxu3 }
 0xa0c   : > { %v4218_v49 = vadd.f32 %v4217_v55, %v4198_v63 }
 0xa0e   : > { %vm4305_vm12 = vcmp.gt.f32.partialorder %v4218_v49, 0.0  ;;  %v4313_v58 = vmul.f32 0.1, %v4218_v49 }
 0xa10   : > { %v4321_v28 = vsel %vm4305_vm12, %v4218_v49, %v4313_v58 }
 0xa11   : > { %4329 = vst [vmem:[%s7492_s20 + $0x28] sm:$0xff] %v4321_v28 }
 0xa19   : > { %v4297_v33 = vpop.f32.mrf.mxu2 }
 0xa1a   : > { %v4298_v57 = vadd.f32 %v4297_v33, %v4278_v26 }
 0xa1c   : > { %vm4307_vm13 = vcmp.gt.f32.partialorder %v4298_v57, 0.0  ;;  %v4315_v38 = vmul.f32 0.1, %v4298_v57 }
 0xa1d   : > { %v4257_v17 = vpop.f32.mrf.mxu3 }
 0xa1e   : > { %v4258_v10 = vadd.f32 %v4257_v17, %v4238_v48  ;;  %v4323_v13 = vsel %vm4307_vm13, %v4298_v57, %v4315_v38 }
 0xa1f   : > { %4331 = vst [vmem:[%s7492_s20 + $0x38] sm:$0xff] %v4323_v13 }
 0xa20   : > { %vm4306_vm0 = vcmp.gt.f32.partialorder %v4258_v10, 0.0  ;;  %v4314_v8 = vmul.f32 0.1, %v4258_v10 }
 0xa22   : > { %v4322_v2 = vsel %vm4306_vm0, %v4258_v10, %v4314_v8 }
 0xa23   : > { %4330 = vst [vmem:[%s7492_s20 + $0x30] sm:$0xff] %v4322_v2 }
 0xa24 PF: > { %s17_s18 = sadd.s32 1, %s5045_s18  }
 0xa25   : > { %p14_p7 = scmp.ge.s32.totalorder %s17_s18, 4  }
 0xa27   :  { %16 = sbr.rel (!%p14_p7) target bundleno = 2 (0x2), region = 83 }
 0xa2c   :  { %4353 = vsyncpa [#allocation5], 1 }
 0xa2d   :  { %4355 = vsyncpa [#allocation5 + $0x1], 1 }
 0xa2e   :  { %4356 = vsyncpa [#allocation7], 1 }

</bundles_post_ra>
